<compile_context>
chip_gen: v7x
topology: tpu7x:2x2x1
jax: 0.10.0
libtpu: 0.0.40
codegen_flags: <defaults>
</compile_context>

<pallas_src>
import functools

import jax
import jax.numpy as jnp
from jax import lax
from jax.experimental import pallas as pl
from jax.experimental.pallas import tpu as pltpu

NEG_INF = jnp.finfo(jnp.float32).min   # matches torch.finfo(torch.float32).min
NEG_CLAMP = -1e30                      # in-kernel guard against -inf / NaN softmax


# ----------------------------- Pallas kernels -----------------------------

def _mha_block_kernel(xq_ref, xk_ref, xv_ref, res_ref, mask_ref,
                      wq_ref, bq_ref, wk_ref, bk_ref, wv_ref, bv_ref,
                      wo_ref, bo_ref, g_ref, be_ref,
                      o_ref, *w_out_ref, nh, scale, eps):
    """Fused MHA block for one batch element: QKV -> attention -> o-proj -> +res -> LN."""
    bf = jnp.bfloat16
    xq = xq_ref[0]            # [Tq, H] f32
    xk = xk_ref[0]            # [Tk, H] f32
    xv = xv_ref[0]            # [Tk, H] f32
    res = res_ref[0]          # [Tq, H] f32
    mask = mask_ref[0, 0]     # [1|Tq, Tk] additive mask

    q = jnp.dot(xq.astype(bf), wq_ref[...], preferred_element_type=jnp.float32) + bq_ref[...]
    k = jnp.dot(xk.astype(bf), wk_ref[...], preferred_element_type=jnp.float32) + bk_ref[...]
    v = jnp.dot(xv.astype(bf), wv_ref[...], preferred_element_type=jnp.float32) + bv_ref[...]

    H = q.shape[-1]
    dh = H // nh

    # Accumulate the output projection per head: ctx @ Wo == sum_h ctx_h @ Wo[h-rows].
    acc = jnp.zeros_like(res)
    for h in range(nh):
        qh = q[:, h * dh:(h + 1) * dh].astype(bf)
        kh = k[:, h * dh:(h + 1) * dh].astype(bf)
        vh = v[:, h * dh:(h + 1) * dh].astype(bf)
        # q @ k^T via dot_general (contract last dims) — no explicit transpose.
        s = lax.dot_general(qh, kh, (((1,), (1,)), ((), ())),
                            preferred_element_type=jnp.float32)
        s = s * scale + mask
        s = jnp.maximum(s, NEG_CLAMP)               # guard fully-masked rows
        s = s - jnp.max(s, axis=-1, keepdims=True)
        e = jnp.exp(s)
        p = e * pl.reciprocal(jnp.sum(e, axis=-1, keepdims=True), approx=True)
        if w_out_ref:                               # only last layer emits weights
            w_out_ref[0][0, h, :, :] = p
        ctx_h = jnp.dot(p.astype(bf), vh, preferred_element_type=jnp.float32)
        acc = acc + jnp.dot(ctx_h.astype(bf), wo_ref[h * dh:(h + 1) * dh, :],
                            preferred_element_type=jnp.float32)

    x = acc + bo_ref[...] + res                     # o-proj bias + residual
    mu = jnp.mean(x, axis=-1, keepdims=True)
    var = jnp.mean((x - mu) ** 2, axis=-1, keepdims=True)
    o_ref[0] = (x - mu) * lax.rsqrt(var + eps) * g_ref[...] + be_ref[...]


def _ffn_block_kernel(x_ref, w1_ref, b1_ref, w2_ref, b2_ref, g_ref, be_ref,
                      o_ref, *, eps):
    """Fused FFN block: fc1 + ReLU + fc2 + residual + LayerNorm (one batch element)."""
    bf = jnp.bfloat16
    x = x_ref[0]              # [T, H] f32 (also the residual)
    t = jnp.dot(x.astype(bf), w1_ref[...], preferred_element_type=jnp.float32) + b1_ref[...]
    t = jnp.maximum(t, 0.0)
    y = jnp.dot(t.astype(bf), w2_ref[...], preferred_element_type=jnp.float32) + b2_ref[...]
    z = y + x
    mu = jnp.mean(z, axis=-1, keepdims=True)
    var = jnp.mean((z - mu) ** 2, axis=-1, keepdims=True)
    o_ref[0] = (z - mu) * lax.rsqrt(var + eps) * g_ref[...] + be_ref[...]


def _linear_kernel(x_ref, w_ref, b_ref, o_ref, acc_ref):
    """Tiled y = x @ w + b with f32 VMEM accumulator (k is the reduction axis)."""
    @pl.when(pl.program_id(2) == 0)
    def _():
        acc_ref[...] = jnp.zeros_like(acc_ref)
    acc_ref[...] += jnp.dot(x_ref[...].astype(jnp.bfloat16), w_ref[...],
                            preferred_element_type=jnp.float32)
    @pl.when(pl.program_id(2) == pl.num_programs(2) - 1)
    def _():
        o_ref[...] = acc_ref[...] + b_ref[...]


# ------------------------------ Pallas wrappers ------------------------------

def pallas_mha(p, xq, xk, xv, res, mask, gamma, beta, nh,
               return_weights=False, eps=1e-5):
    B, Tq, H = xq.shape
    Tk = xk.shape[1]
    Tqm = mask.shape[2]
    dh = H // nh
    scale = 1.0 / (dh ** 0.5)
    kern = functools.partial(_mha_block_kernel, nh=nh, scale=scale, eps=eps)
    vec = lambda a: a.reshape(1, -1)

    in_specs = [
        pl.BlockSpec((1, Tq, H), lambda b: (b, 0, 0)),        # xq
        pl.BlockSpec((1, Tk, H), lambda b: (b, 0, 0)),        # xk
        pl.BlockSpec((1, Tk, H), lambda b: (b, 0, 0)),        # xv
        pl.BlockSpec((1, Tq, H), lambda b: (b, 0, 0)),        # residual
        pl.BlockSpec((1, 1, Tqm, Tk), lambda b: (b, 0, 0, 0)),  # mask
        pl.BlockSpec((H, H), lambda b: (0, 0)),               # wq
        pl.BlockSpec((1, H), lambda b: (0, 0)),               # bq
        pl.BlockSpec((H, H), lambda b: (0, 0)),               # wk
        pl.BlockSpec((1, H), lambda b: (0, 0)),               # bk
        pl.BlockSpec((H, H), lambda b: (0, 0)),               # wv
        pl.BlockSpec((1, H), lambda b: (0, 0)),               # bv
        pl.BlockSpec((H, H), lambda b: (0, 0)),               # wo
        pl.BlockSpec((1, H), lambda b: (0, 0)),               # bo
        pl.BlockSpec((1, H), lambda b: (0, 0)),               # gamma
        pl.BlockSpec((1, H), lambda b: (0, 0)),               # beta
    ]
    out_specs = [pl.BlockSpec((1, Tq, H), lambda b: (b, 0, 0))]
    out_shape = [jax.ShapeDtypeStruct((B, Tq, H), jnp.float32)]
    if return_weights:
        out_specs.append(pl.BlockSpec((1, nh, Tq, Tk), lambda b: (b, 0, 0, 0)))
        out_shape.append(jax.ShapeDtypeStruct((B, nh, Tq, Tk), jnp.float32))

    outs = pl.pallas_call(
        kern,
        grid=(B,),
        in_specs=in_specs,
        out_specs=out_specs,
        out_shape=out_shape,
        compiler_params=pltpu.CompilerParams(dimension_semantics=("parallel",)),
    )(xq, xk, xv, res, mask,
      p["wq"], vec(p["bq"]), p["wk"], vec(p["bk"]),
      p["wv"], vec(p["bv"]), p["wo"], vec(p["bo"]),
      vec(gamma), vec(beta))
    if return_weights:
        return outs[0], outs[1]
    return outs[0], None


def pallas_ffn(x, w1, b1, w2, b2, gamma, beta, eps=1e-5):
    B, T, H = x.shape
    F = w1.shape[1]
    kern = functools.partial(_ffn_block_kernel, eps=eps)
    return pl.pallas_call(
        kern,
        grid=(B,),
        in_specs=[
            pl.BlockSpec((1, T, H), lambda b: (b, 0, 0)),
            pl.BlockSpec((H, F), lambda b: (0, 0)),
            pl.BlockSpec((1, F), lambda b: (0, 0)),
            pl.BlockSpec((F, H), lambda b: (0, 0)),
            pl.BlockSpec((1, H), lambda b: (0, 0)),
            pl.BlockSpec((1, H), lambda b: (0, 0)),
            pl.BlockSpec((1, H), lambda b: (0, 0)),
        ],
        out_specs=pl.BlockSpec((1, T, H), lambda b: (b, 0, 0)),
        out_shape=jax.ShapeDtypeStruct((B, T, H), jnp.float32),
        compiler_params=pltpu.CompilerParams(dimension_semantics=("parallel",)),
    )(x, w1, b1.reshape(1, F), w2, b2.reshape(1, H),
      gamma.reshape(1, H), beta.reshape(1, H))


def pallas_linear(x2d, w, b):
    """Tiled, pipelined y = x @ w + b (used for the final vocab projection)."""
    M, K = x2d.shape
    N = w.shape[1]
    # Tiles sized with v7x's smaller VMEM budget in mind; full dim when small.
    tm = M if M <= 256 else 256
    tn = N if N <= 256 else 256
    tk = K if K <= 512 else 512
    assert M % tm == 0 and N % tn == 0 and K % tk == 0
    grid = (M // tm, N // tn, K // tk)
    return pl.pallas_call(
        _linear_kernel,
        grid=grid,
        in_specs=[
            pl.BlockSpec((tm, tk), lambda i, j, k: (i, k)),
            pl.BlockSpec((tk, tn), lambda i, j, k: (k, j)),
            pl.BlockSpec((1, tn), lambda i, j, k: (0, j)),
        ],
        out_specs=pl.BlockSpec((tm, tn), lambda i, j, k: (i, j)),
        out_shape=jax.ShapeDtypeStruct((M, N), jnp.float32),
        scratch_shapes=[pltpu.VMEM((tm, tn), jnp.float32)],
        compiler_params=pltpu.CompilerParams(
            dimension_semantics=("parallel", "parallel", "arbitrary")),
    )(x2d, w, b.reshape(1, N))


# --------------------------- model building blocks ---------------------------

def encoder_layer(p, h, pos, mask, nh, return_weights):
    qk = h + pos
    h1, w = pallas_mha(p["self_attn"], qk, qk, h, h, mask,
                       p["ln1_g"], p["ln1_b"], nh, return_weights)
    h2 = pallas_ffn(h1, p["fc1_w"], p["fc1_b"], p["fc2_w"], p["fc2_b"],
                    p["ln2_g"], p["ln2_b"])
    return h2, w


def decoder_layer(p, h, pos, self_mask, enc_h, enc_pos, cross_mask, nh,
                  return_weights):
    qk = h + pos
    h1, _ = pallas_mha(p["self_attn"], qk, qk, h, h, self_mask,
                       p["ln1_g"], p["ln1_b"], nh, False)
    q_in = h1 + pos
    k_in = enc_h + enc_pos
    h2, cw = pallas_mha(p["cross_attn"], q_in, k_in, enc_h, h1, cross_mask,
                        p["ln2_g"], p["ln2_b"], nh, return_weights)
    h3 = pallas_ffn(h2, p["fc1_w"], p["fc1_b"], p["fc2_w"], p["fc2_b"],
                    p["ln3_g"], p["ln3_b"])
    return h3, cw


def apply_causal_mask(mask):
    # mirrors the PyTorch helper: [B, T] -> [B, 1, T, T]
    n = mask.shape[1]
    causal = jnp.tril(jnp.ones((n, n), jnp.float32))
    m = mask.astype(jnp.float32)[:, None, None, :]
    return jnp.minimum(m, causal)


def transformer_forward(params, input_ids, input_mask, target_ids, target_mask, nh):
    B, Ti = input_ids.shape
    Tt = target_ids.shape[1]
    H = params["tok_emb"].shape[1]

    tgt_mask = apply_causal_mask(target_mask)                              # [B,1,Tt,Tt]
    tgt_mask = (1.0 - tgt_mask) * NEG_INF
    inp_mask = (1.0 - input_mask[:, None, None, :].astype(jnp.float32)) * NEG_INF  # [B,1,1,Ti]

    inp_h = params["tok_emb"][input_ids]                                   # [B,Ti,H]
    tgt_h = params["tok_emb"][target_ids]                                  # [B,Tt,H]
    inp_pos = jnp.broadcast_to(params["pos_emb"][None, :Ti, :], (B, Ti, H))
    tgt_pos = jnp.broadcast_to(params["pos_emb"][None, :Tt, :], (B, Tt, H))

    # Encoder stack (attention weights only stored for the last layer)
    h = inp_h
    enc_w = None
    n_enc = len(params["encoder"])
    for i, lp in enumerate(params["encoder"]):
        h, w = encoder_layer(lp, h, inp_pos, inp_mask, nh,
                             return_weights=(i == n_enc - 1))
        if w is not None:
            enc_w = w
    enc_out = h

    # Decoder stack (cross-attn weights only stored for the last layer)
    h = tgt_h
    dec_w = None
    n_dec = len(params["decoder"])
    for i, lp in enumerate(params["decoder"]):
        h, w = decoder_layer(lp, h, tgt_pos, tgt_mask,
                             enc_out, inp_pos, inp_mask, nh,
                             return_weights=(i == n_dec - 1))
        if w is not None:
            dec_w = w

    logits = pallas_linear(h.reshape(B * Tt, H),
                           params["final_w"], params["final_b"]).reshape(B, Tt, -1)
    return logits, enc_w, dec_w


# ------------------------------- parameters -------------------------------

def init_params(key, vocab, H, nh, ffn, layers, max_pos):
    keys = jax.random.split(key, 4 + 2 * layers)

    def dense(k, din, dout):
        # weights stored bf16 (MXU operands), biases f32
        w = 0.02 * jax.random.normal(k, (din, dout), jnp.float32)
        return w.astype(jnp.bfloat16), jnp.zeros((dout,), jnp.float32)

    def attn_params(k):
        ks = jax.random.split(k, 4)
        wq, bq = dense(ks[0], H, H)
        wk, bk = dense(ks[1], H, H)
        wv, bv = dense(ks[2], H, H)
        wo, bo = dense(ks[3], H, H)
        return dict(wq=wq, bq=bq, wk=wk, bk=bk, wv=wv, bv=bv, wo=wo, bo=bo)

    def enc_layer_params(k):
        ks = jax.random.split(k, 3)
        fc1_w, fc1_b = dense(ks[1], H, ffn)
        fc2_w, fc2_b = dense(ks[2], ffn, H)
        return dict(self_attn=attn_params(ks[0]),
                    fc1_w=fc1_w, fc1_b=fc1_b, fc2_w=fc2_w, fc2_b=fc2_b,
                    ln1_g=jnp.ones((H,), jnp.float32), ln1_b=jnp.zeros((H,), jnp.float32),
                    ln2_g=jnp.ones((H,), jnp.float32), ln2_b=jnp.zeros((H,), jnp.float32))

    def dec_layer_params(k):
        ks = jax.random.split(k, 4)
        fc1_w, fc1_b = dense(ks[2], H, ffn)
        fc2_w, fc2_b = dense(ks[3], ffn, H)
        return dict(self_attn=attn_params(ks[0]), cross_attn=attn_params(ks[1]),
                    fc1_w=fc1_w, fc1_b=fc1_b, fc2_w=fc2_w, fc2_b=fc2_b,
                    ln1_g=jnp.ones((H,), jnp.float32), ln1_b=jnp.zeros((H,), jnp.float32),
                    ln2_g=jnp.ones((H,), jnp.float32), ln2_b=jnp.zeros((H,), jnp.float32),
                    ln3_g=jnp.ones((H,), jnp.float32), ln3_b=jnp.zeros((H,), jnp.float32))

    tok_emb = 0.02 * jax.random.normal(keys[0], (vocab, H), jnp.float32)
    pos_emb = 0.02 * jax.random.normal(keys[1], (max_pos, H), jnp.float32)
    final_w, final_b = dense(keys[2], H, vocab)
    enc = [enc_layer_params(keys[4 + i]) for i in range(layers)]
    dec = [dec_layer_params(keys[4 + layers + i]) for i in range(layers)]
    return dict(tok_emb=tok_emb, pos_emb=pos_emb,
                final_w=final_w, final_b=final_b, encoder=enc, decoder=dec)


# ---------------------------------- main ----------------------------------

if __name__ == "__main__":
    B, Ti, Tt = 2, 8, 8
    H, nh, ffn, vocab, layers, max_pos = 32, 4, 64, 64, 2, 16

    root = jax.random.PRNGKey(0)
    kp, ki, kt = jax.random.split(root, 3)

    params = init_params(kp, vocab, H, nh, ffn, layers, max_pos)

    input_ids = jax.random.randint(ki, (B, Ti), 0, vocab, dtype=jnp.int32)
    target_ids = jax.random.randint(kt, (B, Tt), 0, vocab, dtype=jnp.int32)
    # padding masks: 1 = keep, 0 = pad
    input_mask = jnp.ones((B, Ti), jnp.float32).at[1, 6:].set(0.0)
    target_mask = jnp.ones((B, Tt), jnp.float32).at[0, 7:].set(0.0)

    fwd = jax.jit(transformer_forward, static_argnums=(5,))
    logits, enc_w, dec_w = fwd(params, input_ids, input_mask,
                               target_ids, target_mask, nh)
    jax.block_until_ready(logits)

    assert logits.shape == (B, Tt, vocab)
    assert enc_w.shape == (B, nh, Ti, Ti)
    assert dec_w.shape == (B, nh, Tt, Ti)
    assert bool(jnp.all(jnp.isfinite(logits)))
    assert bool(jnp.all(jnp.isfinite(enc_w))) and bool(jnp.all(jnp.isfinite(dec_w)))
    print("KERNEL_OK")
</pallas_src>

<mosaic_0001>
module attributes {stable_mosaic.version = 11 : i64} {
  func.func @_ffn_block_kernel(%arg0: i32, %arg1: memref<1x8x32xf32, #tpu.memory_space<vmem>>, %arg2: memref<32x64xbf16, #tpu.memory_space<vmem>>, %arg3: memref<1x64xf32, #tpu.memory_space<vmem>>, %arg4: memref<64x32xbf16, #tpu.memory_space<vmem>>, %arg5: memref<1x32xf32, #tpu.memory_space<vmem>>, %arg6: memref<1x32xf32, #tpu.memory_space<vmem>>, %arg7: memref<1x32xf32, #tpu.memory_space<vmem>>, %arg8: memref<1x8x32xf32, #tpu.memory_space<vmem>>) attributes {dimension_semantics = [#tpu.dimension_semantics<parallel>], iteration_bounds = array<i64: 2>, scalar_prefetch = 0 : i64, scratch_operands = 0 : i64, tpu.core_type = #tpu.core_type<tc>, window_params = [{transform_indices = @transform_0, window_bounds = array<i64: 1, 8, 32>}, {pipeline_mode = #tpu.pipeline_mode<synchronous>, transform_indices = @transform_1, window_bounds = array<i64: 32, 64>}, {pipeline_mode = #tpu.pipeline_mode<synchronous>, transform_indices = @transform_2, window_bounds = array<i64: 1, 64>}, {pipeline_mode = #tpu.pipeline_mode<synchronous>, transform_indices = @transform_3, window_bounds = array<i64: 64, 32>}, {pipeline_mode = #tpu.pipeline_mode<synchronous>, transform_indices = @transform_4, window_bounds = array<i64: 1, 32>}, {pipeline_mode = #tpu.pipeline_mode<synchronous>, transform_indices = @transform_5, window_bounds = array<i64: 1, 32>}, {pipeline_mode = #tpu.pipeline_mode<synchronous>, transform_indices = @transform_6, window_bounds = array<i64: 1, 32>}, {transform_indices = @transform_7, window_bounds = array<i64: 1, 8, 32>}]} {
    %c0 = arith.constant 0 : index
    %c0_0 = arith.constant 0 : index
    %c0_1 = arith.constant 0 : index
    %0 = vector.load %arg1[%c0, %c0_0, %c0_1] : memref<1x8x32xf32, #tpu.memory_space<vmem>>, vector<1x8x32xf32>
    %1 = vector.shape_cast %0 : vector<1x8x32xf32> to vector<8x32xf32>
    %2 = arith.truncf %1 : vector<8x32xf32> to vector<8x32xbf16>
    %c0_2 = arith.constant 0 : index
    %c0_3 = arith.constant 0 : index
    %3 = vector.load %arg2[%c0_2, %c0_3] : memref<32x64xbf16, #tpu.memory_space<vmem>>, vector<32x64xbf16>
    %cst = arith.constant dense<0.000000e+00> : vector<8x64xf32>
    %4 = tpu.matmul %2, %3, %cst {dimension_numbers = #tpu.dot_dimension_numbers<[1], [0], [0], [1], [0, 0, 1, 1], [], []>} : vector<8x32xbf16>, vector<32x64xbf16>, vector<8x64xf32> -> vector<8x64xf32>
    %c0_4 = arith.constant 0 : index
    %c0_5 = arith.constant 0 : index
    %5 = vector.load %arg3[%c0_4, %c0_5] : memref<1x64xf32, #tpu.memory_space<vmem>>, vector<1x64xf32>
    %6 = vector.broadcast %5 : vector<1x64xf32> to vector<8x64xf32>
    %7 = arith.addf %4, %6 : vector<8x64xf32>
    %cst_6 = arith.constant 0.000000e+00 : f32
    %8 = vector.broadcast %cst_6 : f32 to vector<8x64xf32>
    %9 = arith.maximumf %7, %8 : vector<8x64xf32>
    %10 = arith.truncf %9 : vector<8x64xf32> to vector<8x64xbf16>
    %c0_7 = arith.constant 0 : index
    %c0_8 = arith.constant 0 : index
    %11 = vector.load %arg4[%c0_7, %c0_8] : memref<64x32xbf16, #tpu.memory_space<vmem>>, vector<64x32xbf16>
    %cst_9 = arith.constant dense<0.000000e+00> : vector<8x32xf32>
    %12 = tpu.matmul %10, %11, %cst_9 {dimension_numbers = #tpu.dot_dimension_numbers<[1], [0], [0], [1], [0, 0, 1, 1], [], []>} : vector<8x64xbf16>, vector<64x32xbf16>, vector<8x32xf32> -> vector<8x32xf32>
    %c0_10 = arith.constant 0 : index
    %c0_11 = arith.constant 0 : index
    %13 = vector.load %arg5[%c0_10, %c0_11] : memref<1x32xf32, #tpu.memory_space<vmem>>, vector<1x32xf32>
    %14 = vector.broadcast %13 : vector<1x32xf32> to vector<8x32xf32>
    %15 = arith.addf %12, %14 : vector<8x32xf32>
    %16 = arith.addf %15, %1 : vector<8x32xf32>
    %cst_12 = arith.constant dense<0.000000e+00> : vector<8xf32>
    %17 = vector.multi_reduction <add>, %16, %cst_12 [1] : vector<8x32xf32> to vector<8xf32>
    %18 = vector.shape_cast %17 : vector<8xf32> to vector<8x1xf32>
    %cst_13 = arith.constant 3.200000e+01 : f32
    %19 = vector.broadcast %cst_13 : f32 to vector<8x1xf32>
    %20 = arith.divf %18, %19 : vector<8x1xf32>
    %21 = vector.broadcast %20 : vector<8x1xf32> to vector<8x32xf32>
    %22 = arith.subf %16, %21 : vector<8x32xf32>
    %23 = arith.mulf %22, %22 : vector<8x32xf32>
    %cst_14 = arith.constant dense<0.000000e+00> : vector<8xf32>
    %24 = vector.multi_reduction <add>, %23, %cst_14 [1] : vector<8x32xf32> to vector<8xf32>
    %25 = vector.shape_cast %24 : vector<8xf32> to vector<8x1xf32>
    %cst_15 = arith.constant 3.200000e+01 : f32
    %26 = vector.broadcast %cst_15 : f32 to vector<8x1xf32>
    %27 = arith.divf %25, %26 : vector<8x1xf32>
    %28 = vector.broadcast %20 : vector<8x1xf32> to vector<8x32xf32>
    %29 = arith.subf %16, %28 : vector<8x32xf32>
    %cst_16 = arith.constant 9.99999974E-6 : f32
    %30 = vector.broadcast %cst_16 : f32 to vector<8x1xf32>
    %31 = arith.addf %27, %30 : vector<8x1xf32>
    %32 = math.rsqrt %31 : vector<8x1xf32>
    %33 = vector.broadcast %32 : vector<8x1xf32> to vector<8x32xf32>
    %34 = arith.mulf %29, %33 : vector<8x32xf32>
    %c0_17 = arith.constant 0 : index
    %c0_18 = arith.constant 0 : index
    %35 = vector.load %arg6[%c0_17, %c0_18] : memref<1x32xf32, #tpu.memory_space<vmem>>, vector<1x32xf32>
    %36 = vector.broadcast %35 : vector<1x32xf32> to vector<8x32xf32>
    %37 = arith.mulf %34, %36 : vector<8x32xf32>
    %c0_19 = arith.constant 0 : index
    %c0_20 = arith.constant 0 : index
    %38 = vector.load %arg7[%c0_19, %c0_20] : memref<1x32xf32, #tpu.memory_space<vmem>>, vector<1x32xf32>
    %39 = vector.broadcast %38 : vector<1x32xf32> to vector<8x32xf32>
    %40 = arith.addf %37, %39 : vector<8x32xf32>
    %c0_21 = arith.constant 0 : index
    %c0_22 = arith.constant 0 : index
    %c0_23 = arith.constant 0 : index
    %41 = vector.load %arg8[%c0_21, %c0_22, %c0_23] : memref<1x8x32xf32, #tpu.memory_space<vmem>>, vector<1x8x32xf32>
    %42 = vector.shape_cast %41 : vector<1x8x32xf32> to vector<8x32xf32>
    %43 = vector.shape_cast %40 : vector<8x32xf32> to vector<1x8x32xf32>
    tpu.vector_store %arg8[%c0_21, %c0_22, %c0_23], %43 {strides = array<i32>} : memref<1x8x32xf32, #tpu.memory_space<vmem>>, vector<1x8x32xf32>,
    return
  }
  func.func @transform_0(%arg0: i32) -> (i32, i32, i32) {
    %c0_i32 = arith.constant 0 : i32
    %c0_i32_0 = arith.constant 0 : i32
    %c0_i32_1 = arith.constant 0 : i32
    return %arg0, %c0_i32, %c0_i32_0 : i32, i32, i32
  }
  func.func @transform_1(%arg0: i32) -> (i32, i32) {
    %c0_i32 = arith.constant 0 : i32
    %c0_i32_0 = arith.constant 0 : i32
    %c0_i32_1 = arith.constant 0 : i32
    return %c0_i32, %c0_i32_0 : i32, i32
  }
  func.func @transform_2(%arg0: i32) -> (i32, i32) {
    %c0_i32 = arith.constant 0 : i32
    %c0_i32_0 = arith.constant 0 : i32
    %c0_i32_1 = arith.constant 0 : i32
    return %c0_i32, %c0_i32_0 : i32, i32
  }
  func.func @transform_3(%arg0: i32) -> (i32, i32) {
    %c0_i32 = arith.constant 0 : i32
    %c0_i32_0 = arith.constant 0 : i32
    %c0_i32_1 = arith.constant 0 : i32
    return %c0_i32, %c0_i32_0 : i32, i32
  }
  func.func @transform_4(%arg0: i32) -> (i32, i32) {
    %c0_i32 = arith.constant 0 : i32
    %c0_i32_0 = arith.constant 0 : i32
    %c0_i32_1 = arith.constant 0 : i32
    return %c0_i32, %c0_i32_0 : i32, i32
  }
  func.func @transform_5(%arg0: i32) -> (i32, i32) {
    %c0_i32 = arith.constant 0 : i32
    %c0_i32_0 = arith.constant 0 : i32
    %c0_i32_1 = arith.constant 0 : i32
    return %c0_i32, %c0_i32_0 : i32, i32
  }
  func.func @transform_6(%arg0: i32) -> (i32, i32) {
    %c0_i32 = arith.constant 0 : i32
    %c0_i32_0 = arith.constant 0 : i32
    %c0_i32_1 = arith.constant 0 : i32
    return %c0_i32, %c0_i32_0 : i32, i32
  }
  func.func @transform_7(%arg0: i32) -> (i32, i32, i32) {
    %c0_i32 = arith.constant 0 : i32
    %c0_i32_0 = arith.constant 0 : i32
    %c0_i32_1 = arith.constant 0 : i32
    return %arg0, %c0_i32, %c0_i32_0 : i32, i32, i32
  }
}

module attributes {stable_mosaic.version = 11 : i64} {
  func.func @_mha_block_kernel(%arg0: i32, %arg1: memref<1x8x32xf32, #tpu.memory_space<vmem>>, %arg2: memref<1x8x32xf32, #tpu.memory_space<vmem>>, %arg3: memref<1x8x32xf32, #tpu.memory_space<vmem>>, %arg4: memref<1x8x32xf32, #tpu.memory_space<vmem>>, %arg5: memref<1x1x1x8xf32, #tpu.memory_space<vmem>>, %arg6: memref<32x32xbf16, #tpu.memory_space<vmem>>, %arg7: memref<1x32xf32, #tpu.memory_space<vmem>>, %arg8: memref<32x32xbf16, #tpu.memory_space<vmem>>, %arg9: memref<1x32xf32, #tpu.memory_space<vmem>>, %arg10: memref<32x32xbf16, #tpu.memory_space<vmem>>, %arg11: memref<1x32xf32, #tpu.memory_space<vmem>>, %arg12: memref<32x32xbf16, #tpu.memory_space<vmem>>, %arg13: memref<1x32xf32, #tpu.memory_space<vmem>>, %arg14: memref<1x32xf32, #tpu.memory_space<vmem>>, %arg15: memref<1x32xf32, #tpu.memory_space<vmem>>, %arg16: memref<1x8x32xf32, #tpu.memory_space<vmem>>) attributes {dimension_semantics = [#tpu.dimension_semantics<parallel>], iteration_bounds = array<i64: 2>, scalar_prefetch = 0 : i64, scratch_operands = 0 : i64, tpu.core_type = #tpu.core_type<tc>, window_params = [{transform_indices = @transform_0, window_bounds = array<i64: 1, 8, 32>}, {transform_indices = @transform_1, window_bounds = array<i64: 1, 8, 32>}, {transform_indices = @transform_2, window_bounds = array<i64: 1, 8, 32>}, {transform_indices = @transform_3, window_bounds = array<i64: 1, 8, 32>}, {transform_indices = @transform_4, window_bounds = array<i64: 1, 1, 1, 8>}, {pipeline_mode = #tpu.pipeline_mode<synchronous>, transform_indices = @transform_5, window_bounds = array<i64: 32, 32>}, {pipeline_mode = #tpu.pipeline_mode<synchronous>, transform_indices = @transform_6, window_bounds = array<i64: 1, 32>}, {pipeline_mode = #tpu.pipeline_mode<synchronous>, transform_indices = @transform_7, window_bounds = array<i64: 32, 32>}, {pipeline_mode = #tpu.pipeline_mode<synchronous>, transform_indices = @transform_8, window_bounds = array<i64: 1, 32>}, {pipeline_mode = #tpu.pipeline_mode<synchronous>, transform_indices = @transform_9, window_bounds = array<i64: 32, 32>}, {pipeline_mode = #tpu.pipeline_mode<synchronous>, transform_indices = @transform_10, window_bounds = array<i64: 1, 32>}, {pipeline_mode = #tpu.pipeline_mode<synchronous>, transform_indices = @transform_11, window_bounds = array<i64: 32, 32>}, {pipeline_mode = #tpu.pipeline_mode<synchronous>, transform_indices = @transform_12, window_bounds = array<i64: 1, 32>}, {pipeline_mode = #tpu.pipeline_mode<synchronous>, transform_indices = @transform_13, window_bounds = array<i64: 1, 32>}, {pipeline_mode = #tpu.pipeline_mode<synchronous>, transform_indices = @transform_14, window_bounds = array<i64: 1, 32>}, {transform_indices = @transform_15, window_bounds = array<i64: 1, 8, 32>}]} {
    %c0 = arith.constant 0 : index
    %c0_0 = arith.constant 0 : index
    %c0_1 = arith.constant 0 : index
    %0 = vector.load %arg1[%c0, %c0_0, %c0_1] : memref<1x8x32xf32, #tpu.memory_space<vmem>>, vector<1x8x32xf32>
    %1 = vector.shape_cast %0 : vector<1x8x32xf32> to vector<8x32xf32>
    %c0_2 = arith.constant 0 : index
    %c0_3 = arith.constant 0 : index
    %c0_4 = arith.constant 0 : index
    %2 = vector.load %arg2[%c0_2, %c0_3, %c0_4] : memref<1x8x32xf32, #tpu.memory_space<vmem>>, vector<1x8x32xf32>
    %3 = vector.shape_cast %2 : vector<1x8x32xf32> to vector<8x32xf32>
    %c0_5 = arith.constant 0 : index
    %c0_6 = arith.constant 0 : index
    %c0_7 = arith.constant 0 : index
    %4 = vector.load %arg3[%c0_5, %c0_6, %c0_7] : memref<1x8x32xf32, #tpu.memory_space<vmem>>, vector<1x8x32xf32>
    %5 = vector.shape_cast %4 : vector<1x8x32xf32> to vector<8x32xf32>
    %c0_8 = arith.constant 0 : index
    %c0_9 = arith.constant 0 : index
    %c0_10 = arith.constant 0 : index
    %6 = vector.load %arg4[%c0_8, %c0_9, %c0_10] : memref<1x8x32xf32, #tpu.memory_space<vmem>>, vector<1x8x32xf32>
    %7 = vector.shape_cast %6 : vector<1x8x32xf32> to vector<8x32xf32>
    %c0_11 = arith.constant 0 : index
    %c0_12 = arith.constant 0 : index
    %c0_13 = arith.constant 0 : index
    %c0_14 = arith.constant 0 : index
    %8 = vector.load %arg5[%c0_11, %c0_12, %c0_13, %c0_14] : memref<1x1x1x8xf32, #tpu.memory_space<vmem>>, vector<1x1x1x8xf32>
    %9 = vector.shape_cast %8 : vector<1x1x1x8xf32> to vector<1x8xf32>
    %10 = arith.truncf %1 : vector<8x32xf32> to vector<8x32xbf16>
    %c0_15 = arith.constant 0 : index
    %c0_16 = arith.constant 0 : index
    %11 = vector.load %arg6[%c0_15, %c0_16] : memref<32x32xbf16, #tpu.memory_space<vmem>>, vector<32x32xbf16>
    %cst = arith.constant dense<0.000000e+00> : vector<8x32xf32>
    %12 = tpu.matmul %10, %11, %cst {dimension_numbers = #tpu.dot_dimension_numbers<[1], [0], [0], [1], [0, 0, 1, 1], [], []>} : vector<8x32xbf16>, vector<32x32xbf16>, vector<8x32xf32> -> vector<8x32xf32>
    %c0_17 = arith.constant 0 : index
    %c0_18 = arith.constant 0 : index
    %13 = vector.load %arg7[%c0_17, %c0_18] : memref<1x32xf32, #tpu.memory_space<vmem>>, vector<1x32xf32>
    %14 = vector.broadcast %13 : vector<1x32xf32> to vector<8x32xf32>
    %15 = arith.addf %12, %14 : vector<8x32xf32>
    %16 = arith.truncf %3 : vector<8x32xf32> to vector<8x32xbf16>
    %c0_19 = arith.constant 0 : index
    %c0_20 = arith.constant 0 : index
    %17 = vector.load %arg8[%c0_19, %c0_20] : memref<32x32xbf16, #tpu.memory_space<vmem>>, vector<32x32xbf16>
    %cst_21 = arith.constant dense<0.000000e+00> : vector<8x32xf32>
    %18 = tpu.matmul %16, %17, %cst_21 {dimension_numbers = #tpu.dot_dimension_numbers<[1], [0], [0], [1], [0, 0, 1, 1], [], []>} : vector<8x32xbf16>, vector<32x32xbf16>, vector<8x32xf32> -> vector<8x32xf32>
    %c0_22 = arith.constant 0 : index
    %c0_23 = arith.constant 0 : index
    %19 = vector.load %arg9[%c0_22, %c0_23] : memref<1x32xf32, #tpu.memory_space<vmem>>, vector<1x32xf32>
    %20 = vector.broadcast %19 : vector<1x32xf32> to vector<8x32xf32>
    %21 = arith.addf %18, %20 : vector<8x32xf32>
    %22 = arith.truncf %5 : vector<8x32xf32> to vector<8x32xbf16>
    %c0_24 = arith.constant 0 : index
    %c0_25 = arith.constant 0 : index
    %23 = vector.load %arg10[%c0_24, %c0_25] : memref<32x32xbf16, #tpu.memory_space<vmem>>, vector<32x32xbf16>
    %cst_26 = arith.constant dense<0.000000e+00> : vector<8x32xf32>
    %24 = tpu.matmul %22, %23, %cst_26 {dimension_numbers = #tpu.dot_dimension_numbers<[1], [0], [0], [1], [0, 0, 1, 1], [], []>} : vector<8x32xbf16>, vector<32x32xbf16>, vector<8x32xf32> -> vector<8x32xf32>
    %c0_27 = arith.constant 0 : index
    %c0_28 = arith.constant 0 : index
    %25 = vector.load %arg11[%c0_27, %c0_28] : memref<1x32xf32, #tpu.memory_space<vmem>>, vector<1x32xf32>
    %26 = vector.broadcast %25 : vector<1x32xf32> to vector<8x32xf32>
    %27 = arith.addf %24, %26 : vector<8x32xf32>
    %cst_29 = arith.constant 0.000000e+00 : f32
    %28 = vector.broadcast %cst_29 : f32 to vector<8x32xf32>
    %29 = vector.extract_strided_slice %15 {offsets = [0, 0], sizes = [8, 8], strides = [1, 1]} : vector<8x32xf32> to vector<8x8xf32>
    %30 = arith.truncf %29 : vector<8x8xf32> to vector<8x8xbf16>
    %31 = vector.extract_strided_slice %21 {offsets = [0, 0], sizes = [8, 8], strides = [1, 1]} : vector<8x32xf32> to vector<8x8xf32>
    %32 = arith.truncf %31 : vector<8x8xf32> to vector<8x8xbf16>
    %33 = vector.extract_strided_slice %27 {offsets = [0, 0], sizes = [8, 8], strides = [1, 1]} : vector<8x32xf32> to vector<8x8xf32>
    %34 = arith.truncf %33 : vector<8x8xf32> to vector<8x8xbf16>
    %cst_30 = arith.constant dense<0.000000e+00> : vector<8x8xf32>
    %35 = tpu.matmul %30, %32, %cst_30 {dimension_numbers = #tpu.dot_dimension_numbers<[1], [1], [0], [0], [0, 0, 1, 0], [], []>} : vector<8x8xbf16>, vector<8x8xbf16>, vector<8x8xf32> -> vector<8x8xf32>
    %cst_31 = arith.constant 0.353553385 : f32
    %36 = vector.broadcast %cst_31 : f32 to vector<8x8xf32>
    %37 = arith.mulf %35, %36 : vector<8x8xf32>
    %38 = vector.broadcast %9 : vector<1x8xf32> to vector<8x8xf32>
    %39 = arith.addf %37, %38 : vector<8x8xf32>
    %cst_32 = arith.constant -1.000000e+30 : f32
    %40 = vector.broadcast %cst_32 : f32 to vector<8x8xf32>
    %41 = arith.maximumf %39, %40 : vector<8x8xf32>
    %cst_33 = arith.constant dense<0xFF800000> : vector<8xf32>
    %42 = vector.multi_reduction <maximumf>, %41, %cst_33 [1] : vector<8x8xf32> to vector<8xf32>
    %43 = vector.shape_cast %42 : vector<8xf32> to vector<8x1xf32>
    %44 = vector.broadcast %43 : vector<8x1xf32> to vector<8x8xf32>
    %45 = arith.subf %41, %44 : vector<8x8xf32>
    %46 = math.exp %45 : vector<8x8xf32>
    %cst_34 = arith.constant dense<0.000000e+00> : vector<8xf32>
    %47 = vector.multi_reduction <add>, %46, %cst_34 [1] : vector<8x8xf32> to vector<8xf32>
    %48 = vector.shape_cast %47 : vector<8xf32> to vector<8x1xf32>
    %49 = tpu.reciprocal %48 {approx = true} : vector<8x1xf32> -> vector<8x1xf32>
    %50 = vector.broadcast %49 : vector<8x1xf32> to vector<8x8xf32>
    %51 = arith.mulf %46, %50 : vector<8x8xf32>
    %52 = arith.truncf %51 : vector<8x8xf32> to vector<8x8xbf16>
    %cst_35 = arith.constant dense<0.000000e+00> : vector<8x8xf32>
    %53 = tpu.matmul %52, %34, %cst_35 {dimension_numbers = #tpu.dot_dimension_numbers<[1], [0], [0], [1], [0, 0, 1, 1], [], []>} : vector<8x8xbf16>, vector<8x8xbf16>, vector<8x8xf32> -> vector<8x8xf32>
    %54 = arith.truncf %53 : vector<8x8xf32> to vector<8x8xbf16>
    %c0_36 = arith.constant 0 : index
    %c0_37 = arith.constant 0 : index
    %55 = vector.load %arg12[%c0_36, %c0_37] : memref<32x32xbf16, #tpu.memory_space<vmem>>, vector<8x32xbf16>
    %cst_38 = arith.constant dense<0.000000e+00> : vector<8x32xf32>
    %56 = tpu.matmul %54, %55, %cst_38 {dimension_numbers = #tpu.dot_dimension_numbers<[1], [0], [0], [1], [0, 0, 1, 1], [], []>} : vector<8x8xbf16>, vector<8x32xbf16>, vector<8x32xf32> -> vector<8x32xf32>
    %57 = arith.addf %28, %56 : vector<8x32xf32>
    %58 = vector.extract_strided_slice %15 {offsets = [0, 8], sizes = [8, 8], strides = [1, 1]} : vector<8x32xf32> to vector<8x8xf32>
    %59 = arith.truncf %58 : vector<8x8xf32> to vector<8x8xbf16>
    %60 = vector.extract_strided_slice %21 {offsets = [0, 8], sizes = [8, 8], strides = [1, 1]} : vector<8x32xf32> to vector<8x8xf32>
    %61 = arith.truncf %60 : vector<8x8xf32> to vector<8x8xbf16>
    %62 = vector.extract_strided_slice %27 {offsets = [0, 8], sizes = [8, 8], strides = [1, 1]} : vector<8x32xf32> to vector<8x8xf32>
    %63 = arith.truncf %62 : vector<8x8xf32> to vector<8x8xbf16>
    %cst_39 = arith.constant dense<0.000000e+00> : vector<8x8xf32>
    %64 = tpu.matmul %59, %61, %cst_39 {dimension_numbers = #tpu.dot_dimension_numbers<[1], [1], [0], [0], [0, 0, 1, 0], [], []>} : vector<8x8xbf16>, vector<8x8xbf16>, vector<8x8xf32> -> vector<8x8xf32>
    %cst_40 = arith.constant 0.353553385 : f32
    %65 = vector.broadcast %cst_40 : f32 to vector<8x8xf32>
    %66 = arith.mulf %64, %65 : vector<8x8xf32>
    %67 = vector.broadcast %9 : vector<1x8xf32> to vector<8x8xf32>
    %68 = arith.addf %66, %67 : vector<8x8xf32>
    %cst_41 = arith.constant -1.000000e+30 : f32
    %69 = vector.broadcast %cst_41 : f32 to vector<8x8xf32>
    %70 = arith.maximumf %68, %69 : vector<8x8xf32>
    %cst_42 = arith.constant dense<0xFF800000> : vector<8xf32>
    %71 = vector.multi_reduction <maximumf>, %70, %cst_42 [1] : vector<8x8xf32> to vector<8xf32>
    %72 = vector.shape_cast %71 : vector<8xf32> to vector<8x1xf32>
    %73 = vector.broadcast %72 : vector<8x1xf32> to vector<8x8xf32>
    %74 = arith.subf %70, %73 : vector<8x8xf32>
    %75 = math.exp %74 : vector<8x8xf32>
    %cst_43 = arith.constant dense<0.000000e+00> : vector<8xf32>
    %76 = vector.multi_reduction <add>, %75, %cst_43 [1] : vector<8x8xf32> to vector<8xf32>
    %77 = vector.shape_cast %76 : vector<8xf32> to vector<8x1xf32>
    %78 = tpu.reciprocal %77 {approx = true} : vector<8x1xf32> -> vector<8x1xf32>
    %79 = vector.broadcast %78 : vector<8x1xf32> to vector<8x8xf32>
    %80 = arith.mulf %75, %79 : vector<8x8xf32>
    %81 = arith.truncf %80 : vector<8x8xf32> to vector<8x8xbf16>
    %cst_44 = arith.constant dense<0.000000e+00> : vector<8x8xf32>
    %82 = tpu.matmul %81, %63, %cst_44 {dimension_numbers = #tpu.dot_dimension_numbers<[1], [0], [0], [1], [0, 0, 1, 1], [], []>} : vector<8x8xbf16>, vector<8x8xbf16>, vector<8x8xf32> -> vector<8x8xf32>
    %83 = arith.truncf %82 : vector<8x8xf32> to vector<8x8xbf16>
    %c8 = arith.constant 8 : index
    %c0_45 = arith.constant 0 : index
    %84 = vector.load %arg12[%c8, %c0_45] : memref<32x32xbf16, #tpu.memory_space<vmem>>, vector<8x32xbf16>
    %cst_46 = arith.constant dense<0.000000e+00> : vector<8x32xf32>
    %85 = tpu.matmul %83, %84, %cst_46 {dimension_numbers = #tpu.dot_dimension_numbers<[1], [0], [0], [1], [0, 0, 1, 1], [], []>} : vector<8x8xbf16>, vector<8x32xbf16>, vector<8x32xf32> -> vector<8x32xf32>
    %86 = arith.addf %57, %85 : vector<8x32xf32>
    %87 = vector.extract_strided_slice %15 {offsets = [0, 16], sizes = [8, 8], strides = [1, 1]} : vector<8x32xf32> to vector<8x8xf32>
    %88 = arith.truncf %87 : vector<8x8xf32> to vector<8x8xbf16>
    %89 = vector.extract_strided_slice %21 {offsets = [0, 16], sizes = [8, 8], strides = [1, 1]} : vector<8x32xf32> to vector<8x8xf32>
    %90 = arith.truncf %89 : vector<8x8xf32> to vector<8x8xbf16>
    %91 = vector.extract_strided_slice %27 {offsets = [0, 16], sizes = [8, 8], strides = [1, 1]} : vector<8x32xf32> to vector<8x8xf32>
    %92 = arith.truncf %91 : vector<8x8xf32> to vector<8x8xbf16>
    %cst_47 = arith.constant dense<0.000000e+00> : vector<8x8xf32>
    %93 = tpu.matmul %88, %90, %cst_47 {dimension_numbers = #tpu.dot_dimension_numbers<[1], [1], [0], [0], [0, 0, 1, 0], [], []>} : vector<8x8xbf16>, vector<8x8xbf16>, vector<8x8xf32> -> vector<8x8xf32>
    %cst_48 = arith.constant 0.353553385 : f32
    %94 = vector.broadcast %cst_48 : f32 to vector<8x8xf32>
    %95 = arith.mulf %93, %94 : vector<8x8xf32>
    %96 = vector.broadcast %9 : vector<1x8xf32> to vector<8x8xf32>
    %97 = arith.addf %95, %96 : vector<8x8xf32>
    %cst_49 = arith.constant -1.000000e+30 : f32
    %98 = vector.broadcast %cst_49 : f32 to vector<8x8xf32>
    %99 = arith.maximumf %97, %98 : vector<8x8xf32>
    %cst_50 = arith.constant dense<0xFF800000> : vector<8xf32>
    %100 = vector.multi_reduction <maximumf>, %99, %cst_50 [1] : vector<8x8xf32> to vector<8xf32>
    %101 = vector.shape_cast %100 : vector<8xf32> to vector<8x1xf32>
    %102 = vector.broadcast %101 : vector<8x1xf32> to vector<8x8xf32>
    %103 = arith.subf %99, %102 : vector<8x8xf32>
    %104 = math.exp %103 : vector<8x8xf32>
    %cst_51 = arith.constant dense<0.000000e+00> : vector<8xf32>
    %105 = vector.multi_reduction <add>, %104, %cst_51 [1] : vector<8x8xf32> to vector<8xf32>
    %106 = vector.shape_cast %105 : vector<8xf32> to vector<8x1xf32>
    %107 = tpu.reciprocal %106 {approx = true} : vector<8x1xf32> -> vector<8x1xf32>
    %108 = vector.broadcast %107 : vector<8x1xf32> to vector<8x8xf32>
    %109 = arith.mulf %104, %108 : vector<8x8xf32>
    %110 = arith.truncf %109 : vector<8x8xf32> to vector<8x8xbf16>
    %cst_52 = arith.constant dense<0.000000e+00> : vector<8x8xf32>
    %111 = tpu.matmul %110, %92, %cst_52 {dimension_numbers = #tpu.dot_dimension_numbers<[1], [0], [0], [1], [0, 0, 1, 1], [], []>} : vector<8x8xbf16>, vector<8x8xbf16>, vector<8x8xf32> -> vector<8x8xf32>
    %112 = arith.truncf %111 : vector<8x8xf32> to vector<8x8xbf16>
    %c16 = arith.constant 16 : index
    %c0_53 = arith.constant 0 : index
    %113 = vector.load %arg12[%c16, %c0_53] : memref<32x32xbf16, #tpu.memory_space<vmem>>, vector<8x32xbf16>
    %cst_54 = arith.constant dense<0.000000e+00> : vector<8x32xf32>
    %114 = tpu.matmul %112, %113, %cst_54 {dimension_numbers = #tpu.dot_dimension_numbers<[1], [0], [0], [1], [0, 0, 1, 1], [], []>} : vector<8x8xbf16>, vector<8x32xbf16>, vector<8x32xf32> -> vector<8x32xf32>
    %115 = arith.addf %86, %114 : vector<8x32xf32>
    %116 = vector.extract_strided_slice %15 {offsets = [0, 24], sizes = [8, 8], strides = [1, 1]} : vector<8x32xf32> to vector<8x8xf32>
    %117 = arith.truncf %116 : vector<8x8xf32> to vector<8x8xbf16>
    %118 = vector.extract_strided_slice %21 {offsets = [0, 24], sizes = [8, 8], strides = [1, 1]} : vector<8x32xf32> to vector<8x8xf32>
    %119 = arith.truncf %118 : vector<8x8xf32> to vector<8x8xbf16>
    %120 = vector.extract_strided_slice %27 {offsets = [0, 24], sizes = [8, 8], strides = [1, 1]} : vector<8x32xf32> to vector<8x8xf32>
    %121 = arith.truncf %120 : vector<8x8xf32> to vector<8x8xbf16>
    %cst_55 = arith.constant dense<0.000000e+00> : vector<8x8xf32>
    %122 = tpu.matmul %117, %119, %cst_55 {dimension_numbers = #tpu.dot_dimension_numbers<[1], [1], [0], [0], [0, 0, 1, 0], [], []>} : vector<8x8xbf16>, vector<8x8xbf16>, vector<8x8xf32> -> vector<8x8xf32>
    %cst_56 = arith.constant 0.353553385 : f32
    %123 = vector.broadcast %cst_56 : f32 to vector<8x8xf32>
    %124 = arith.mulf %122, %123 : vector<8x8xf32>
    %125 = vector.broadcast %9 : vector<1x8xf32> to vector<8x8xf32>
    %126 = arith.addf %124, %125 : vector<8x8xf32>
    %cst_57 = arith.constant -1.000000e+30 : f32
    %127 = vector.broadcast %cst_57 : f32 to vector<8x8xf32>
    %128 = arith.maximumf %126, %127 : vector<8x8xf32>
    %cst_58 = arith.constant dense<0xFF800000> : vector<8xf32>
    %129 = vector.multi_reduction <maximumf>, %128, %cst_58 [1] : vector<8x8xf32> to vector<8xf32>
    %130 = vector.shape_cast %129 : vector<8xf32> to vector<8x1xf32>
    %131 = vector.broadcast %130 : vector<8x1xf32> to vector<8x8xf32>
    %132 = arith.subf %128, %131 : vector<8x8xf32>
    %133 = math.exp %132 : vector<8x8xf32>
    %cst_59 = arith.constant dense<0.000000e+00> : vector<8xf32>
    %134 = vector.multi_reduction <add>, %133, %cst_59 [1] : vector<8x8xf32> to vector<8xf32>
    %135 = vector.shape_cast %134 : vector<8xf32> to vector<8x1xf32>
    %136 = tpu.reciprocal %135 {approx = true} : vector<8x1xf32> -> vector<8x1xf32>
    %137 = vector.broadcast %136 : vector<8x1xf32> to vector<8x8xf32>
    %138 = arith.mulf %133, %137 : vector<8x8xf32>
    %139 = arith.truncf %138 : vector<8x8xf32> to vector<8x8xbf16>
    %cst_60 = arith.constant dense<0.000000e+00> : vector<8x8xf32>
    %140 = tpu.matmul %139, %121, %cst_60 {dimension_numbers = #tpu.dot_dimension_numbers<[1], [0], [0], [1], [0, 0, 1, 1], [], []>} : vector<8x8xbf16>, vector<8x8xbf16>, vector<8x8xf32> -> vector<8x8xf32>
    %141 = arith.truncf %140 : vector<8x8xf32> to vector<8x8xbf16>
    %c24 = arith.constant 24 : index
    %c0_61 = arith.constant 0 : index
    %142 = vector.load %arg12[%c24, %c0_61] : memref<32x32xbf16, #tpu.memory_space<vmem>>, vector<8x32xbf16>
    %cst_62 = arith.constant dense<0.000000e+00> : vector<8x32xf32>
    %143 = tpu.matmul %141, %142, %cst_62 {dimension_numbers = #tpu.dot_dimension_numbers<[1], [0], [0], [1], [0, 0, 1, 1], [], []>} : vector<8x8xbf16>, vector<8x32xbf16>, vector<8x32xf32> -> vector<8x32xf32>
    %144 = arith.addf %115, %143 : vector<8x32xf32>
    %c0_63 = arith.constant 0 : index
    %c0_64 = arith.constant 0 : index
    %145 = vector.load %arg13[%c0_63, %c0_64] : memref<1x32xf32, #tpu.memory_space<vmem>>, vector<1x32xf32>
    %146 = vector.broadcast %145 : vector<1x32xf32> to vector<8x32xf32>
    %147 = arith.addf %144, %146 : vector<8x32xf32>
    %148 = arith.addf %147, %7 : vector<8x32xf32>
    %cst_65 = arith.constant dense<0.000000e+00> : vector<8xf32>
    %149 = vector.multi_reduction <add>, %148, %cst_65 [1] : vector<8x32xf32> to vector<8xf32>
    %150 = vector.shape_cast %149 : vector<8xf32> to vector<8x1xf32>
    %cst_66 = arith.constant 3.200000e+01 : f32
    %151 = vector.broadcast %cst_66 : f32 to vector<8x1xf32>
    %152 = arith.divf %150, %151 : vector<8x1xf32>
    %153 = vector.broadcast %152 : vector<8x1xf32> to vector<8x32xf32>
    %154 = arith.subf %148, %153 : vector<8x32xf32>
    %155 = arith.mulf %154, %154 : vector<8x32xf32>
    %cst_67 = arith.constant dense<0.000000e+00> : vector<8xf32>
    %156 = vector.multi_reduction <add>, %155, %cst_67 [1] : vector<8x32xf32> to vector<8xf32>
    %157 = vector.shape_cast %156 : vector<8xf32> to vector<8x1xf32>
    %cst_68 = arith.constant 3.200000e+01 : f32
    %158 = vector.broadcast %cst_68 : f32 to vector<8x1xf32>
    %159 = arith.divf %157, %158 : vector<8x1xf32>
    %160 = vector.broadcast %152 : vector<8x1xf32> to vector<8x32xf32>
    %161 = arith.subf %148, %160 : vector<8x32xf32>
    %cst_69 = arith.constant 9.99999974E-6 : f32
    %162 = vector.broadcast %cst_69 : f32 to vector<8x1xf32>
    %163 = arith.addf %159, %162 : vector<8x1xf32>
    %164 = math.rsqrt %163 : vector<8x1xf32>
    %165 = vector.broadcast %164 : vector<8x1xf32> to vector<8x32xf32>
    %166 = arith.mulf %161, %165 : vector<8x32xf32>
    %c0_70 = arith.constant 0 : index
    %c0_71 = arith.constant 0 : index
    %167 = vector.load %arg14[%c0_70, %c0_71] : memref<1x32xf32, #tpu.memory_space<vmem>>, vector<1x32xf32>
    %168 = vector.broadcast %167 : vector<1x32xf32> to vector<8x32xf32>
    %169 = arith.mulf %166, %168 : vector<8x32xf32>
    %c0_72 = arith.constant 0 : index
    %c0_73 = arith.constant 0 : index
    %170 = vector.load %arg15[%c0_72, %c0_73] : memref<1x32xf32, #tpu.memory_space<vmem>>, vector<1x32xf32>
    %171 = vector.broadcast %170 : vector<1x32xf32> to vector<8x32xf32>
    %172 = arith.addf %169, %171 : vector<8x32xf32>
    %c0_74 = arith.constant 0 : index
    %c0_75 = arith.constant 0 : index
    %c0_76 = arith.constant 0 : index
    %173 = vector.load %arg16[%c0_74, %c0_75, %c0_76] : memref<1x8x32xf32, #tpu.memory_space<vmem>>, vector<1x8x32xf32>
    %174 = vector.shape_cast %173 : vector<1x8x32xf32> to vector<8x32xf32>
    %175 = vector.shape_cast %172 : vector<8x32xf32> to vector<1x8x32xf32>
    tpu.vector_store %arg16[%c0_74, %c0_75, %c0_76], %175 {strides = array<i32>} : memref<1x8x32xf32, #tpu.memory_space<vmem>>, vector<1x8x32xf32>,
    return
  }
  func.func @transform_0(%arg0: i32) -> (i32, i32, i32) {
    %c0_i32 = arith.constant 0 : i32
    %c0_i32_0 = arith.constant 0 : i32
    %c0_i32_1 = arith.constant 0 : i32
    return %arg0, %c0_i32, %c0_i32_0 : i32, i32, i32
  }
  func.func @transform_1(%arg0: i32) -> (i32, i32, i32) {
    %c0_i32 = arith.constant 0 : i32
    %c0_i32_0 = arith.constant 0 : i32
    %c0_i32_1 = arith.constant 0 : i32
    return %arg0, %c0_i32, %c0_i32_0 : i32, i32, i32
  }
  func.func @transform_2(%arg0: i32) -> (i32, i32, i32) {
    %c0_i32 = arith.constant 0 : i32
    %c0_i32_0 = arith.constant 0 : i32
    %c0_i32_1 = arith.constant 0 : i32
    return %arg0, %c0_i32, %c0_i32_0 : i32, i32, i32
  }
  func.func @transform_3(%arg0: i32) -> (i32, i32, i32) {
    %c0_i32 = arith.constant 0 : i32
    %c0_i32_0 = arith.constant 0 : i32
    %c0_i32_1 = arith.constant 0 : i32
    return %arg0, %c0_i32, %c0_i32_0 : i32, i32, i32
  }
  func.func @transform_4(%arg0: i32) -> (i32, i32, i32, i32) {
    %c0_i32 = arith.constant 0 : i32
    %c0_i32_0 = arith.constant 0 : i32
    %c0_i32_1 = arith.constant 0 : i32
    %c0_i32_2 = arith.constant 0 : i32
    return %arg0, %c0_i32, %c0_i32_0, %c0_i32_1 : i32, i32, i32, i32
  }
  func.func @transform_5(%arg0: i32) -> (i32, i32) {
    %c0_i32 = arith.constant 0 : i32
    %c0_i32_0 = arith.constant 0 : i32
    %c0_i32_1 = arith.constant 0 : i32
    return %c0_i32, %c0_i32_0 : i32, i32
  }
  func.func @transform_6(%arg0: i32) -> (i32, i32) {
    %c0_i32 = arith.constant 0 : i32
    %c0_i32_0 = arith.constant 0 : i32
    %c0_i32_1 = arith.constant 0 : i32
    return %c0_i32, %c0_i32_0 : i32, i32
  }
  func.func @transform_7(%arg0: i32) -> (i32, i32) {
    %c0_i32 = arith.constant 0 : i32
    %c0_i32_0 = arith.constant 0 : i32
    %c0_i32_1 = arith.constant 0 : i32
    return %c0_i32, %c0_i32_0 : i32, i32
  }
  func.func @transform_8(%arg0: i32) -> (i32, i32) {
    %c0_i32 = arith.constant 0 : i32
    %c0_i32_0 = arith.constant 0 : i32
    %c0_i32_1 = arith.constant 0 : i32
    return %c0_i32, %c0_i32_0 : i32, i32
  }
  func.func @transform_9(%arg0: i32) -> (i32, i32) {
    %c0_i32 = arith.constant 0 : i32
    %c0_i32_0 = arith.constant 0 : i32
    %c0_i32_1 = arith.constant 0 : i32
    return %c0_i32, %c0_i32_0 : i32, i32
  }
  func.func @transform_10(%arg0: i32) -> (i32, i32) {
    %c0_i32 = arith.constant 0 : i32
    %c0_i32_0 = arith.constant 0 : i32
    %c0_i32_1 = arith.constant 0 : i32
    return %c0_i32, %c0_i32_0 : i32, i32
  }
  func.func @transform_11(%arg0: i32) -> (i32, i32) {
    %c0_i32 = arith.constant 0 : i32
    %c0_i32_0 = arith.constant 0 : i32
    %c0_i32_1 = arith.constant 0 : i32
    return %c0_i32, %c0_i32_0 : i32, i32
  }
  func.func @transform_12(%arg0: i32) -> (i32, i32) {
    %c0_i32 = arith.constant 0 : i32
    %c0_i32_0 = arith.constant 0 : i32
    %c0_i32_1 = arith.constant 0 : i32
    return %c0_i32, %c0_i32_0 : i32, i32
  }
  func.func @transform_13(%arg0: i32) -> (i32, i32) {
    %c0_i32 = arith.constant 0 : i32
    %c0_i32_0 = arith.constant 0 : i32
    %c0_i32_1 = arith.constant 0 : i32
    return %c0_i32, %c0_i32_0 : i32, i32
  }
  func.func @transform_14(%arg0: i32) -> (i32, i32) {
    %c0_i32 = arith.constant 0 : i32
    %c0_i32_0 = arith.constant 0 : i32
    %c0_i32_1 = arith.constant 0 : i32
    return %c0_i32, %c0_i32_0 : i32, i32
  }
  func.func @transform_15(%arg0: i32) -> (i32, i32, i32) {
    %c0_i32 = arith.constant 0 : i32
    %c0_i32_0 = arith.constant 0 : i32
    %c0_i32_1 = arith.constant 0 : i32
    return %arg0, %c0_i32, %c0_i32_0 : i32, i32, i32
  }
}

module attributes {stable_mosaic.version = 11 : i64} {
  func.func @_mha_block_kernel(%arg0: i32, %arg1: memref<1x8x32xf32, #tpu.memory_space<vmem>>, %arg2: memref<1x8x32xf32, #tpu.memory_space<vmem>>, %arg3: memref<1x8x32xf32, #tpu.memory_space<vmem>>, %arg4: memref<1x8x32xf32, #tpu.memory_space<vmem>>, %arg5: memref<1x1x1x8xf32, #tpu.memory_space<vmem>>, %arg6: memref<32x32xbf16, #tpu.memory_space<vmem>>, %arg7: memref<1x32xf32, #tpu.memory_space<vmem>>, %arg8: memref<32x32xbf16, #tpu.memory_space<vmem>>, %arg9: memref<1x32xf32, #tpu.memory_space<vmem>>, %arg10: memref<32x32xbf16, #tpu.memory_space<vmem>>, %arg11: memref<1x32xf32, #tpu.memory_space<vmem>>, %arg12: memref<32x32xbf16, #tpu.memory_space<vmem>>, %arg13: memref<1x32xf32, #tpu.memory_space<vmem>>, %arg14: memref<1x32xf32, #tpu.memory_space<vmem>>, %arg15: memref<1x32xf32, #tpu.memory_space<vmem>>, %arg16: memref<1x8x32xf32, #tpu.memory_space<vmem>>, %arg17: memref<1x4x8x8xf32, #tpu.memory_space<vmem>>) attributes {dimension_semantics = [#tpu.dimension_semantics<parallel>], iteration_bounds = array<i64: 2>, scalar_prefetch = 0 : i64, scratch_operands = 0 : i64, tpu.core_type = #tpu.core_type<tc>, window_params = [{transform_indices = @transform_0, window_bounds = array<i64: 1, 8, 32>}, {transform_indices = @transform_1, window_bounds = array<i64: 1, 8, 32>}, {transform_indices = @transform_2, window_bounds = array<i64: 1, 8, 32>}, {transform_indices = @transform_3, window_bounds = array<i64: 1, 8, 32>}, {transform_indices = @transform_4, window_bounds = array<i64: 1, 1, 1, 8>}, {pipeline_mode = #tpu.pipeline_mode<synchronous>, transform_indices = @transform_5, window_bounds = array<i64: 32, 32>}, {pipeline_mode = #tpu.pipeline_mode<synchronous>, transform_indices = @transform_6, window_bounds = array<i64: 1, 32>}, {pipeline_mode = #tpu.pipeline_mode<synchronous>, transform_indices = @transform_7, window_bounds = array<i64: 32, 32>}, {pipeline_mode = #tpu.pipeline_mode<synchronous>, transform_indices = @transform_8, window_bounds = array<i64: 1, 32>}, {pipeline_mode = #tpu.pipeline_mode<synchronous>, transform_indices = @transform_9, window_bounds = array<i64: 32, 32>}, {pipeline_mode = #tpu.pipeline_mode<synchronous>, transform_indices = @transform_10, window_bounds = array<i64: 1, 32>}, {pipeline_mode = #tpu.pipeline_mode<synchronous>, transform_indices = @transform_11, window_bounds = array<i64: 32, 32>}, {pipeline_mode = #tpu.pipeline_mode<synchronous>, transform_indices = @transform_12, window_bounds = array<i64: 1, 32>}, {pipeline_mode = #tpu.pipeline_mode<synchronous>, transform_indices = @transform_13, window_bounds = array<i64: 1, 32>}, {pipeline_mode = #tpu.pipeline_mode<synchronous>, transform_indices = @transform_14, window_bounds = array<i64: 1, 32>}, {transform_indices = @transform_15, window_bounds = array<i64: 1, 8, 32>}, {transform_indices = @transform_16, window_bounds = array<i64: 1, 4, 8, 8>}]} {
    %c0 = arith.constant 0 : index
    %c0_0 = arith.constant 0 : index
    %c0_1 = arith.constant 0 : index
    %0 = vector.load %arg1[%c0, %c0_0, %c0_1] : memref<1x8x32xf32, #tpu.memory_space<vmem>>, vector<1x8x32xf32>
    %1 = vector.shape_cast %0 : vector<1x8x32xf32> to vector<8x32xf32>
    %c0_2 = arith.constant 0 : index
    %c0_3 = arith.constant 0 : index
    %c0_4 = arith.constant 0 : index
    %2 = vector.load %arg2[%c0_2, %c0_3, %c0_4] : memref<1x8x32xf32, #tpu.memory_space<vmem>>, vector<1x8x32xf32>
    %3 = vector.shape_cast %2 : vector<1x8x32xf32> to vector<8x32xf32>
    %c0_5 = arith.constant 0 : index
    %c0_6 = arith.constant 0 : index
    %c0_7 = arith.constant 0 : index
    %4 = vector.load %arg3[%c0_5, %c0_6, %c0_7] : memref<1x8x32xf32, #tpu.memory_space<vmem>>, vector<1x8x32xf32>
    %5 = vector.shape_cast %4 : vector<1x8x32xf32> to vector<8x32xf32>
    %c0_8 = arith.constant 0 : index
    %c0_9 = arith.constant 0 : index
    %c0_10 = arith.constant 0 : index
    %6 = vector.load %arg4[%c0_8, %c0_9, %c0_10] : memref<1x8x32xf32, #tpu.memory_space<vmem>>, vector<1x8x32xf32>
    %7 = vector.shape_cast %6 : vector<1x8x32xf32> to vector<8x32xf32>
    %c0_11 = arith.constant 0 : index
    %c0_12 = arith.constant 0 : index
    %c0_13 = arith.constant 0 : index
    %c0_14 = arith.constant 0 : index
    %8 = vector.load %arg5[%c0_11, %c0_12, %c0_13, %c0_14] : memref<1x1x1x8xf32, #tpu.memory_space<vmem>>, vector<1x1x1x8xf32>
    %9 = vector.shape_cast %8 : vector<1x1x1x8xf32> to vector<1x8xf32>
    %10 = arith.truncf %1 : vector<8x32xf32> to vector<8x32xbf16>
    %c0_15 = arith.constant 0 : index
    %c0_16 = arith.constant 0 : index
    %11 = vector.load %arg6[%c0_15, %c0_16] : memref<32x32xbf16, #tpu.memory_space<vmem>>, vector<32x32xbf16>
    %cst = arith.constant dense<0.000000e+00> : vector<8x32xf32>
    %12 = tpu.matmul %10, %11, %cst {dimension_numbers = #tpu.dot_dimension_numbers<[1], [0], [0], [1], [0, 0, 1, 1], [], []>} : vector<8x32xbf16>, vector<32x32xbf16>, vector<8x32xf32> -> vector<8x32xf32>
    %c0_17 = arith.constant 0 : index
    %c0_18 = arith.constant 0 : index
    %13 = vector.load %arg7[%c0_17, %c0_18] : memref<1x32xf32, #tpu.memory_space<vmem>>, vector<1x32xf32>
    %14 = vector.broadcast %13 : vector<1x32xf32> to vector<8x32xf32>
    %15 = arith.addf %12, %14 : vector<8x32xf32>
    %16 = arith.truncf %3 : vector<8x32xf32> to vector<8x32xbf16>
    %c0_19 = arith.constant 0 : index
    %c0_20 = arith.constant 0 : index
    %17 = vector.load %arg8[%c0_19, %c0_20] : memref<32x32xbf16, #tpu.memory_space<vmem>>, vector<32x32xbf16>
    %cst_21 = arith.constant dense<0.000000e+00> : vector<8x32xf32>
    %18 = tpu.matmul %16, %17, %cst_21 {dimension_numbers = #tpu.dot_dimension_numbers<[1], [0], [0], [1], [0, 0, 1, 1], [], []>} : vector<8x32xbf16>, vector<32x32xbf16>, vector<8x32xf32> -> vector<8x32xf32>
    %c0_22 = arith.constant 0 : index
    %c0_23 = arith.constant 0 : index
    %19 = vector.load %arg9[%c0_22, %c0_23] : memref<1x32xf32, #tpu.memory_space<vmem>>, vector<1x32xf32>
    %20 = vector.broadcast %19 : vector<1x32xf32> to vector<8x32xf32>
    %21 = arith.addf %18, %20 : vector<8x32xf32>
    %22 = arith.truncf %5 : vector<8x32xf32> to vector<8x32xbf16>
    %c0_24 = arith.constant 0 : index
    %c0_25 = arith.constant 0 : index
    %23 = vector.load %arg10[%c0_24, %c0_25] : memref<32x32xbf16, #tpu.memory_space<vmem>>, vector<32x32xbf16>
    %cst_26 = arith.constant dense<0.000000e+00> : vector<8x32xf32>
    %24 = tpu.matmul %22, %23, %cst_26 {dimension_numbers = #tpu.dot_dimension_numbers<[1], [0], [0], [1], [0, 0, 1, 1], [], []>} : vector<8x32xbf16>, vector<32x32xbf16>, vector<8x32xf32> -> vector<8x32xf32>
    %c0_27 = arith.constant 0 : index
    %c0_28 = arith.constant 0 : index
    %25 = vector.load %arg11[%c0_27, %c0_28] : memref<1x32xf32, #tpu.memory_space<vmem>>, vector<1x32xf32>
    %26 = vector.broadcast %25 : vector<1x32xf32> to vector<8x32xf32>
    %27 = arith.addf %24, %26 : vector<8x32xf32>
    %cst_29 = arith.constant 0.000000e+00 : f32
    %28 = vector.broadcast %cst_29 : f32 to vector<8x32xf32>
    %29 = vector.extract_strided_slice %15 {offsets = [0, 0], sizes = [8, 8], strides = [1, 1]} : vector<8x32xf32> to vector<8x8xf32>
    %30 = arith.truncf %29 : vector<8x8xf32> to vector<8x8xbf16>
    %31 = vector.extract_strided_slice %21 {offsets = [0, 0], sizes = [8, 8], strides = [1, 1]} : vector<8x32xf32> to vector<8x8xf32>
    %32 = arith.truncf %31 : vector<8x8xf32> to vector<8x8xbf16>
    %33 = vector.extract_strided_slice %27 {offsets = [0, 0], sizes = [8, 8], strides = [1, 1]} : vector<8x32xf32> to vector<8x8xf32>
    %34 = arith.truncf %33 : vector<8x8xf32> to vector<8x8xbf16>
    %cst_30 = arith.constant dense<0.000000e+00> : vector<8x8xf32>
    %35 = tpu.matmul %30, %32, %cst_30 {dimension_numbers = #tpu.dot_dimension_numbers<[1], [1], [0], [0], [0, 0, 1, 0], [], []>} : vector<8x8xbf16>, vector<8x8xbf16>, vector<8x8xf32> -> vector<8x8xf32>
    %cst_31 = arith.constant 0.353553385 : f32
    %36 = vector.broadcast %cst_31 : f32 to vector<8x8xf32>
    %37 = arith.mulf %35, %36 : vector<8x8xf32>
    %38 = vector.broadcast %9 : vector<1x8xf32> to vector<8x8xf32>
    %39 = arith.addf %37, %38 : vector<8x8xf32>
    %cst_32 = arith.constant -1.000000e+30 : f32
    %40 = vector.broadcast %cst_32 : f32 to vector<8x8xf32>
    %41 = arith.maximumf %39, %40 : vector<8x8xf32>
    %cst_33 = arith.constant dense<0xFF800000> : vector<8xf32>
    %42 = vector.multi_reduction <maximumf>, %41, %cst_33 [1] : vector<8x8xf32> to vector<8xf32>
    %43 = vector.shape_cast %42 : vector<8xf32> to vector<8x1xf32>
    %44 = vector.broadcast %43 : vector<8x1xf32> to vector<8x8xf32>
    %45 = arith.subf %41, %44 : vector<8x8xf32>
    %46 = math.exp %45 : vector<8x8xf32>
    %cst_34 = arith.constant dense<0.000000e+00> : vector<8xf32>
    %47 = vector.multi_reduction <add>, %46, %cst_34 [1] : vector<8x8xf32> to vector<8xf32>
    %48 = vector.shape_cast %47 : vector<8xf32> to vector<8x1xf32>
    %49 = tpu.reciprocal %48 {approx = true} : vector<8x1xf32> -> vector<8x1xf32>
    %50 = vector.broadcast %49 : vector<8x1xf32> to vector<8x8xf32>
    %51 = arith.mulf %46, %50 : vector<8x8xf32>
    %c0_35 = arith.constant 0 : index
    %c0_36 = arith.constant 0 : index
    %c0_37 = arith.constant 0 : index
    %c0_38 = arith.constant 0 : index
    %52 = vector.load %arg17[%c0_35, %c0_36, %c0_37, %c0_38] : memref<1x4x8x8xf32, #tpu.memory_space<vmem>>, vector<1x1x8x8xf32>
    %53 = vector.shape_cast %52 : vector<1x1x8x8xf32> to vector<8x8xf32>
    %54 = vector.shape_cast %51 : vector<8x8xf32> to vector<1x1x8x8xf32>
    tpu.vector_store %arg17[%c0_35, %c0_36, %c0_37, %c0_38], %54 {strides = array<i32>} : memref<1x4x8x8xf32, #tpu.memory_space<vmem>>, vector<1x1x8x8xf32>,
    %55 = arith.truncf %51 : vector<8x8xf32> to vector<8x8xbf16>
    %cst_39 = arith.constant dense<0.000000e+00> : vector<8x8xf32>
    %56 = tpu.matmul %55, %34, %cst_39 {dimension_numbers = #tpu.dot_dimension_numbers<[1], [0], [0], [1], [0, 0, 1, 1], [], []>} : vector<8x8xbf16>, vector<8x8xbf16>, vector<8x8xf32> -> vector<8x8xf32>
    %57 = arith.truncf %56 : vector<8x8xf32> to vector<8x8xbf16>
    %c0_40 = arith.constant 0 : index
    %c0_41 = arith.constant 0 : index
    %58 = vector.load %arg12[%c0_40, %c0_41] : memref<32x32xbf16, #tpu.memory_space<vmem>>, vector<8x32xbf16>
    %cst_42 = arith.constant dense<0.000000e+00> : vector<8x32xf32>
    %59 = tpu.matmul %57, %58, %cst_42 {dimension_numbers = #tpu.dot_dimension_numbers<[1], [0], [0], [1], [0, 0, 1, 1], [], []>} : vector<8x8xbf16>, vector<8x32xbf16>, vector<8x32xf32> -> vector<8x32xf32>
    %60 = arith.addf %28, %59 : vector<8x32xf32>
    %61 = vector.extract_strided_slice %15 {offsets = [0, 8], sizes = [8, 8], strides = [1, 1]} : vector<8x32xf32> to vector<8x8xf32>
    %62 = arith.truncf %61 : vector<8x8xf32> to vector<8x8xbf16>
    %63 = vector.extract_strided_slice %21 {offsets = [0, 8], sizes = [8, 8], strides = [1, 1]} : vector<8x32xf32> to vector<8x8xf32>
    %64 = arith.truncf %63 : vector<8x8xf32> to vector<8x8xbf16>
    %65 = vector.extract_strided_slice %27 {offsets = [0, 8], sizes = [8, 8], strides = [1, 1]} : vector<8x32xf32> to vector<8x8xf32>
    %66 = arith.truncf %65 : vector<8x8xf32> to vector<8x8xbf16>
    %cst_43 = arith.constant dense<0.000000e+00> : vector<8x8xf32>
    %67 = tpu.matmul %62, %64, %cst_43 {dimension_numbers = #tpu.dot_dimension_numbers<[1], [1], [0], [0], [0, 0, 1, 0], [], []>} : vector<8x8xbf16>, vector<8x8xbf16>, vector<8x8xf32> -> vector<8x8xf32>
    %cst_44 = arith.constant 0.353553385 : f32
    %68 = vector.broadcast %cst_44 : f32 to vector<8x8xf32>
    %69 = arith.mulf %67, %68 : vector<8x8xf32>
    %70 = vector.broadcast %9 : vector<1x8xf32> to vector<8x8xf32>
    %71 = arith.addf %69, %70 : vector<8x8xf32>
    %cst_45 = arith.constant -1.000000e+30 : f32
    %72 = vector.broadcast %cst_45 : f32 to vector<8x8xf32>
    %73 = arith.maximumf %71, %72 : vector<8x8xf32>
    %cst_46 = arith.constant dense<0xFF800000> : vector<8xf32>
    %74 = vector.multi_reduction <maximumf>, %73, %cst_46 [1] : vector<8x8xf32> to vector<8xf32>
    %75 = vector.shape_cast %74 : vector<8xf32> to vector<8x1xf32>
    %76 = vector.broadcast %75 : vector<8x1xf32> to vector<8x8xf32>
    %77 = arith.subf %73, %76 : vector<8x8xf32>
    %78 = math.exp %77 : vector<8x8xf32>
    %cst_47 = arith.constant dense<0.000000e+00> : vector<8xf32>
    %79 = vector.multi_reduction <add>, %78, %cst_47 [1] : vector<8x8xf32> to vector<8xf32>
    %80 = vector.shape_cast %79 : vector<8xf32> to vector<8x1xf32>
    %81 = tpu.reciprocal %80 {approx = true} : vector<8x1xf32> -> vector<8x1xf32>
    %82 = vector.broadcast %81 : vector<8x1xf32> to vector<8x8xf32>
    %83 = arith.mulf %78, %82 : vector<8x8xf32>
    %c0_48 = arith.constant 0 : index
    %c1 = arith.constant 1 : index
    %c0_49 = arith.constant 0 : index
    %c0_50 = arith.constant 0 : index
    %84 = vector.load %arg17[%c0_48, %c1, %c0_49, %c0_50] : memref<1x4x8x8xf32, #tpu.memory_space<vmem>>, vector<1x1x8x8xf32>
    %85 = vector.shape_cast %84 : vector<1x1x8x8xf32> to vector<8x8xf32>
    %86 = vector.shape_cast %83 : vector<8x8xf32> to vector<1x1x8x8xf32>
    tpu.vector_store %arg17[%c0_48, %c1, %c0_49, %c0_50], %86 {strides = array<i32>} : memref<1x4x8x8xf32, #tpu.memory_space<vmem>>, vector<1x1x8x8xf32>,
    %87 = arith.truncf %83 : vector<8x8xf32> to vector<8x8xbf16>
    %cst_51 = arith.constant dense<0.000000e+00> : vector<8x8xf32>
    %88 = tpu.matmul %87, %66, %cst_51 {dimension_numbers = #tpu.dot_dimension_numbers<[1], [0], [0], [1], [0, 0, 1, 1], [], []>} : vector<8x8xbf16>, vector<8x8xbf16>, vector<8x8xf32> -> vector<8x8xf32>
    %89 = arith.truncf %88 : vector<8x8xf32> to vector<8x8xbf16>
    %c8 = arith.constant 8 : index
    %c0_52 = arith.constant 0 : index
    %90 = vector.load %arg12[%c8, %c0_52] : memref<32x32xbf16, #tpu.memory_space<vmem>>, vector<8x32xbf16>
    %cst_53 = arith.constant dense<0.000000e+00> : vector<8x32xf32>
    %91 = tpu.matmul %89, %90, %cst_53 {dimension_numbers = #tpu.dot_dimension_numbers<[1], [0], [0], [1], [0, 0, 1, 1], [], []>} : vector<8x8xbf16>, vector<8x32xbf16>, vector<8x32xf32> -> vector<8x32xf32>
    %92 = arith.addf %60, %91 : vector<8x32xf32>
    %93 = vector.extract_strided_slice %15 {offsets = [0, 16], sizes = [8, 8], strides = [1, 1]} : vector<8x32xf32> to vector<8x8xf32>
    %94 = arith.truncf %93 : vector<8x8xf32> to vector<8x8xbf16>
    %95 = vector.extract_strided_slice %21 {offsets = [0, 16], sizes = [8, 8], strides = [1, 1]} : vector<8x32xf32> to vector<8x8xf32>
    %96 = arith.truncf %95 : vector<8x8xf32> to vector<8x8xbf16>
    %97 = vector.extract_strided_slice %27 {offsets = [0, 16], sizes = [8, 8], strides = [1, 1]} : vector<8x32xf32> to vector<8x8xf32>
    %98 = arith.truncf %97 : vector<8x8xf32> to vector<8x8xbf16>
    %cst_54 = arith.constant dense<0.000000e+00> : vector<8x8xf32>
    %99 = tpu.matmul %94, %96, %cst_54 {dimension_numbers = #tpu.dot_dimension_numbers<[1], [1], [0], [0], [0, 0, 1, 0], [], []>} : vector<8x8xbf16>, vector<8x8xbf16>, vector<8x8xf32> -> vector<8x8xf32>
    %cst_55 = arith.constant 0.353553385 : f32
    %100 = vector.broadcast %cst_55 : f32 to vector<8x8xf32>
    %101 = arith.mulf %99, %100 : vector<8x8xf32>
    %102 = vector.broadcast %9 : vector<1x8xf32> to vector<8x8xf32>
    %103 = arith.addf %101, %102 : vector<8x8xf32>
    %cst_56 = arith.constant -1.000000e+30 : f32
    %104 = vector.broadcast %cst_56 : f32 to vector<8x8xf32>
    %105 = arith.maximumf %103, %104 : vector<8x8xf32>
    %cst_57 = arith.constant dense<0xFF800000> : vector<8xf32>
    %106 = vector.multi_reduction <maximumf>, %105, %cst_57 [1] : vector<8x8xf32> to vector<8xf32>
    %107 = vector.shape_cast %106 : vector<8xf32> to vector<8x1xf32>
    %108 = vector.broadcast %107 : vector<8x1xf32> to vector<8x8xf32>
    %109 = arith.subf %105, %108 : vector<8x8xf32>
    %110 = math.exp %109 : vector<8x8xf32>
    %cst_58 = arith.constant dense<0.000000e+00> : vector<8xf32>
    %111 = vector.multi_reduction <add>, %110, %cst_58 [1] : vector<8x8xf32> to vector<8xf32>
    %112 = vector.shape_cast %111 : vector<8xf32> to vector<8x1xf32>
    %113 = tpu.reciprocal %112 {approx = true} : vector<8x1xf32> -> vector<8x1xf32>
    %114 = vector.broadcast %113 : vector<8x1xf32> to vector<8x8xf32>
    %115 = arith.mulf %110, %114 : vector<8x8xf32>
    %c0_59 = arith.constant 0 : index
    %c2 = arith.constant 2 : index
    %c0_60 = arith.constant 0 : index
    %c0_61 = arith.constant 0 : index
    %116 = vector.load %arg17[%c0_59, %c2, %c0_60, %c0_61] : memref<1x4x8x8xf32, #tpu.memory_space<vmem>>, vector<1x1x8x8xf32>
    %117 = vector.shape_cast %116 : vector<1x1x8x8xf32> to vector<8x8xf32>
    %118 = vector.shape_cast %115 : vector<8x8xf32> to vector<1x1x8x8xf32>
    tpu.vector_store %arg17[%c0_59, %c2, %c0_60, %c0_61], %118 {strides = array<i32>} : memref<1x4x8x8xf32, #tpu.memory_space<vmem>>, vector<1x1x8x8xf32>,
    %119 = arith.truncf %115 : vector<8x8xf32> to vector<8x8xbf16>
    %cst_62 = arith.constant dense<0.000000e+00> : vector<8x8xf32>
    %120 = tpu.matmul %119, %98, %cst_62 {dimension_numbers = #tpu.dot_dimension_numbers<[1], [0], [0], [1], [0, 0, 1, 1], [], []>} : vector<8x8xbf16>, vector<8x8xbf16>, vector<8x8xf32> -> vector<8x8xf32>
    %121 = arith.truncf %120 : vector<8x8xf32> to vector<8x8xbf16>
    %c16 = arith.constant 16 : index
    %c0_63 = arith.constant 0 : index
    %122 = vector.load %arg12[%c16, %c0_63] : memref<32x32xbf16, #tpu.memory_space<vmem>>, vector<8x32xbf16>
    %cst_64 = arith.constant dense<0.000000e+00> : vector<8x32xf32>
    %123 = tpu.matmul %121, %122, %cst_64 {dimension_numbers = #tpu.dot_dimension_numbers<[1], [0], [0], [1], [0, 0, 1, 1], [], []>} : vector<8x8xbf16>, vector<8x32xbf16>, vector<8x32xf32> -> vector<8x32xf32>
    %124 = arith.addf %92, %123 : vector<8x32xf32>
    %125 = vector.extract_strided_slice %15 {offsets = [0, 24], sizes = [8, 8], strides = [1, 1]} : vector<8x32xf32> to vector<8x8xf32>
    %126 = arith.truncf %125 : vector<8x8xf32> to vector<8x8xbf16>
    %127 = vector.extract_strided_slice %21 {offsets = [0, 24], sizes = [8, 8], strides = [1, 1]} : vector<8x32xf32> to vector<8x8xf32>
    %128 = arith.truncf %127 : vector<8x8xf32> to vector<8x8xbf16>
    %129 = vector.extract_strided_slice %27 {offsets = [0, 24], sizes = [8, 8], strides = [1, 1]} : vector<8x32xf32> to vector<8x8xf32>
    %130 = arith.truncf %129 : vector<8x8xf32> to vector<8x8xbf16>
    %cst_65 = arith.constant dense<0.000000e+00> : vector<8x8xf32>
    %131 = tpu.matmul %126, %128, %cst_65 {dimension_numbers = #tpu.dot_dimension_numbers<[1], [1], [0], [0], [0, 0, 1, 0], [], []>} : vector<8x8xbf16>, vector<8x8xbf16>, vector<8x8xf32> -> vector<8x8xf32>
    %cst_66 = arith.constant 0.353553385 : f32
    %132 = vector.broadcast %cst_66 : f32 to vector<8x8xf32>
    %133 = arith.mulf %131, %132 : vector<8x8xf32>
    %134 = vector.broadcast %9 : vector<1x8xf32> to vector<8x8xf32>
    %135 = arith.addf %133, %134 : vector<8x8xf32>
    %cst_67 = arith.constant -1.000000e+30 : f32
    %136 = vector.broadcast %cst_67 : f32 to vector<8x8xf32>
    %137 = arith.maximumf %135, %136 : vector<8x8xf32>
    %cst_68 = arith.constant dense<0xFF800000> : vector<8xf32>
    %138 = vector.multi_reduction <maximumf>, %137, %cst_68 [1] : vector<8x8xf32> to vector<8xf32>
    %139 = vector.shape_cast %138 : vector<8xf32> to vector<8x1xf32>
    %140 = vector.broadcast %139 : vector<8x1xf32> to vector<8x8xf32>
    %141 = arith.subf %137, %140 : vector<8x8xf32>
    %142 = math.exp %141 : vector<8x8xf32>
    %cst_69 = arith.constant dense<0.000000e+00> : vector<8xf32>
    %143 = vector.multi_reduction <add>, %142, %cst_69 [1] : vector<8x8xf32> to vector<8xf32>
    %144 = vector.shape_cast %143 : vector<8xf32> to vector<8x1xf32>
    %145 = tpu.reciprocal %144 {approx = true} : vector<8x1xf32> -> vector<8x1xf32>
    %146 = vector.broadcast %145 : vector<8x1xf32> to vector<8x8xf32>
    %147 = arith.mulf %142, %146 : vector<8x8xf32>
    %c0_70 = arith.constant 0 : index
    %c3 = arith.constant 3 : index
    %c0_71 = arith.constant 0 : index
    %c0_72 = arith.constant 0 : index
    %148 = vector.load %arg17[%c0_70, %c3, %c0_71, %c0_72] : memref<1x4x8x8xf32, #tpu.memory_space<vmem>>, vector<1x1x8x8xf32>
    %149 = vector.shape_cast %148 : vector<1x1x8x8xf32> to vector<8x8xf32>
    %150 = vector.shape_cast %147 : vector<8x8xf32> to vector<1x1x8x8xf32>
    tpu.vector_store %arg17[%c0_70, %c3, %c0_71, %c0_72], %150 {strides = array<i32>} : memref<1x4x8x8xf32, #tpu.memory_space<vmem>>, vector<1x1x8x8xf32>,
    %151 = arith.truncf %147 : vector<8x8xf32> to vector<8x8xbf16>
    %cst_73 = arith.constant dense<0.000000e+00> : vector<8x8xf32>
    %152 = tpu.matmul %151, %130, %cst_73 {dimension_numbers = #tpu.dot_dimension_numbers<[1], [0], [0], [1], [0, 0, 1, 1], [], []>} : vector<8x8xbf16>, vector<8x8xbf16>, vector<8x8xf32> -> vector<8x8xf32>
    %153 = arith.truncf %152 : vector<8x8xf32> to vector<8x8xbf16>
    %c24 = arith.constant 24 : index
    %c0_74 = arith.constant 0 : index
    %154 = vector.load %arg12[%c24, %c0_74] : memref<32x32xbf16, #tpu.memory_space<vmem>>, vector<8x32xbf16>
    %cst_75 = arith.constant dense<0.000000e+00> : vector<8x32xf32>
    %155 = tpu.matmul %153, %154, %cst_75 {dimension_numbers = #tpu.dot_dimension_numbers<[1], [0], [0], [1], [0, 0, 1, 1], [], []>} : vector<8x8xbf16>, vector<8x32xbf16>, vector<8x32xf32> -> vector<8x32xf32>
    %156 = arith.addf %124, %155 : vector<8x32xf32>
    %c0_76 = arith.constant 0 : index
    %c0_77 = arith.constant 0 : index
    %157 = vector.load %arg13[%c0_76, %c0_77] : memref<1x32xf32, #tpu.memory_space<vmem>>, vector<1x32xf32>
    %158 = vector.broadcast %157 : vector<1x32xf32> to vector<8x32xf32>
    %159 = arith.addf %156, %158 : vector<8x32xf32>
    %160 = arith.addf %159, %7 : vector<8x32xf32>
    %cst_78 = arith.constant dense<0.000000e+00> : vector<8xf32>
    %161 = vector.multi_reduction <add>, %160, %cst_78 [1] : vector<8x32xf32> to vector<8xf32>
    %162 = vector.shape_cast %161 : vector<8xf32> to vector<8x1xf32>
    %cst_79 = arith.constant 3.200000e+01 : f32
    %163 = vector.broadcast %cst_79 : f32 to vector<8x1xf32>
    %164 = arith.divf %162, %163 : vector<8x1xf32>
    %165 = vector.broadcast %164 : vector<8x1xf32> to vector<8x32xf32>
    %166 = arith.subf %160, %165 : vector<8x32xf32>
    %167 = arith.mulf %166, %166 : vector<8x32xf32>
    %cst_80 = arith.constant dense<0.000000e+00> : vector<8xf32>
    %168 = vector.multi_reduction <add>, %167, %cst_80 [1] : vector<8x32xf32> to vector<8xf32>
    %169 = vector.shape_cast %168 : vector<8xf32> to vector<8x1xf32>
    %cst_81 = arith.constant 3.200000e+01 : f32
    %170 = vector.broadcast %cst_81 : f32 to vector<8x1xf32>
    %171 = arith.divf %169, %170 : vector<8x1xf32>
    %172 = vector.broadcast %164 : vector<8x1xf32> to vector<8x32xf32>
    %173 = arith.subf %160, %172 : vector<8x32xf32>
    %cst_82 = arith.constant 9.99999974E-6 : f32
    %174 = vector.broadcast %cst_82 : f32 to vector<8x1xf32>
    %175 = arith.addf %171, %174 : vector<8x1xf32>
    %176 = math.rsqrt %175 : vector<8x1xf32>
    %177 = vector.broadcast %176 : vector<8x1xf32> to vector<8x32xf32>
    %178 = arith.mulf %173, %177 : vector<8x32xf32>
    %c0_83 = arith.constant 0 : index
    %c0_84 = arith.constant 0 : index
    %179 = vector.load %arg14[%c0_83, %c0_84] : memref<1x32xf32, #tpu.memory_space<vmem>>, vector<1x32xf32>
    %180 = vector.broadcast %179 : vector<1x32xf32> to vector<8x32xf32>
    %181 = arith.mulf %178, %180 : vector<8x32xf32>
    %c0_85 = arith.constant 0 : index
    %c0_86 = arith.constant 0 : index
    %182 = vector.load %arg15[%c0_85, %c0_86] : memref<1x32xf32, #tpu.memory_space<vmem>>, vector<1x32xf32>
    %183 = vector.broadcast %182 : vector<1x32xf32> to vector<8x32xf32>
    %184 = arith.addf %181, %183 : vector<8x32xf32>
    %c0_87 = arith.constant 0 : index
    %c0_88 = arith.constant 0 : index
    %c0_89 = arith.constant 0 : index
    %185 = vector.load %arg16[%c0_87, %c0_88, %c0_89] : memref<1x8x32xf32, #tpu.memory_space<vmem>>, vector<1x8x32xf32>
    %186 = vector.shape_cast %185 : vector<1x8x32xf32> to vector<8x32xf32>
    %187 = vector.shape_cast %184 : vector<8x32xf32> to vector<1x8x32xf32>
    tpu.vector_store %arg16[%c0_87, %c0_88, %c0_89], %187 {strides = array<i32>} : memref<1x8x32xf32, #tpu.memory_space<vmem>>, vector<1x8x32xf32>,
    return
  }
  func.func @transform_0(%arg0: i32) -> (i32, i32, i32) {
    %c0_i32 = arith.constant 0 : i32
    %c0_i32_0 = arith.constant 0 : i32
    %c0_i32_1 = arith.constant 0 : i32
    return %arg0, %c0_i32, %c0_i32_0 : i32, i32, i32
  }
  func.func @transform_1(%arg0: i32) -> (i32, i32, i32) {
    %c0_i32 = arith.constant 0 : i32
    %c0_i32_0 = arith.constant 0 : i32
    %c0_i32_1 = arith.constant 0 : i32
    return %arg0, %c0_i32, %c0_i32_0 : i32, i32, i32
  }
  func.func @transform_2(%arg0: i32) -> (i32, i32, i32) {
    %c0_i32 = arith.constant 0 : i32
    %c0_i32_0 = arith.constant 0 : i32
    %c0_i32_1 = arith.constant 0 : i32
    return %arg0, %c0_i32, %c0_i32_0 : i32, i32, i32
  }
  func.func @transform_3(%arg0: i32) -> (i32, i32, i32) {
    %c0_i32 = arith.constant 0 : i32
    %c0_i32_0 = arith.constant 0 : i32
    %c0_i32_1 = arith.constant 0 : i32
    return %arg0, %c0_i32, %c0_i32_0 : i32, i32, i32
  }
  func.func @transform_4(%arg0: i32) -> (i32, i32, i32, i32) {
    %c0_i32 = arith.constant 0 : i32
    %c0_i32_0 = arith.constant 0 : i32
    %c0_i32_1 = arith.constant 0 : i32
    %c0_i32_2 = arith.constant 0 : i32
    return %arg0, %c0_i32, %c0_i32_0, %c0_i32_1 : i32, i32, i32, i32
  }
  func.func @transform_5(%arg0: i32) -> (i32, i32) {
    %c0_i32 = arith.constant 0 : i32
    %c0_i32_0 = arith.constant 0 : i32
    %c0_i32_1 = arith.constant 0 : i32
    return %c0_i32, %c0_i32_0 : i32, i32
  }
  func.func @transform_6(%arg0: i32) -> (i32, i32) {
    %c0_i32 = arith.constant 0 : i32
    %c0_i32_0 = arith.constant 0 : i32
    %c0_i32_1 = arith.constant 0 : i32
    return %c0_i32, %c0_i32_0 : i32, i32
  }
  func.func @transform_7(%arg0: i32) -> (i32, i32) {
    %c0_i32 = arith.constant 0 : i32
    %c0_i32_0 = arith.constant 0 : i32
    %c0_i32_1 = arith.constant 0 : i32
    return %c0_i32, %c0_i32_0 : i32, i32
  }
  func.func @transform_8(%arg0: i32) -> (i32, i32) {
    %c0_i32 = arith.constant 0 : i32
    %c0_i32_0 = arith.constant 0 : i32
    %c0_i32_1 = arith.constant 0 : i32
    return %c0_i32, %c0_i32_0 : i32, i32
  }
  func.func @transform_9(%arg0: i32) -> (i32, i32) {
    %c0_i32 = arith.constant 0 : i32
    %c0_i32_0 = arith.constant 0 : i32
    %c0_i32_1 = arith.constant 0 : i32
    return %c0_i32, %c0_i32_0 : i32, i32
  }
  func.func @transform_10(%arg0: i32) -> (i32, i32) {
    %c0_i32 = arith.constant 0 : i32
    %c0_i32_0 = arith.constant 0 : i32
    %c0_i32_1 = arith.constant 0 : i32
    return %c0_i32, %c0_i32_0 : i32, i32
  }
  func.func @transform_11(%arg0: i32) -> (i32, i32) {
    %c0_i32 = arith.constant 0 : i32
    %c0_i32_0 = arith.constant 0 : i32
    %c0_i32_1 = arith.constant 0 : i32
    return %c0_i32, %c0_i32_0 : i32, i32
  }
  func.func @transform_12(%arg0: i32) -> (i32, i32) {
    %c0_i32 = arith.constant 0 : i32
    %c0_i32_0 = arith.constant 0 : i32
    %c0_i32_1 = arith.constant 0 : i32
    return %c0_i32, %c0_i32_0 : i32, i32
  }
  func.func @transform_13(%arg0: i32) -> (i32, i32) {
    %c0_i32 = arith.constant 0 : i32
    %c0_i32_0 = arith.constant 0 : i32
    %c0_i32_1 = arith.constant 0 : i32
    return %c0_i32, %c0_i32_0 : i32, i32
  }
  func.func @transform_14(%arg0: i32) -> (i32, i32) {
    %c0_i32 = arith.constant 0 : i32
    %c0_i32_0 = arith.constant 0 : i32
    %c0_i32_1 = arith.constant 0 : i32
    return %c0_i32, %c0_i32_0 : i32, i32
  }
  func.func @transform_15(%arg0: i32) -> (i32, i32, i32) {
    %c0_i32 = arith.constant 0 : i32
    %c0_i32_0 = arith.constant 0 : i32
    %c0_i32_1 = arith.constant 0 : i32
    return %arg0, %c0_i32, %c0_i32_0 : i32, i32, i32
  }
  func.func @transform_16(%arg0: i32) -> (i32, i32, i32, i32) {
    %c0_i32 = arith.constant 0 : i32
    %c0_i32_0 = arith.constant 0 : i32
    %c0_i32_1 = arith.constant 0 : i32
    %c0_i32_2 = arith.constant 0 : i32
    return %arg0, %c0_i32, %c0_i32_0, %c0_i32_1 : i32, i32, i32, i32
  }
}

module attributes {stable_mosaic.version = 11 : i64} {
  func.func @_mha_block_kernel(%arg0: i32, %arg1: memref<1x8x32xf32, #tpu.memory_space<vmem>>, %arg2: memref<1x8x32xf32, #tpu.memory_space<vmem>>, %arg3: memref<1x8x32xf32, #tpu.memory_space<vmem>>, %arg4: memref<1x8x32xf32, #tpu.memory_space<vmem>>, %arg5: memref<1x1x8x8xf32, #tpu.memory_space<vmem>>, %arg6: memref<32x32xbf16, #tpu.memory_space<vmem>>, %arg7: memref<1x32xf32, #tpu.memory_space<vmem>>, %arg8: memref<32x32xbf16, #tpu.memory_space<vmem>>, %arg9: memref<1x32xf32, #tpu.memory_space<vmem>>, %arg10: memref<32x32xbf16, #tpu.memory_space<vmem>>, %arg11: memref<1x32xf32, #tpu.memory_space<vmem>>, %arg12: memref<32x32xbf16, #tpu.memory_space<vmem>>, %arg13: memref<1x32xf32, #tpu.memory_space<vmem>>, %arg14: memref<1x32xf32, #tpu.memory_space<vmem>>, %arg15: memref<1x32xf32, #tpu.memory_space<vmem>>, %arg16: memref<1x8x32xf32, #tpu.memory_space<vmem>>) attributes {dimension_semantics = [#tpu.dimension_semantics<parallel>], iteration_bounds = array<i64: 2>, scalar_prefetch = 0 : i64, scratch_operands = 0 : i64, tpu.core_type = #tpu.core_type<tc>, window_params = [{transform_indices = @transform_0, window_bounds = array<i64: 1, 8, 32>}, {transform_indices = @transform_1, window_bounds = array<i64: 1, 8, 32>}, {transform_indices = @transform_2, window_bounds = array<i64: 1, 8, 32>}, {transform_indices = @transform_3, window_bounds = array<i64: 1, 8, 32>}, {transform_indices = @transform_4, window_bounds = array<i64: 1, 1, 8, 8>}, {pipeline_mode = #tpu.pipeline_mode<synchronous>, transform_indices = @transform_5, window_bounds = array<i64: 32, 32>}, {pipeline_mode = #tpu.pipeline_mode<synchronous>, transform_indices = @transform_6, window_bounds = array<i64: 1, 32>}, {pipeline_mode = #tpu.pipeline_mode<synchronous>, transform_indices = @transform_7, window_bounds = array<i64: 32, 32>}, {pipeline_mode = #tpu.pipeline_mode<synchronous>, transform_indices = @transform_8, window_bounds = array<i64: 1, 32>}, {pipeline_mode = #tpu.pipeline_mode<synchronous>, transform_indices = @transform_9, window_bounds = array<i64: 32, 32>}, {pipeline_mode = #tpu.pipeline_mode<synchronous>, transform_indices = @transform_10, window_bounds = array<i64: 1, 32>}, {pipeline_mode = #tpu.pipeline_mode<synchronous>, transform_indices = @transform_11, window_bounds = array<i64: 32, 32>}, {pipeline_mode = #tpu.pipeline_mode<synchronous>, transform_indices = @transform_12, window_bounds = array<i64: 1, 32>}, {pipeline_mode = #tpu.pipeline_mode<synchronous>, transform_indices = @transform_13, window_bounds = array<i64: 1, 32>}, {pipeline_mode = #tpu.pipeline_mode<synchronous>, transform_indices = @transform_14, window_bounds = array<i64: 1, 32>}, {transform_indices = @transform_15, window_bounds = array<i64: 1, 8, 32>}]} {
    %c0 = arith.constant 0 : index
    %c0_0 = arith.constant 0 : index
    %c0_1 = arith.constant 0 : index
    %0 = vector.load %arg1[%c0, %c0_0, %c0_1] : memref<1x8x32xf32, #tpu.memory_space<vmem>>, vector<1x8x32xf32>
    %1 = vector.shape_cast %0 : vector<1x8x32xf32> to vector<8x32xf32>
    %c0_2 = arith.constant 0 : index
    %c0_3 = arith.constant 0 : index
    %c0_4 = arith.constant 0 : index
    %2 = vector.load %arg2[%c0_2, %c0_3, %c0_4] : memref<1x8x32xf32, #tpu.memory_space<vmem>>, vector<1x8x32xf32>
    %3 = vector.shape_cast %2 : vector<1x8x32xf32> to vector<8x32xf32>
    %c0_5 = arith.constant 0 : index
    %c0_6 = arith.constant 0 : index
    %c0_7 = arith.constant 0 : index
    %4 = vector.load %arg3[%c0_5, %c0_6, %c0_7] : memref<1x8x32xf32, #tpu.memory_space<vmem>>, vector<1x8x32xf32>
    %5 = vector.shape_cast %4 : vector<1x8x32xf32> to vector<8x32xf32>
    %c0_8 = arith.constant 0 : index
    %c0_9 = arith.constant 0 : index
    %c0_10 = arith.constant 0 : index
    %6 = vector.load %arg4[%c0_8, %c0_9, %c0_10] : memref<1x8x32xf32, #tpu.memory_space<vmem>>, vector<1x8x32xf32>
    %7 = vector.shape_cast %6 : vector<1x8x32xf32> to vector<8x32xf32>
    %c0_11 = arith.constant 0 : index
    %c0_12 = arith.constant 0 : index
    %c0_13 = arith.constant 0 : index
    %c0_14 = arith.constant 0 : index
    %8 = vector.load %arg5[%c0_11, %c0_12, %c0_13, %c0_14] : memref<1x1x8x8xf32, #tpu.memory_space<vmem>>, vector<1x1x8x8xf32>
    %9 = vector.shape_cast %8 : vector<1x1x8x8xf32> to vector<8x8xf32>
    %10 = arith.truncf %1 : vector<8x32xf32> to vector<8x32xbf16>
    %c0_15 = arith.constant 0 : index
    %c0_16 = arith.constant 0 : index
    %11 = vector.load %arg6[%c0_15, %c0_16] : memref<32x32xbf16, #tpu.memory_space<vmem>>, vector<32x32xbf16>
    %cst = arith.constant dense<0.000000e+00> : vector<8x32xf32>
    %12 = tpu.matmul %10, %11, %cst {dimension_numbers = #tpu.dot_dimension_numbers<[1], [0], [0], [1], [0, 0, 1, 1], [], []>} : vector<8x32xbf16>, vector<32x32xbf16>, vector<8x32xf32> -> vector<8x32xf32>
    %c0_17 = arith.constant 0 : index
    %c0_18 = arith.constant 0 : index
    %13 = vector.load %arg7[%c0_17, %c0_18] : memref<1x32xf32, #tpu.memory_space<vmem>>, vector<1x32xf32>
    %14 = vector.broadcast %13 : vector<1x32xf32> to vector<8x32xf32>
    %15 = arith.addf %12, %14 : vector<8x32xf32>
    %16 = arith.truncf %3 : vector<8x32xf32> to vector<8x32xbf16>
    %c0_19 = arith.constant 0 : index
    %c0_20 = arith.constant 0 : index
    %17 = vector.load %arg8[%c0_19, %c0_20] : memref<32x32xbf16, #tpu.memory_space<vmem>>, vector<32x32xbf16>
    %cst_21 = arith.constant dense<0.000000e+00> : vector<8x32xf32>
    %18 = tpu.matmul %16, %17, %cst_21 {dimension_numbers = #tpu.dot_dimension_numbers<[1], [0], [0], [1], [0, 0, 1, 1], [], []>} : vector<8x32xbf16>, vector<32x32xbf16>, vector<8x32xf32> -> vector<8x32xf32>
    %c0_22 = arith.constant 0 : index
    %c0_23 = arith.constant 0 : index
    %19 = vector.load %arg9[%c0_22, %c0_23] : memref<1x32xf32, #tpu.memory_space<vmem>>, vector<1x32xf32>
    %20 = vector.broadcast %19 : vector<1x32xf32> to vector<8x32xf32>
    %21 = arith.addf %18, %20 : vector<8x32xf32>
    %22 = arith.truncf %5 : vector<8x32xf32> to vector<8x32xbf16>
    %c0_24 = arith.constant 0 : index
    %c0_25 = arith.constant 0 : index
    %23 = vector.load %arg10[%c0_24, %c0_25] : memref<32x32xbf16, #tpu.memory_space<vmem>>, vector<32x32xbf16>
    %cst_26 = arith.constant dense<0.000000e+00> : vector<8x32xf32>
    %24 = tpu.matmul %22, %23, %cst_26 {dimension_numbers = #tpu.dot_dimension_numbers<[1], [0], [0], [1], [0, 0, 1, 1], [], []>} : vector<8x32xbf16>, vector<32x32xbf16>, vector<8x32xf32> -> vector<8x32xf32>
    %c0_27 = arith.constant 0 : index
    %c0_28 = arith.constant 0 : index
    %25 = vector.load %arg11[%c0_27, %c0_28] : memref<1x32xf32, #tpu.memory_space<vmem>>, vector<1x32xf32>
    %26 = vector.broadcast %25 : vector<1x32xf32> to vector<8x32xf32>
    %27 = arith.addf %24, %26 : vector<8x32xf32>
    %cst_29 = arith.constant 0.000000e+00 : f32
    %28 = vector.broadcast %cst_29 : f32 to vector<8x32xf32>
    %29 = vector.extract_strided_slice %15 {offsets = [0, 0], sizes = [8, 8], strides = [1, 1]} : vector<8x32xf32> to vector<8x8xf32>
    %30 = arith.truncf %29 : vector<8x8xf32> to vector<8x8xbf16>
    %31 = vector.extract_strided_slice %21 {offsets = [0, 0], sizes = [8, 8], strides = [1, 1]} : vector<8x32xf32> to vector<8x8xf32>
    %32 = arith.truncf %31 : vector<8x8xf32> to vector<8x8xbf16>
    %33 = vector.extract_strided_slice %27 {offsets = [0, 0], sizes = [8, 8], strides = [1, 1]} : vector<8x32xf32> to vector<8x8xf32>
    %34 = arith.truncf %33 : vector<8x8xf32> to vector<8x8xbf16>
    %cst_30 = arith.constant dense<0.000000e+00> : vector<8x8xf32>
    %35 = tpu.matmul %30, %32, %cst_30 {dimension_numbers = #tpu.dot_dimension_numbers<[1], [1], [0], [0], [0, 0, 1, 0], [], []>} : vector<8x8xbf16>, vector<8x8xbf16>, vector<8x8xf32> -> vector<8x8xf32>
    %cst_31 = arith.constant 0.353553385 : f32
    %36 = vector.broadcast %cst_31 : f32 to vector<8x8xf32>
    %37 = arith.mulf %35, %36 : vector<8x8xf32>
    %38 = arith.addf %37, %9 : vector<8x8xf32>
    %cst_32 = arith.constant -1.000000e+30 : f32
    %39 = vector.broadcast %cst_32 : f32 to vector<8x8xf32>
    %40 = arith.maximumf %38, %39 : vector<8x8xf32>
    %cst_33 = arith.constant dense<0xFF800000> : vector<8xf32>
    %41 = vector.multi_reduction <maximumf>, %40, %cst_33 [1] : vector<8x8xf32> to vector<8xf32>
    %42 = vector.shape_cast %41 : vector<8xf32> to vector<8x1xf32>
    %43 = vector.broadcast %42 : vector<8x1xf32> to vector<8x8xf32>
    %44 = arith.subf %40, %43 : vector<8x8xf32>
    %45 = math.exp %44 : vector<8x8xf32>
    %cst_34 = arith.constant dense<0.000000e+00> : vector<8xf32>
    %46 = vector.multi_reduction <add>, %45, %cst_34 [1] : vector<8x8xf32> to vector<8xf32>
    %47 = vector.shape_cast %46 : vector<8xf32> to vector<8x1xf32>
    %48 = tpu.reciprocal %47 {approx = true} : vector<8x1xf32> -> vector<8x1xf32>
    %49 = vector.broadcast %48 : vector<8x1xf32> to vector<8x8xf32>
    %50 = arith.mulf %45, %49 : vector<8x8xf32>
    %51 = arith.truncf %50 : vector<8x8xf32> to vector<8x8xbf16>
    %cst_35 = arith.constant dense<0.000000e+00> : vector<8x8xf32>
    %52 = tpu.matmul %51, %34, %cst_35 {dimension_numbers = #tpu.dot_dimension_numbers<[1], [0], [0], [1], [0, 0, 1, 1], [], []>} : vector<8x8xbf16>, vector<8x8xbf16>, vector<8x8xf32> -> vector<8x8xf32>
    %53 = arith.truncf %52 : vector<8x8xf32> to vector<8x8xbf16>
    %c0_36 = arith.constant 0 : index
    %c0_37 = arith.constant 0 : index
    %54 = vector.load %arg12[%c0_36, %c0_37] : memref<32x32xbf16, #tpu.memory_space<vmem>>, vector<8x32xbf16>
    %cst_38 = arith.constant dense<0.000000e+00> : vector<8x32xf32>
    %55 = tpu.matmul %53, %54, %cst_38 {dimension_numbers = #tpu.dot_dimension_numbers<[1], [0], [0], [1], [0, 0, 1, 1], [], []>} : vector<8x8xbf16>, vector<8x32xbf16>, vector<8x32xf32> -> vector<8x32xf32>
    %56 = arith.addf %28, %55 : vector<8x32xf32>
    %57 = vector.extract_strided_slice %15 {offsets = [0, 8], sizes = [8, 8], strides = [1, 1]} : vector<8x32xf32> to vector<8x8xf32>
    %58 = arith.truncf %57 : vector<8x8xf32> to vector<8x8xbf16>
    %59 = vector.extract_strided_slice %21 {offsets = [0, 8], sizes = [8, 8], strides = [1, 1]} : vector<8x32xf32> to vector<8x8xf32>
    %60 = arith.truncf %59 : vector<8x8xf32> to vector<8x8xbf16>
    %61 = vector.extract_strided_slice %27 {offsets = [0, 8], sizes = [8, 8], strides = [1, 1]} : vector<8x32xf32> to vector<8x8xf32>
    %62 = arith.truncf %61 : vector<8x8xf32> to vector<8x8xbf16>
    %cst_39 = arith.constant dense<0.000000e+00> : vector<8x8xf32>
    %63 = tpu.matmul %58, %60, %cst_39 {dimension_numbers = #tpu.dot_dimension_numbers<[1], [1], [0], [0], [0, 0, 1, 0], [], []>} : vector<8x8xbf16>, vector<8x8xbf16>, vector<8x8xf32> -> vector<8x8xf32>
    %cst_40 = arith.constant 0.353553385 : f32
    %64 = vector.broadcast %cst_40 : f32 to vector<8x8xf32>
    %65 = arith.mulf %63, %64 : vector<8x8xf32>
    %66 = arith.addf %65, %9 : vector<8x8xf32>
    %cst_41 = arith.constant -1.000000e+30 : f32
    %67 = vector.broadcast %cst_41 : f32 to vector<8x8xf32>
    %68 = arith.maximumf %66, %67 : vector<8x8xf32>
    %cst_42 = arith.constant dense<0xFF800000> : vector<8xf32>
    %69 = vector.multi_reduction <maximumf>, %68, %cst_42 [1] : vector<8x8xf32> to vector<8xf32>
    %70 = vector.shape_cast %69 : vector<8xf32> to vector<8x1xf32>
    %71 = vector.broadcast %70 : vector<8x1xf32> to vector<8x8xf32>
    %72 = arith.subf %68, %71 : vector<8x8xf32>
    %73 = math.exp %72 : vector<8x8xf32>
    %cst_43 = arith.constant dense<0.000000e+00> : vector<8xf32>
    %74 = vector.multi_reduction <add>, %73, %cst_43 [1] : vector<8x8xf32> to vector<8xf32>
    %75 = vector.shape_cast %74 : vector<8xf32> to vector<8x1xf32>
    %76 = tpu.reciprocal %75 {approx = true} : vector<8x1xf32> -> vector<8x1xf32>
    %77 = vector.broadcast %76 : vector<8x1xf32> to vector<8x8xf32>
    %78 = arith.mulf %73, %77 : vector<8x8xf32>
    %79 = arith.truncf %78 : vector<8x8xf32> to vector<8x8xbf16>
    %cst_44 = arith.constant dense<0.000000e+00> : vector<8x8xf32>
    %80 = tpu.matmul %79, %62, %cst_44 {dimension_numbers = #tpu.dot_dimension_numbers<[1], [0], [0], [1], [0, 0, 1, 1], [], []>} : vector<8x8xbf16>, vector<8x8xbf16>, vector<8x8xf32> -> vector<8x8xf32>
    %81 = arith.truncf %80 : vector<8x8xf32> to vector<8x8xbf16>
    %c8 = arith.constant 8 : index
    %c0_45 = arith.constant 0 : index
    %82 = vector.load %arg12[%c8, %c0_45] : memref<32x32xbf16, #tpu.memory_space<vmem>>, vector<8x32xbf16>
    %cst_46 = arith.constant dense<0.000000e+00> : vector<8x32xf32>
    %83 = tpu.matmul %81, %82, %cst_46 {dimension_numbers = #tpu.dot_dimension_numbers<[1], [0], [0], [1], [0, 0, 1, 1], [], []>} : vector<8x8xbf16>, vector<8x32xbf16>, vector<8x32xf32> -> vector<8x32xf32>
    %84 = arith.addf %56, %83 : vector<8x32xf32>
    %85 = vector.extract_strided_slice %15 {offsets = [0, 16], sizes = [8, 8], strides = [1, 1]} : vector<8x32xf32> to vector<8x8xf32>
    %86 = arith.truncf %85 : vector<8x8xf32> to vector<8x8xbf16>
    %87 = vector.extract_strided_slice %21 {offsets = [0, 16], sizes = [8, 8], strides = [1, 1]} : vector<8x32xf32> to vector<8x8xf32>
    %88 = arith.truncf %87 : vector<8x8xf32> to vector<8x8xbf16>
    %89 = vector.extract_strided_slice %27 {offsets = [0, 16], sizes = [8, 8], strides = [1, 1]} : vector<8x32xf32> to vector<8x8xf32>
    %90 = arith.truncf %89 : vector<8x8xf32> to vector<8x8xbf16>
    %cst_47 = arith.constant dense<0.000000e+00> : vector<8x8xf32>
    %91 = tpu.matmul %86, %88, %cst_47 {dimension_numbers = #tpu.dot_dimension_numbers<[1], [1], [0], [0], [0, 0, 1, 0], [], []>} : vector<8x8xbf16>, vector<8x8xbf16>, vector<8x8xf32> -> vector<8x8xf32>
    %cst_48 = arith.constant 0.353553385 : f32
    %92 = vector.broadcast %cst_48 : f32 to vector<8x8xf32>
    %93 = arith.mulf %91, %92 : vector<8x8xf32>
    %94 = arith.addf %93, %9 : vector<8x8xf32>
    %cst_49 = arith.constant -1.000000e+30 : f32
    %95 = vector.broadcast %cst_49 : f32 to vector<8x8xf32>
    %96 = arith.maximumf %94, %95 : vector<8x8xf32>
    %cst_50 = arith.constant dense<0xFF800000> : vector<8xf32>
    %97 = vector.multi_reduction <maximumf>, %96, %cst_50 [1] : vector<8x8xf32> to vector<8xf32>
    %98 = vector.shape_cast %97 : vector<8xf32> to vector<8x1xf32>
    %99 = vector.broadcast %98 : vector<8x1xf32> to vector<8x8xf32>
    %100 = arith.subf %96, %99 : vector<8x8xf32>
    %101 = math.exp %100 : vector<8x8xf32>
    %cst_51 = arith.constant dense<0.000000e+00> : vector<8xf32>
    %102 = vector.multi_reduction <add>, %101, %cst_51 [1] : vector<8x8xf32> to vector<8xf32>
    %103 = vector.shape_cast %102 : vector<8xf32> to vector<8x1xf32>
    %104 = tpu.reciprocal %103 {approx = true} : vector<8x1xf32> -> vector<8x1xf32>
    %105 = vector.broadcast %104 : vector<8x1xf32> to vector<8x8xf32>
    %106 = arith.mulf %101, %105 : vector<8x8xf32>
    %107 = arith.truncf %106 : vector<8x8xf32> to vector<8x8xbf16>
    %cst_52 = arith.constant dense<0.000000e+00> : vector<8x8xf32>
    %108 = tpu.matmul %107, %90, %cst_52 {dimension_numbers = #tpu.dot_dimension_numbers<[1], [0], [0], [1], [0, 0, 1, 1], [], []>} : vector<8x8xbf16>, vector<8x8xbf16>, vector<8x8xf32> -> vector<8x8xf32>
    %109 = arith.truncf %108 : vector<8x8xf32> to vector<8x8xbf16>
    %c16 = arith.constant 16 : index
    %c0_53 = arith.constant 0 : index
    %110 = vector.load %arg12[%c16, %c0_53] : memref<32x32xbf16, #tpu.memory_space<vmem>>, vector<8x32xbf16>
    %cst_54 = arith.constant dense<0.000000e+00> : vector<8x32xf32>
    %111 = tpu.matmul %109, %110, %cst_54 {dimension_numbers = #tpu.dot_dimension_numbers<[1], [0], [0], [1], [0, 0, 1, 1], [], []>} : vector<8x8xbf16>, vector<8x32xbf16>, vector<8x32xf32> -> vector<8x32xf32>
    %112 = arith.addf %84, %111 : vector<8x32xf32>
    %113 = vector.extract_strided_slice %15 {offsets = [0, 24], sizes = [8, 8], strides = [1, 1]} : vector<8x32xf32> to vector<8x8xf32>
    %114 = arith.truncf %113 : vector<8x8xf32> to vector<8x8xbf16>
    %115 = vector.extract_strided_slice %21 {offsets = [0, 24], sizes = [8, 8], strides = [1, 1]} : vector<8x32xf32> to vector<8x8xf32>
    %116 = arith.truncf %115 : vector<8x8xf32> to vector<8x8xbf16>
    %117 = vector.extract_strided_slice %27 {offsets = [0, 24], sizes = [8, 8], strides = [1, 1]} : vector<8x32xf32> to vector<8x8xf32>
    %118 = arith.truncf %117 : vector<8x8xf32> to vector<8x8xbf16>
    %cst_55 = arith.constant dense<0.000000e+00> : vector<8x8xf32>
    %119 = tpu.matmul %114, %116, %cst_55 {dimension_numbers = #tpu.dot_dimension_numbers<[1], [1], [0], [0], [0, 0, 1, 0], [], []>} : vector<8x8xbf16>, vector<8x8xbf16>, vector<8x8xf32> -> vector<8x8xf32>
    %cst_56 = arith.constant 0.353553385 : f32
    %120 = vector.broadcast %cst_56 : f32 to vector<8x8xf32>
    %121 = arith.mulf %119, %120 : vector<8x8xf32>
    %122 = arith.addf %121, %9 : vector<8x8xf32>
    %cst_57 = arith.constant -1.000000e+30 : f32
    %123 = vector.broadcast %cst_57 : f32 to vector<8x8xf32>
    %124 = arith.maximumf %122, %123 : vector<8x8xf32>
    %cst_58 = arith.constant dense<0xFF800000> : vector<8xf32>
    %125 = vector.multi_reduction <maximumf>, %124, %cst_58 [1] : vector<8x8xf32> to vector<8xf32>
    %126 = vector.shape_cast %125 : vector<8xf32> to vector<8x1xf32>
    %127 = vector.broadcast %126 : vector<8x1xf32> to vector<8x8xf32>
    %128 = arith.subf %124, %127 : vector<8x8xf32>
    %129 = math.exp %128 : vector<8x8xf32>
    %cst_59 = arith.constant dense<0.000000e+00> : vector<8xf32>
    %130 = vector.multi_reduction <add>, %129, %cst_59 [1] : vector<8x8xf32> to vector<8xf32>
    %131 = vector.shape_cast %130 : vector<8xf32> to vector<8x1xf32>
    %132 = tpu.reciprocal %131 {approx = true} : vector<8x1xf32> -> vector<8x1xf32>
    %133 = vector.broadcast %132 : vector<8x1xf32> to vector<8x8xf32>
    %134 = arith.mulf %129, %133 : vector<8x8xf32>
    %135 = arith.truncf %134 : vector<8x8xf32> to vector<8x8xbf16>
    %cst_60 = arith.constant dense<0.000000e+00> : vector<8x8xf32>
    %136 = tpu.matmul %135, %118, %cst_60 {dimension_numbers = #tpu.dot_dimension_numbers<[1], [0], [0], [1], [0, 0, 1, 1], [], []>} : vector<8x8xbf16>, vector<8x8xbf16>, vector<8x8xf32> -> vector<8x8xf32>
    %137 = arith.truncf %136 : vector<8x8xf32> to vector<8x8xbf16>
    %c24 = arith.constant 24 : index
    %c0_61 = arith.constant 0 : index
    %138 = vector.load %arg12[%c24, %c0_61] : memref<32x32xbf16, #tpu.memory_space<vmem>>, vector<8x32xbf16>
    %cst_62 = arith.constant dense<0.000000e+00> : vector<8x32xf32>
    %139 = tpu.matmul %137, %138, %cst_62 {dimension_numbers = #tpu.dot_dimension_numbers<[1], [0], [0], [1], [0, 0, 1, 1], [], []>} : vector<8x8xbf16>, vector<8x32xbf16>, vector<8x32xf32> -> vector<8x32xf32>
    %140 = arith.addf %112, %139 : vector<8x32xf32>
    %c0_63 = arith.constant 0 : index
    %c0_64 = arith.constant 0 : index
    %141 = vector.load %arg13[%c0_63, %c0_64] : memref<1x32xf32, #tpu.memory_space<vmem>>, vector<1x32xf32>
    %142 = vector.broadcast %141 : vector<1x32xf32> to vector<8x32xf32>
    %143 = arith.addf %140, %142 : vector<8x32xf32>
    %144 = arith.addf %143, %7 : vector<8x32xf32>
    %cst_65 = arith.constant dense<0.000000e+00> : vector<8xf32>
    %145 = vector.multi_reduction <add>, %144, %cst_65 [1] : vector<8x32xf32> to vector<8xf32>
    %146 = vector.shape_cast %145 : vector<8xf32> to vector<8x1xf32>
    %cst_66 = arith.constant 3.200000e+01 : f32
    %147 = vector.broadcast %cst_66 : f32 to vector<8x1xf32>
    %148 = arith.divf %146, %147 : vector<8x1xf32>
    %149 = vector.broadcast %148 : vector<8x1xf32> to vector<8x32xf32>
    %150 = arith.subf %144, %149 : vector<8x32xf32>
    %151 = arith.mulf %150, %150 : vector<8x32xf32>
    %cst_67 = arith.constant dense<0.000000e+00> : vector<8xf32>
    %152 = vector.multi_reduction <add>, %151, %cst_67 [1] : vector<8x32xf32> to vector<8xf32>
    %153 = vector.shape_cast %152 : vector<8xf32> to vector<8x1xf32>
    %cst_68 = arith.constant 3.200000e+01 : f32
    %154 = vector.broadcast %cst_68 : f32 to vector<8x1xf32>
    %155 = arith.divf %153, %154 : vector<8x1xf32>
    %156 = vector.broadcast %148 : vector<8x1xf32> to vector<8x32xf32>
    %157 = arith.subf %144, %156 : vector<8x32xf32>
    %cst_69 = arith.constant 9.99999974E-6 : f32
    %158 = vector.broadcast %cst_69 : f32 to vector<8x1xf32>
    %159 = arith.addf %155, %158 : vector<8x1xf32>
    %160 = math.rsqrt %159 : vector<8x1xf32>
    %161 = vector.broadcast %160 : vector<8x1xf32> to vector<8x32xf32>
    %162 = arith.mulf %157, %161 : vector<8x32xf32>
    %c0_70 = arith.constant 0 : index
    %c0_71 = arith.constant 0 : index
    %163 = vector.load %arg14[%c0_70, %c0_71] : memref<1x32xf32, #tpu.memory_space<vmem>>, vector<1x32xf32>
    %164 = vector.broadcast %163 : vector<1x32xf32> to vector<8x32xf32>
    %165 = arith.mulf %162, %164 : vector<8x32xf32>
    %c0_72 = arith.constant 0 : index
    %c0_73 = arith.constant 0 : index
    %166 = vector.load %arg15[%c0_72, %c0_73] : memref<1x32xf32, #tpu.memory_space<vmem>>, vector<1x32xf32>
    %167 = vector.broadcast %166 : vector<1x32xf32> to vector<8x32xf32>
    %168 = arith.addf %165, %167 : vector<8x32xf32>
    %c0_74 = arith.constant 0 : index
    %c0_75 = arith.constant 0 : index
    %c0_76 = arith.constant 0 : index
    %169 = vector.load %arg16[%c0_74, %c0_75, %c0_76] : memref<1x8x32xf32, #tpu.memory_space<vmem>>, vector<1x8x32xf32>
    %170 = vector.shape_cast %169 : vector<1x8x32xf32> to vector<8x32xf32>
    %171 = vector.shape_cast %168 : vector<8x32xf32> to vector<1x8x32xf32>
    tpu.vector_store %arg16[%c0_74, %c0_75, %c0_76], %171 {strides = array<i32>} : memref<1x8x32xf32, #tpu.memory_space<vmem>>, vector<1x8x32xf32>,
    return
  }
  func.func @transform_0(%arg0: i32) -> (i32, i32, i32) {
    %c0_i32 = arith.constant 0 : i32
    %c0_i32_0 = arith.constant 0 : i32
    %c0_i32_1 = arith.constant 0 : i32
    return %arg0, %c0_i32, %c0_i32_0 : i32, i32, i32
  }
  func.func @transform_1(%arg0: i32) -> (i32, i32, i32) {
    %c0_i32 = arith.constant 0 : i32
    %c0_i32_0 = arith.constant 0 : i32
    %c0_i32_1 = arith.constant 0 : i32
    return %arg0, %c0_i32, %c0_i32_0 : i32, i32, i32
  }
  func.func @transform_2(%arg0: i32) -> (i32, i32, i32) {
    %c0_i32 = arith.constant 0 : i32
    %c0_i32_0 = arith.constant 0 : i32
    %c0_i32_1 = arith.constant 0 : i32
    return %arg0, %c0_i32, %c0_i32_0 : i32, i32, i32
  }
  func.func @transform_3(%arg0: i32) -> (i32, i32, i32) {
    %c0_i32 = arith.constant 0 : i32
    %c0_i32_0 = arith.constant 0 : i32
    %c0_i32_1 = arith.constant 0 : i32
    return %arg0, %c0_i32, %c0_i32_0 : i32, i32, i32
  }
  func.func @transform_4(%arg0: i32) -> (i32, i32, i32, i32) {
    %c0_i32 = arith.constant 0 : i32
    %c0_i32_0 = arith.constant 0 : i32
    %c0_i32_1 = arith.constant 0 : i32
    %c0_i32_2 = arith.constant 0 : i32
    return %arg0, %c0_i32, %c0_i32_0, %c0_i32_1 : i32, i32, i32, i32
  }
  func.func @transform_5(%arg0: i32) -> (i32, i32) {
    %c0_i32 = arith.constant 0 : i32
    %c0_i32_0 = arith.constant 0 : i32
    %c0_i32_1 = arith.constant 0 : i32
    return %c0_i32, %c0_i32_0 : i32, i32
  }
  func.func @transform_6(%arg0: i32) -> (i32, i32) {
    %c0_i32 = arith.constant 0 : i32
    %c0_i32_0 = arith.constant 0 : i32
    %c0_i32_1 = arith.constant 0 : i32
    return %c0_i32, %c0_i32_0 : i32, i32
  }
  func.func @transform_7(%arg0: i32) -> (i32, i32) {
    %c0_i32 = arith.constant 0 : i32
    %c0_i32_0 = arith.constant 0 : i32
    %c0_i32_1 = arith.constant 0 : i32
    return %c0_i32, %c0_i32_0 : i32, i32
  }
  func.func @transform_8(%arg0: i32) -> (i32, i32) {
    %c0_i32 = arith.constant 0 : i32
    %c0_i32_0 = arith.constant 0 : i32
    %c0_i32_1 = arith.constant 0 : i32
    return %c0_i32, %c0_i32_0 : i32, i32
  }
  func.func @transform_9(%arg0: i32) -> (i32, i32) {
    %c0_i32 = arith.constant 0 : i32
    %c0_i32_0 = arith.constant 0 : i32
    %c0_i32_1 = arith.constant 0 : i32
    return %c0_i32, %c0_i32_0 : i32, i32
  }
  func.func @transform_10(%arg0: i32) -> (i32, i32) {
    %c0_i32 = arith.constant 0 : i32
    %c0_i32_0 = arith.constant 0 : i32
    %c0_i32_1 = arith.constant 0 : i32
    return %c0_i32, %c0_i32_0 : i32, i32
  }
  func.func @transform_11(%arg0: i32) -> (i32, i32) {
    %c0_i32 = arith.constant 0 : i32
    %c0_i32_0 = arith.constant 0 : i32
    %c0_i32_1 = arith.constant 0 : i32
    return %c0_i32, %c0_i32_0 : i32, i32
  }
  func.func @transform_12(%arg0: i32) -> (i32, i32) {
    %c0_i32 = arith.constant 0 : i32
    %c0_i32_0 = arith.constant 0 : i32
    %c0_i32_1 = arith.constant 0 : i32
    return %c0_i32, %c0_i32_0 : i32, i32
  }
  func.func @transform_13(%arg0: i32) -> (i32, i32) {
    %c0_i32 = arith.constant 0 : i32
    %c0_i32_0 = arith.constant 0 : i32
    %c0_i32_1 = arith.constant 0 : i32
    return %c0_i32, %c0_i32_0 : i32, i32
  }
  func.func @transform_14(%arg0: i32) -> (i32, i32) {
    %c0_i32 = arith.constant 0 : i32
    %c0_i32_0 = arith.constant 0 : i32
    %c0_i32_1 = arith.constant 0 : i32
    return %c0_i32, %c0_i32_0 : i32, i32
  }
  func.func @transform_15(%arg0: i32) -> (i32, i32, i32) {
    %c0_i32 = arith.constant 0 : i32
    %c0_i32_0 = arith.constant 0 : i32
    %c0_i32_1 = arith.constant 0 : i32
    return %arg0, %c0_i32, %c0_i32_0 : i32, i32, i32
  }
}

module attributes {stable_mosaic.version = 11 : i64} {
  func.func @_linear_kernel(%arg0: i32, %arg1: i32, %arg2: i32, %arg3: memref<16x32xf32, #tpu.memory_space<vmem>>, %arg4: memref<32x64xbf16, #tpu.memory_space<vmem>>, %arg5: memref<1x64xf32, #tpu.memory_space<vmem>>, %arg6: memref<16x64xf32, #tpu.memory_space<vmem>>, %arg7: memref<16x64xf32, #tpu.memory_space<vmem>>) attributes {dimension_semantics = [#tpu.dimension_semantics<parallel>, #tpu.dimension_semantics<parallel>, #tpu.dimension_semantics<arbitrary>], iteration_bounds = array<i64: 1, 1, 1>, scalar_prefetch = 0 : i64, scratch_operands = 1 : i64, tpu.core_type = #tpu.core_type<tc>, window_params = [{transform_indices = @transform_0, window_bounds = array<i64: 16, 32>}, {transform_indices = @transform_1, window_bounds = array<i64: 32, 64>}, {transform_indices = @transform_2, window_bounds = array<i64: 1, 64>}, {transform_indices = @transform_3, window_bounds = array<i64: 16, 64>}]} {
    %c0_i32 = arith.constant 0 : i32
    %0 = arith.cmpi eq, %arg2, %c0_i32 : i32
    %1 = arith.extui %0 : i1 to i32
    %c0_i32_0 = arith.constant 0 : i32
    %2 = arith.cmpi ne, %1, %c0_i32_0 : i32
    scf.if %2 {
      %cst_10 = arith.constant 0.000000e+00 : f32
      %13 = vector.broadcast %cst_10 : f32 to vector<16x64xf32>
      %c0_11 = arith.constant 0 : index
      %c0_12 = arith.constant 0 : index
      %14 = vector.load %arg7[%c0_11, %c0_12] : memref<16x64xf32, #tpu.memory_space<vmem>>, vector<16x64xf32>
      tpu.vector_store %arg7[%c0_11, %c0_12], %13 {strides = array<i32>} : memref<16x64xf32, #tpu.memory_space<vmem>>, vector<16x64xf32>,
    } else {
    }
    %c0 = arith.constant 0 : index
    %c0_1 = arith.constant 0 : index
    %3 = vector.load %arg7[%c0, %c0_1] : memref<16x64xf32, #tpu.memory_space<vmem>>, vector<16x64xf32>
    %c0_2 = arith.constant 0 : index
    %c0_3 = arith.constant 0 : index
    %4 = vector.load %arg3[%c0_2, %c0_3] : memref<16x32xf32, #tpu.memory_space<vmem>>, vector<16x32xf32>
    %5 = arith.truncf %4 : vector<16x32xf32> to vector<16x32xbf16>
    %c0_4 = arith.constant 0 : index
    %c0_5 = arith.constant 0 : index
    %6 = vector.load %arg4[%c0_4, %c0_5] : memref<32x64xbf16, #tpu.memory_space<vmem>>, vector<32x64xbf16>
    %cst = arith.constant dense<0.000000e+00> : vector<16x64xf32>
    %7 = tpu.matmul %5, %6, %cst {dimension_numbers = #tpu.dot_dimension_numbers<[1], [0], [0], [1], [0, 0, 1, 1], [], []>} : vector<16x32xbf16>, vector<32x64xbf16>, vector<16x64xf32> -> vector<16x64xf32>
    %8 = arith.addf %3, %7 : vector<16x64xf32>
    %c0_6 = arith.constant 0 : index
    %c0_7 = arith.constant 0 : index
    %9 = vector.load %arg7[%c0_6, %c0_7] : memref<16x64xf32, #tpu.memory_space<vmem>>, vector<16x64xf32>
    tpu.vector_store %arg7[%c0_6, %c0_7], %8 {strides = array<i32>} : memref<16x64xf32, #tpu.memory_space<vmem>>, vector<16x64xf32>,
    %c0_i32_8 = arith.constant 0 : i32
    %10 = arith.cmpi eq, %arg2, %c0_i32_8 : i32
    %11 = arith.extui %10 : i1 to i32
    %c0_i32_9 = arith.constant 0 : i32
    %12 = arith.cmpi ne, %11, %c0_i32_9 : i32
    scf.if %12 {
      %c0_10 = arith.constant 0 : index
      %c0_11 = arith.constant 0 : index
      %13 = vector.load %arg7[%c0_10, %c0_11] : memref<16x64xf32, #tpu.memory_space<vmem>>, vector<16x64xf32>
      %c0_12 = arith.constant 0 : index
      %c0_13 = arith.constant 0 : index
      %14 = vector.load %arg5[%c0_12, %c0_13] : memref<1x64xf32, #tpu.memory_space<vmem>>, vector<1x64xf32>
      %15 = vector.broadcast %14 : vector<1x64xf32> to vector<16x64xf32>
      %16 = arith.addf %13, %15 : vector<16x64xf32>
      %c0_14 = arith.constant 0 : index
      %c0_15 = arith.constant 0 : index
      %17 = vector.load %arg6[%c0_14, %c0_15] : memref<16x64xf32, #tpu.memory_space<vmem>>, vector<16x64xf32>
      tpu.vector_store %arg6[%c0_14, %c0_15], %16 {strides = array<i32>} : memref<16x64xf32, #tpu.memory_space<vmem>>, vector<16x64xf32>,
    } else {
    }
    return
  }
  func.func @transform_0(%arg0: i32, %arg1: i32, %arg2: i32) -> (i32, i32) {
    %c0_i32 = arith.constant 0 : i32
    return %arg0, %arg2 : i32, i32
  }
  func.func @transform_1(%arg0: i32, %arg1: i32, %arg2: i32) -> (i32, i32) {
    %c0_i32 = arith.constant 0 : i32
    return %arg2, %arg1 : i32, i32
  }
  func.func @transform_2(%arg0: i32, %arg1: i32, %arg2: i32) -> (i32, i32) {
    %c0_i32 = arith.constant 0 : i32
    %c0_i32_0 = arith.constant 0 : i32
    return %c0_i32, %arg1 : i32, i32
  }
  func.func @transform_3(%arg0: i32, %arg1: i32, %arg2: i32) -> (i32, i32) {
    %c0_i32 = arith.constant 0 : i32
    return %arg0, %arg1 : i32, i32
  }
}

</mosaic_0001>

<bundles_post_ra>
// kernel: transformer_forward.12
= control target key start
LH: loop header
LB: loop body
LE: loop exit
PB: predicated region body
PF: predicated region fallthrough
CT: control target
= control target key end

     0   :  { %s631_s24 = smov 0   ;;  %s689_s0 = inlined_call_operand.vmem [shape: f32[2,8,32], index: 0, kind: input, shape index: {}]   ;;  %s690_s1 = inlined_call_operand.vmem [shape: bf16[32,64], index: 1, kind: input, shape index: {}]   ;;  %s691_s2 = inlined_call_operand.vmem [shape: f32[1,64], index: 2, kind: input, shape index: {}]   ;;  %s692_s3 = inlined_call_operand.vmem [shape: bf16[64,32], index: 3, kind: input, shape index: {}]   ;;  %s693_s4 = inlined_call_operand.vmem [shape: f32[1,32], index: 4, kind: input, shape index: {}]   ;;  %s694_s5 = inlined_call_operand.vmem [shape: f32[1,32], index: 5, kind: input, shape index: {}]   ;;  %s695_s6 = inlined_call_operand.vmem [shape: f32[1,32], index: 6, kind: input, shape index: {}]   ;;  %s696_s7 = inlined_call_operand.vmem [shape: f32[2,8,32], index: 7, kind: output, shape index: {}]  }
   0x1 LB: > { %s514_s25 = sadd.s32 4294967295, %s587_s24   ;;  %p518_p0 = scmp.ge.s32.totalorder %s587_s24, 1  ;;  %s587_s24 = sphi %s631_s24, %s17_s24  }
   0x2   : > { %p236_p1 = scmp.lt.s32.totalorder %s587_s24, 3 }
   0x4   : > { %p237_p2 = pnand %p518_p0, %p236_p1 }
   0x5   : > { %v573_v0 = vld [vmem:[%s690_s1] sm:$0xff] (!%p237_p2)   ;;  %v589_v1 = vmov (!%p237_p2), 0.0   ;;  %v574_v2 = vld [vmem:[%s690_s1 + $0x8] sm:$0xff] (!%p237_p2)   ;;  %vm590_vm0 = vmmov (!%p237_p2), 0   ;;  %p266_p3 = scmp.lt.s32.totalorder (!%p237_p2), %s514_s25, 1  ;;  %vm300_vm1 = vcmask (!%p237_p2), 261120  }
   0x6   : > { %240 = sbr.rel (%p237_p2) target bundleno = 767 (0x2ff), region = 48  ;;  %543 = vmatprep.subr.bf16.mxu0 (!%p237_p2), %v589_v1  ;;  %551 = vmatprep.subr.bf16.mxu1 (!%p237_p2), %v589_v1  ;;  %v575_v3 = vld [vmem:[%s692_s3] sm:$0xff] (!%p237_p2)   ;;  %v576_v4 = vld [vmem:[%s692_s3 + $0x8] sm:$0xff] (!%p237_p2)   ;;  %v577_v7 = vld [vmem:[%s692_s3 + $0x10] sm:$0xff] (!%p237_p2)   ;;  %vm385_vm2 = vcmask (!%p237_p2), 523264  }
   0x7   : > { %544 = vmatpush3.bf16.msra.mxu0 (!%p237_p2), %v573_v0  ;;  %547 = vmatprep.mubr.msk.bf16.mxu0 (!%p237_p2), %vm590_vm0, %v589_v1  ;;  %v578_v8 = vld [vmem:[%s692_s3 + $0x18] sm:$0xff] (!%p237_p2)   ;;  %v521_v9 = vld [vmem:[%s691_s2] ss:$0 sm:$0xff] (!%p237_p2) }
   0x8   : > { %545 = vmatprep.subr.bf16.mxu0 (!%p237_p2), %v589_v1  ;;  %559 = vmatprep.mubr.msk.bf16.mxu1 (!%p237_p2), %vm590_vm0, %v589_v1  ;;  %v525_v17 = vld [vmem:[%s693_s4] ss:$0 sm:$0xff] (!%p237_p2) }
   0x9   : > { %552 = vmatpush3.bf16.msra.mxu1 (!%p237_p2), %v575_v3  ;;  %v531_v34 = vld [vmem:[%s694_s5] ss:$0 sm:$0xff] (!%p237_p2) }
   0xa   : > { %553 = vmatprep.subr.bf16.mxu1 (!%p237_p2), %v589_v1  ;;  %v532_v36 = vld [vmem:[%s695_s6] ss:$0 sm:$0xff] (!%p237_p2) }
   0xb   : > { %546 = vmatpush3.bf16.msra.mxu0 (!%p237_p2), %v574_v2 }
   0xd   : > { %s698_s25 = smov (!%p266_p3, %s514_s25), 1  ;;  %554 = vmatpush3.bf16.msra.mxu1 %v576_v4 }
   0xe   : > { %s519_s11 = sshll.u32 %s698_s25, 3  ;;  %555 = vmatprep.subr.bf16.mxu1 %v589_v1 }
   0xf   : > { %s269_s14 = scalar_lea.vmem %s689_s0, %s519_s11  ;;  %s273_s8 = scalar_lea.vmem %s696_s7, %s519_s11 }
  0x10   : > { %v275_v5 = vld [vmem:[%s269_s14] sm:$0xff] }
  0x11   : > { %v276_v6 = vpack.c.bf16 %v275_v5, %v275_v5  ;;  %556 = vmatpush3.bf16.msra.mxu1 %v577_v7 }
  0x12   : > { %557 = vmatprep.subr.bf16.mxu1 %v589_v1 }
  0x13   : > { %548 = vmatmul.mubr.msk.bf16.vlgmr.msra.gmra.mrb[0].mxu0 %vm300_vm1, %v276_v6 }
  0x15   : > { %558 = vmatpush3.bf16.msra.mxu1 %v578_v8 }
  0xe6   : > { %v338_v10 = vpop.f32.mrb[0].mxu0 }
  0xe7   : > { %v339_v11 = vadd.f32 %v521_v9, %v338_v10  ;;  %v549_v12 = vpop.f32.mrb[1].mxu0 }
  0xe8   : > { %v341_v13 = vpop.f32.mrb[2].mxu0 }
  0xe9   : > { %v344_v14 = vmax.f32 %v339_v11, 0.0  ;;  %v550_v15 = vpop.f32.mrb[3].mxu0 }
  0xeb   : > { %v345_v16 = vpack.c.bf16 %v344_v14, %v344_v14 }
  0xed   : > { %560 = vmatmul.mubr.msk.bf16.vlgmr.msra.gmra.mrb[0].mxu1 %vm385_vm2, %v345_v16 }
 0x1c0   : > { %v423_v18 = vpop.f32.mrb[0].mxu1 }
 0x1c1   : > { %v424_v19 = vadd.f32 %v525_v17, %v423_v18  ;;  %v561_v20 = vpop.f32.mrb[1].mxu1 }
 0x1c2   : > { %v426_v21 = vpop.f32.mrb[2].mxu1 }
 0x1c3   : > { %v562_v22 = vpop.f32.mrb[3].mxu1  ;;  %v429_v23 = vadd.f32 %v424_v19, %v275_v5 }
 0x1c5   : > { %v430_v24 = vsel %vm300_vm1, %v429_v23, 0.0 }
 0x1c6   : > { %431 = vadd.xlane.f32.xlu0 %v430_v24 }
 0x253   : > { %v432_v25 = vpop.xlane.xlu0 %431 }
 0x254   : > { %v434_v26 = vmul.f32 0.03125, %v432_v25 }
 0x256   : > { %v435_v27 = vsub.f32 %v429_v23, %v434_v26 }
 0x258   : > { %v436_v28 = vmul.f32 %v435_v27, %v435_v27 }
 0x25a   : > { %v437_v29 = vsel %vm300_vm1, %v436_v28, 0.0 }
 0x25b   : > { %438 = vadd.xlane.f32.xlu0 %v437_v29 }
 0x2e8   : > { %v439_v30 = vpop.xlane.xlu0 %438 }
 0x2e9   : > { %v440_v31 = vmul.f32 0.03125, %v439_v30 }
 0x2eb   : > { %v441_v32 = vadd.f32 1e-05, %v440_v31 }
 0x2ed   : > { %579 = vrsqrt.f32 %v441_v32 }
 0x2f7   : > { %v580_v33 = vpop.eup %579 }
 0x2f8   : > { %v443_v35 = vmul.f32 %v580_v33, %v435_v27 }
 0x2fa   : > { %v451_v37 = vmul.f32 %v531_v34, %v443_v35 }
 0x2fc   : > { %v459_v38 = vadd.f32 %v532_v36, %v451_v37 }
 0x2fe   : > { %460 = vst.msk [vmem:[%s273_s8] sm:$0xff] %vm300_vm1, %v459_v38 }
 0x2ff PF: > { %s17_s24 = sadd.s32 1, %s587_s24  }
 0x300   : > { %p14_p4 = scmp.ge.s32.totalorder %s17_s24, 4  }
 0x302   :  { %16 = sbr.rel (!%p14_p4) target bundleno = 1 (0x1), region = 78 }

// kernel: transformer_forward.11
= control target key start
LH: loop header
LB: loop body
LE: loop exit
PB: predicated region body
PF: predicated region fallthrough
CT: control target
= control target key end

     0   :  { %s1854_s18 = smov 0   ;;  %s2061_s0 = inlined_call_operand.vmem [shape: f32[2,8,32], index: 0, kind: input, shape index: {}, may-alias: {0,1}]   ;;  %s2062_s1 = inlined_call_operand.vmem [shape: f32[2,8,32], index: 1, kind: input, shape index: {}, may-alias: {0,1}]   ;;  %s2063_s2 = inlined_call_operand.vmem [shape: f32[2,8,32], index: 2, kind: input, shape index: {}, may-alias: {2,3}]   ;;  %s2064_s3 = inlined_call_operand.vmem [shape: f32[2,8,32], index: 3, kind: input, shape index: {}, may-alias: {2,3}]   ;;  %s2065_s4 = inlined_call_operand.vmem [shape: f32[2,1,1,8], index: 4, kind: input, shape index: {}]   ;;  %s2066_s5 = inlined_call_operand.vmem [shape: bf16[32,32], index: 5, kind: input, shape index: {}]   ;;  %s2067_s6 = inlined_call_operand.vmem [shape: f32[1,32], index: 6, kind: input, shape index: {}]   ;;  %s2068_s7 = inlined_call_operand.vmem [shape: bf16[32,32], index: 7, kind: input, shape index: {}]   ;;  %s2069_s8 = inlined_call_operand.vmem [shape: f32[1,32], index: 8, kind: input, shape index: {}]   ;;  %s2070_s9 = inlined_call_operand.vmem [shape: bf16[32,32], index: 9, kind: input, shape index: {}]   ;;  %s2071_s10 = inlined_call_operand.vmem [shape: f32[1,32], index: 10, kind: input, shape index: {}]   ;;  %s2072_s11 = inlined_call_operand.vmem [shape: bf16[32,32], index: 11, kind: input, shape index: {}]   ;;  %s2073_s12 = inlined_call_operand.vmem [shape: f32[1,32], index: 12, kind: input, shape index: {}]   ;;  %s2074_s13 = inlined_call_operand.vmem [shape: f32[1,32], index: 13, kind: input, shape index: {}]   ;;  %s2075_s14 = inlined_call_operand.vmem [shape: f32[1,32], index: 14, kind: input, shape index: {}]   ;;  %s2076_s15 = inlined_call_operand.vmem [shape: f32[2,8,32], index: 15, kind: output, shape index: {}]  }
   0x1 LB: > { %s1555_s19 = sadd.s32 4294967295, %s1767_s18   ;;  %p1559_p0 = scmp.ge.s32.totalorder %s1767_s18, 1  ;;  %s1767_s18 = sphi %s1854_s18, %s25_s18  }
   0x2   : > { %p471_p1 = scmp.lt.s32.totalorder %s1767_s18, 3 }
   0x4   : > { %p472_p2 = pnand %p1559_p0, %p471_p1 }
   0x5   : > { %v1737_v0 = vld [vmem:[%s2068_s7] sm:$0xff] (!%p472_p2)   ;;  %v1769_v1 = vmov (!%p472_p2), 0.0   ;;  %v1738_v2 = vld [vmem:[%s2068_s7 + $0x8] sm:$0xff] (!%p472_p2)   ;;  %vm1770_vm0 = vmmov (!%p472_p2), 0   ;;  %p532_p3 = scmp.lt.s32.totalorder (!%p472_p2), %s1555_s19, 1  ;;  %vm585_vm1 = vcmask (!%p472_p2), 261120  }
   0x6   : > { %475 = sbr.rel (%p472_p2) target bundleno = 2936 (0xb78), region = 80  ;;  %1636 = vmatprep.subr.bf16.mxu1 (!%p472_p2), %v1769_v1  ;;  %1628 = vmatprep.subr.bf16.mxu0 (!%p472_p2), %v1769_v1  ;;  %v1739_v3 = vld [vmem:[%s2066_s5] sm:$0xff] (!%p472_p2)   ;;  %v1740_v4 = vld [vmem:[%s2066_s5 + $0x8] sm:$0xff] (!%p472_p2)   ;;  %vm766_vm2 = vcmask (!%p472_p2), 64512   ;;  %s1771_s26 = smov (!%p472_p2), 120   ;;  %vm837_vm3 = vcmask (!%p472_p2), 1043456  }
   0x7   : > { %1637 = vmatpush3.bf16.msra.mxu1 (!%p472_p2), %v1737_v0  ;;  %1640 = vmatprep.mubr.msk.bf16.mxu1 (!%p472_p2), %vm1770_vm0, %v1769_v1  ;;  %v1569_v9 = vld [vmem:[%s2069_s8] ss:$0 sm:$0xff] (!%p472_p2)  ;;  %v1742_v25 = vld [vmem:[%s2070_s9 + $0x8] sm:$0xff] (!%p472_p2)   ;;  %s1772_s27 = smov (!%p472_p2), 112  }
   0x8   : > { %1638 = vmatprep.subr.bf16.mxu1 (!%p472_p2), %v1769_v1  ;;  %1632 = vmatprep.mubr.msk.bf16.mxu0 (!%p472_p2), %vm1770_vm0, %v1769_v1  ;;  %v1565_v10 = vld [vmem:[%s2067_s6] ss:$0 sm:$0xff] (!%p472_p2) }
   0x9   : > { %1629 = vmatpush3.bf16.msra.mxu0 (!%p472_p2), %v1739_v3  ;;  %v1741_v24 = vld [vmem:[%s2070_s9] sm:$0xff] (!%p472_p2)  }
   0xa   : > { %1630 = vmatprep.subr.bf16.mxu0 (!%p472_p2), %v1769_v1  ;;  %v1573_v57 = vld [vmem:[%s2071_s10] ss:$0 sm:$0xff] (!%p472_p2) }
   0xb   : > { %1639 = vmatpush3.bf16.msra.mxu1 (!%p472_p2), %v1738_v2 }
   0xc   : > { %1652 = vmatprep.subr.bf16.mxu1 (!%p472_p2), %v1769_v1 }
   0xd   : > { %s2078_s19 = smov (!%p532_p3, %s1555_s19), 1  ;;  %1631 = vmatpush3.bf16.msra.mxu0 %v1740_v4 }
   0xe   : > { %s1885_s28 = sshll.u32 %s2078_s19, 3  ;;  %1644 = vmatprep.subr.bf16.mxu0 %v1769_v1  ;;  %s550_s24 = scalar_lea.vmem %s2065_s4, %s2078_s19 }
   0xf   : > { %s539_s16 = scalar_lea.vmem %s2062_s1, %s1885_s28  ;;  %s535_s21 = scalar_lea.vmem %s2061_s0, %s1885_s28  ;;  %v1948_v32 = vld [vmem:[%s550_s24] ss:$0 sm:$0xff] }
  0x10   : > { %v557_v5 = vld [vmem:[%s539_s16] sm:$0xff]  ;;  %s543_s17 = scalar_lea.vmem %s2063_s2, %s1885_s28  ;;  %s547_s25 = scalar_lea.vmem %s2064_s3, %s1885_s28 }
  0x11   : > { %v629_v6 = vpack.c.bf16 %v557_v5, %v557_v5  ;;  %v556_v7 = vld [vmem:[%s535_s21] sm:$0xff]  ;;  %s554_s22 = scalar_lea.vmem %s2076_s15, %s1885_s28 }
  0x12   : > { %v561_v8 = vpack.c.bf16 %v556_v7, %v556_v7  ;;  %v558_v26 = vld [vmem:[%s543_s17] sm:$0xff]  ;;  %s1773_s17 = smov 104  }
  0x13   : > { %1641 = vmatmul.mubr.msk.bf16.vlgmr.msra.gmra.mrb[0].mxu1 %vm585_vm1, %v629_v6  ;;  %v696_v27 = vpack.c.bf16 %v558_v26, %v558_v26  ;;  %v1000_v7 = vld [vmem:[%s2072_s11 + $0x4] sm:$0xf] }
  0x14   : > { %1633 = vmatmul.mubr.msk.bf16.vlgmr.msra.gmra.mrb[0].mxu0 %vm585_vm1, %v561_v8  ;;  %1654 = vmatprep.mubr.msk.bf16.mxu1 %vm1770_vm0, %v1769_v1  ;;  %v1005_v8 = vsel %vm837_vm3, %v1000_v7, 0 }
  0x15   : > { %1648 = vmatprep.mubr.msk.bf16.mxu0 %vm1770_vm0, %v1769_v1  ;;  %1645 = vmatpush3.bf16.msra.mxu0 %v1741_v24 }
  0x16   : > { %1646 = vmatprep.subr.bf16.mxu0 %v1769_v1 }
  0x19   : > { %1647 = vmatpush3.bf16.msra.mxu0 %v1742_v25 }
  0x1a   : > { %1658 = vmatprep.subr.bf16.mxu0 %v1769_v1 }
  0x1c   : > { %1649 = vmatmul.mubr.msk.bf16.vlgmr.msra.gmra.mrb[4].mxu0 %vm585_vm1, %v696_v27 }
  0x1d   : > { %1660 = vmatprep.mubr.msk.bf16.mxu0 %vm1770_vm0, %v1769_v1 }
  0xe6   : > { %v690_v11 = vpop.f32.mrb[0].mxu1 }
  0xe7   : > { %v691_v12 = vadd.f32 %v1569_v9, %v690_v11  ;;  %v1642_v13 = vpop.f32.mrb[1].mxu1  ;;  %v623_v14 = vpop.f32.mrb[0].mxu0 }
  0xe8   : > { %v693_v15 = vpop.f32.mrb[2].mxu1  ;;  %v624_v16 = vadd.f32 %v1565_v10, %v623_v14  ;;  %v1634_v17 = vpop.f32.mrb[1].mxu0  ;;  %v882_v13 = vld [vmem:[%s2072_s11] sm:$0xf] }
  0xe9   : > { %v1909_v18 = vpack.c.bf16 %v691_v12, %v691_v12  ;;  %v1643_v19 = vpop.f32.mrb[3].mxu1  ;;  %v626_v20 = vpop.f32.mrb[2].mxu0 }
  0xea   : > { %v1635_v21 = vpop.f32.mrb[3].mxu0  ;;  %v1913_v22 = vpack.c.bf16 %v624_v16, %v624_v16  ;;  %v1051_v16 = vsel %vm837_vm3, %v882_v13, 0 }
  0xeb   : > { %887 = vrot.lane.b32.xlu0 %v1909_v18, %s1771_s26  ;;  %v771_v23 = vsel %vm766_vm2, %v1909_v18, 0 }
  0xec   : > { %1653 = vmatpush3.bf16.xpose.msra.mxu1 %v771_v23 }
  0xed   : > { %1664 = vmatprep.subr.bf16.mxu1 %v1769_v1 }
  0xef   : > { %884 = vrot.lane.b32.xlu0 %v1913_v22, %s1771_s26  ;;  %v757_v51 = vpop.f32.mrb[4].mxu0 }
  0xf0   : > { %v1650_v52 = vpop.f32.mrb[5].mxu0  ;;  %v758_v58 = vadd.f32 %v1573_v57, %v757_v51 }
  0xf1   : > { %v760_v53 = vpop.f32.mrb[6].mxu0 }
  0xf2   : > { %v1651_v54 = vpop.f32.mrb[7].mxu0  ;;  %v1958_v59 = vpack.c.bf16 %v758_v58, %v758_v58 }
  0xf3   : > { %1655 = vmatmul.mubr.msk.bf16.vlgmr.msra.gmra.mrb[4].mxu1 %vm766_vm2, %v1913_v22 }
  0xf4   : > { %1666 = vmatprep.mubr.msk.bf16.mxu1 %vm1770_vm0, %v1769_v1  ;;  %v839_v60 = vsel %vm837_vm3, %v1958_v59, 0 }
  0xf5   : > { %1659 = vmatpush3.bf16.msra.mxu0 %v839_v60 }
  0xf6   : > { %1670 = vmatprep.subr.bf16.mxu0 %v1769_v1 }
 0x15d   : > { %v888_v28 = vpop.permute.xlu0 %887 }
 0x15e   : > { %v893_v29 = vsel %vm766_vm2, %v888_v28, 0 }
 0x15f   : > { %1665 = vmatpush3.bf16.xpose.msra.mxu1 %v893_v29 }
 0x160   : > { %1676 = vmatprep.subr.bf16.mxu1 %v1769_v1 }
 0x161   : > { %v885_v30 = vpop.permute.xlu0 %884 }
 0x166   : > { %1667 = vmatmul.mubr.msk.bf16.vlgmr.msra.gmra.mrb[8].mxu1 %vm766_vm2, %v885_v30 }
 0x167   : > { %1678 = vmatprep.mubr.msk.bf16.mxu1 %vm1770_vm0, %v1769_v1  ;;  %1677 = vmatpush3.bf16.msra.mxu1 %v1005_v8 }
 0x168   : > { %1688 = vmatprep.subr.bf16.mxu1 %v1769_v1 }
 0x1c6   : > { %v807_v31 = vpop.f32.mrb[4].mxu1 }
 0x1c7   : > { %v813_v33 = vmul.f32 0.35355338, %v807_v31  ;;  %v1656_v34 = vpop.f32.mrb[5].mxu1 }
 0x1c8   : > { %v810_v35 = vpop.f32.mrb[6].mxu1 }
 0x1c9   : > { %v1657_v36 = vpop.f32.mrb[7].mxu1  ;;  %v820_v37 = vadd.f32 %v1948_v32, %v813_v33 }
 0x1cb   : > { %v821_v38 = vmax.f32 %v820_v37, -1e+30 }
 0x1cd   : > { %v822_v39 = vsel %vm766_vm2, %v821_v38, -inf }
 0x1ce   : > { %823 = vmax.xlane.f32.xlu1 %v822_v39 }
 0x239   : > { %v929_v40 = vpop.f32.mrb[8].mxu1 }
 0x23a   : > { %v935_v41 = vmul.f32 0.35355338, %v929_v40  ;;  %v1668_v42 = vpop.f32.mrb[9].mxu1 }
 0x23b   : > { %v932_v43 = vpop.f32.mrb[10].mxu1 }
 0x23c   : > { %v936_v44 = vadd.f32 %v1948_v32, %v935_v41  ;;  %v1669_v45 = vpop.f32.mrb[11].mxu1 }
 0x23e   : > { %v937_v46 = vmax.f32 %v936_v44, -1e+30 }
 0x240   : > { %v938_v47 = vsel %vm766_vm2, %v937_v46, -inf }
 0x241   : > { %939 = vmax.xlane.f32.xlu1 %v938_v47 }
 0x25b   : > { %v824_v48 = vpop.xlane.xlu1 %823 }
 0x25c   : > { %v825_v49 = vsub.f32 %v821_v38, %v824_v48 }
 0x25e   : > { %v826_v50 = vmul.f32 1.442695, %v825_v49 }
 0x260   : > { %1743 = vpow2.f32 %v826_v50 }
 0x26a   : > { %v1744_v55 = vpop.eup %1743 }
 0x26b   : > { %v828_v56 = vsel %vm766_vm2, %v1744_v55, 0.0 }
 0x26c   : > { %829 = vadd.xlane.f32.xlu0 %v828_v56 }
 0x282   : > { %1158 = vrot.lane.b32.xlu0 %v1958_v59, %s1772_s27 }
 0x2ce   : > { %v940_v61 = vpop.xlane.xlu1 %939 }
 0x2cf   : > { %v941_v62 = vsub.f32 %v937_v46, %v940_v61 }
 0x2d1   : > { %v942_v63 = vmul.f32 1.442695, %v941_v62 }
 0x2d3   : > { %1745 = vpow2.f32 %v942_v63 }
 0x2dd   : > { %v1746_v0 = vpop.eup %1745 }
 0x2de   : > { %v944_v2 = vsel %vm766_vm2, %v1746_v0, 0.0 }
 0x2df   : > { %945 = vadd.xlane.f32.xlu1 %v944_v2 }
 0x2f0   : > { %951 = vrot.lane.b32.xlu1 %v1958_v59, %s1771_s26 }
 0x2f4   : > { %1095 = vrot.lane.b32.xlu1 %v1909_v18, %s1772_s27 }
 0x2f8   : > { %1093 = vrot.lane.b32.xlu1 %v1913_v22, %s1772_s27 }
 0x2f9   : > { %v830_v3 = vpop.xlane.xlu0 %829 }
 0x2fa   : > { %1747 = vrcp.f32 %v830_v3 }
 0x2fd   : > { %v1159_v17 = vpop.permute.xlu0 %1158 }
 0x2fe   : > { %v1164_v24 = vsel %vm837_vm3, %v1159_v17, 0 }
 0x304   : > { %v1748_v4 = vpop.eup %1747 }
 0x305   : > { %v832_v5 = vmul.f32 %v1748_v4, %v1744_v55 }
 0x307   : > { %v833_v6 = vpack.c.bf16 %v832_v5, %v832_v5 }
 0x309   : > { %1661 = vmatmul.mubr.msk.bf16.vlgmr.msra.gmra.mrb[8].mxu0 %vm766_vm2, %v833_v6 }
 0x30a   : > { %1672 = vmatprep.mubr.msk.bf16.mxu0 %vm1770_vm0, %v1769_v1 }
 0x36c   : > { %v946_v9 = vpop.xlane.xlu1 %945 }
 0x36d   : > { %1749 = vrcp.f32 %v946_v9 }
 0x370   : > { %v952_v10 = vpop.permute.xlu1 %951 }
 0x371   : > { %v957_v11 = vsel %vm837_vm3, %v952_v10, 0 }
 0x372   : > { %1671 = vmatpush3.bf16.msra.mxu0 %v957_v11 }
 0x373   : > { %1682 = vmatprep.subr.bf16.mxu0 %v1769_v1 }
 0x374   : > { %v1096_v26 = vpop.permute.xlu1 %1095 }
 0x375   : > { %v1101_v31 = vsel %vm766_vm2, %v1096_v26, 0 }
 0x377   : > { %v1750_v12 = vpop.eup %1749 }
 0x378   : > { %v948_v14 = vmul.f32 %v1750_v12, %v1746_v0  ;;  %v1094_v34 = vpop.permute.xlu1 %1093 }
 0x37a   : > { %v949_v15 = vpack.c.bf16 %v948_v14, %v948_v14 }
 0x37c   : > { %1673 = vmatmul.mubr.msk.bf16.vlgmr.msra.gmra.mrb[12].mxu0 %vm766_vm2, %v949_v15 }
 0x37d   : > { %1683 = vmatpush3.bf16.msra.mxu0 %v1051_v16  ;;  %1684 = vmatprep.mubr.msk.bf16.mxu0 %vm1770_vm0, %v1769_v1 }
 0x37e   : > { %1694 = vmatprep.subr.bf16.mxu0 %v1769_v1 }
 0x3dc   : > { %v875_v19 = vpop.f32.mrb[8].mxu0 }
 0x3dd   : > { %v881_v20 = vpack.c.bf16 %v875_v19, %v875_v19  ;;  %v1662_v21 = vpop.f32.mrb[9].mxu0 }
 0x3de   : > { %v878_v23 = vpop.f32.mrb[10].mxu0 }
 0x3df   : > { %v1663_v25 = vpop.f32.mrb[11].mxu0  ;;  %1685 = vmatmul.mubr.msk.bf16.vlgmr.msra.gmra.mrb[16].mxu0 %vm766_vm2, %v881_v20 }
 0x3e0   : > { %1695 = vmatpush3.bf16.msra.mxu0 %v1164_v24  ;;  %1696 = vmatprep.mubr.msk.bf16.mxu0 %vm1770_vm0, %v1769_v1 }
 0x3e1   : > { %1706 = vmatprep.subr.bf16.mxu0 %v1769_v1 }
 0x44f   : > { %v993_v27 = vpop.f32.mrb[12].mxu0 }
 0x450   : > { %v999_v28 = vpack.c.bf16 %v993_v27, %v993_v27  ;;  %v1674_v29 = vpop.f32.mrb[13].mxu0 }
 0x451   : > { %v996_v30 = vpop.f32.mrb[14].mxu0 }
 0x452   : > { %v1675_v33 = vpop.f32.mrb[15].mxu0  ;;  %1679 = vmatmul.mubr.msk.bf16.vlgmr.msra.gmra.mrb[12].mxu1 %vm766_vm2, %v999_v28 }
 0x453   : > { %1689 = vmatpush3.bf16.xpose.msra.mxu1 %v1101_v31  ;;  %1690 = vmatprep.mubr.msk.bf16.mxu1 %vm1770_vm0, %v1769_v1 }
 0x454   : > { %1700 = vmatprep.subr.bf16.mxu1 %v1769_v1 }
 0x45a   : > { %1691 = vmatmul.mubr.msk.bf16.vlgmr.msra.gmra.mrb[16].mxu1 %vm766_vm2, %v1094_v34 }
 0x45b   : > { %1702 = vmatprep.mubr.msk.bf16.mxu1 %vm1770_vm0, %v1769_v1 }
 0x4b2   : > { %v1087_v35 = vpop.f32.mrb[16].mxu0 }
 0x4b3   : > { %v1686_v36 = vpop.f32.mrb[17].mxu0 }
 0x4b4   : > { %v1090_v37 = vpop.f32.mrb[18].mxu0 }
 0x4b5   : > { %v1687_v38 = vpop.f32.mrb[19].mxu0 }
 0x525   : > { %v1041_v39 = vpop.f32.mrb[12].mxu1 }
 0x526   : > { %v2000_v40 = vadd.f32 %v1087_v35, %v1041_v39  ;;  %v1680_v41 = vpop.f32.mrb[13].mxu1  ;;  %v1590_v39 = vld [vmem:[%s2073_s12] ss:$0 sm:$0xff] }
 0x527   : > { %v1044_v42 = vpop.f32.mrb[14].mxu1 }
 0x528   : > { %v1681_v43 = vpop.f32.mrb[15].mxu1 }
 0x529   : > { %v559_v43 = vld [vmem:[%s547_s25] sm:$0xff] }
 0x52d   : > { %v1137_v44 = vpop.f32.mrb[16].mxu1 }
 0x52e   : > { %v1143_v45 = vmul.f32 0.35355338, %v1137_v44  ;;  %v1692_v46 = vpop.f32.mrb[17].mxu1 }
 0x52f   : > { %v1140_v47 = vpop.f32.mrb[18].mxu1 }
 0x530   : > { %v1144_v48 = vadd.f32 %v1948_v32, %v1143_v45  ;;  %v1693_v49 = vpop.f32.mrb[19].mxu1 }
 0x532   : > { %v1145_v50 = vmax.f32 %v1144_v48, -1e+30 }
 0x534   : > { %v1146_v51 = vsel %vm766_vm2, %v1145_v50, -inf }
 0x535   : > { %1147 = vmax.xlane.f32.xlu1 %v1146_v51 }
 0x5c2   : > { %v1148_v52 = vpop.xlane.xlu1 %1147 }
 0x5c3   : > { %v1149_v53 = vsub.f32 %v1145_v50, %v1148_v52 }
 0x5c5   : > { %v1150_v54 = vmul.f32 1.442695, %v1149_v53 }
 0x5c7   : > { %1751 = vpow2.f32 %v1150_v54 }
 0x5d1   : > { %v1752_v55 = vpop.eup %1751 }
 0x5d2   : > { %v1152_v56 = vsel %vm766_vm2, %v1752_v55, 0.0 }
 0x5d3   : > { %1153 = vadd.xlane.f32.xlu0 %v1152_v56 }
 0x5e9   : > { %1257 = vrot.lane.b32.xlu0 %v1909_v18, %s1773_s17 }
 0x5ed   : > { %1255 = vrot.lane.b32.xlu0 %v1913_v22, %s1773_s17  ;;  %v1207_v22 = vld [vmem:[%s2072_s11 + $0x8] sm:$0xf] }
 0x5ee   : > { %v1212_v0 = vsel %vm837_vm3, %v1207_v22, 0 }
 0x5ef   : > { %1701 = vmatpush3.bf16.msra.mxu1 %v1212_v0 }
 0x5f0   : > { %1712 = vmatprep.subr.bf16.mxu1 %v1769_v1 }
 0x660   : > { %v1154_v57 = vpop.xlane.xlu0 %1153 }
 0x661   : > { %1753 = vrcp.f32 %v1154_v57  ;;  %v1591_v57 = vld [vmem:[%s2074_s13] ss:$0 sm:$0xff] }
 0x664   : > { %v1258_v61 = vpop.permute.xlu0 %1257 }
 0x665   : > { %v1263_v63 = vsel %vm766_vm2, %v1258_v61, 0 }
 0x668   : > { %v1256_v18 = vpop.permute.xlu0 %1255 }
 0x66b   : > { %v1754_v58 = vpop.eup %1753 }
 0x66c   : > { %v1156_v60 = vmul.f32 %v1754_v58, %v1752_v55 }
 0x66e   : > { %v1157_v62 = vpack.c.bf16 %v1156_v60, %v1156_v60  ;;  %v1592_v60 = vld [vmem:[%s2075_s14] ss:$0 sm:$0xff] }
 0x670   : > { %1697 = vmatmul.mubr.msk.bf16.vlgmr.msra.gmra.mrb[20].mxu0 %vm766_vm2, %v1157_v62 }
 0x671   : > { %1707 = vmatpush3.bf16.xpose.msra.mxu0 %v1263_v63  ;;  %1708 = vmatprep.mubr.msk.bf16.mxu0 %vm1770_vm0, %v1769_v1 }
 0x672   : > { %1718 = vmatprep.subr.bf16.mxu0 %v1769_v1 }
 0x678   : > { %1709 = vmatmul.mubr.msk.bf16.vlgmr.msra.gmra.mrb[24].mxu0 %vm766_vm2, %v1256_v18 }
 0x679   : > { %1720 = vmatprep.mubr.msk.bf16.mxu0 %vm1770_vm0, %v1769_v1 }
 0x743   : > { %v1200_v2 = vpop.f32.mrb[20].mxu0 }
 0x744   : > { %v1206_v3 = vpack.c.bf16 %v1200_v2, %v1200_v2  ;;  %v1698_v4 = vpop.f32.mrb[21].mxu0 }
 0x745   : > { %v1203_v5 = vpop.f32.mrb[22].mxu0 }
 0x746   : > { %v1699_v6 = vpop.f32.mrb[23].mxu0  ;;  %1703 = vmatmul.mubr.msk.bf16.vlgmr.msra.gmra.mrb[20].mxu1 %vm766_vm2, %v1206_v3 }
 0x747   : > { %1714 = vmatprep.mubr.msk.bf16.mxu1 %vm1770_vm0, %v1769_v1  ;;  %v1369_v1 = vld [vmem:[%s2072_s11 + $0xc] sm:$0xf] }
 0x74b   : > { %v1299_v7 = vpop.f32.mrb[24].mxu0 }
 0x74c   : > { %v1305_v8 = vmul.f32 0.35355338, %v1299_v7  ;;  %v1710_v9 = vpop.f32.mrb[25].mxu0 }
 0x74d   : > { %v1302_v10 = vpop.f32.mrb[26].mxu0 }
 0x74e   : > { %v1306_v11 = vadd.f32 %v1948_v32, %v1305_v8  ;;  %v1711_v12 = vpop.f32.mrb[27].mxu0  ;;  %v1374_v32 = vsel %vm837_vm3, %v1369_v1, 0 }
 0x74f   : > { %1719 = vmatpush3.bf16.msra.mxu0 %v1374_v32 }
 0x750   : > { %v1307_v13 = vmax.f32 %v1306_v11, -1e+30 }
 0x752   : > { %v1308_v14 = vsel %vm766_vm2, %v1307_v13, -inf }
 0x753   : > { %1309 = vmax.xlane.f32.xlu0 %v1308_v14 }
 0x7e0   : > { %v1310_v15 = vpop.xlane.xlu0 %1309 }
 0x7e1   : > { %v1311_v16 = vsub.f32 %v1307_v13, %v1310_v15 }
 0x7e3   : > { %v1312_v17 = vmul.f32 1.442695, %v1311_v16 }
 0x7e5   : > { %1755 = vpow2.f32 %v1312_v17 }
 0x7ef   : > { %v1756_v19 = vpop.eup %1755 }
 0x7f0   : > { %v1314_v20 = vsel %vm766_vm2, %v1756_v19, 0.0 }
 0x7f1   : > { %1315 = vadd.xlane.f32.xlu1 %v1314_v20 }
 0x802   : > { %1320 = vrot.lane.b32.xlu1 %v1958_v59, %s1773_s17 }
 0x819   : > { %v1248_v21 = vpop.f32.mrb[20].mxu1 }
 0x81a   : > { %v1254_v23 = vadd.f32 %v1248_v21, %v2000_v40  ;;  %v1704_v24 = vpop.f32.mrb[21].mxu1 }
 0x81b   : > { %v1251_v25 = vpop.f32.mrb[22].mxu1 }
 0x81c   : > { %v1705_v26 = vpop.f32.mrb[23].mxu1 }
 0x87e   : > { %v1316_v27 = vpop.xlane.xlu1 %1315 }
 0x87f   : > { %1757 = vrcp.f32 %v1316_v27 }
 0x882   : > { %v1321_v28 = vpop.permute.xlu1 %1320 }
 0x883   : > { %v1326_v29 = vsel %vm837_vm3, %v1321_v28, 0 }
 0x884   : > { %1713 = vmatpush3.bf16.msra.mxu1 %v1326_v29 }
 0x889   : > { %v1758_v59 = vpop.eup %1757 }
 0x88a   : > { %v1318_v30 = vmul.f32 %v1758_v59, %v1756_v19 }
 0x88c   : > { %v1319_v31 = vpack.c.bf16 %v1318_v30, %v1318_v30 }
 0x88e   : > { %1715 = vmatmul.mubr.msk.bf16.vlgmr.msra.gmra.mrb[24].mxu1 %vm766_vm2, %v1319_v31 }
 0x961   : > { %v1362_v33 = vpop.f32.mrb[24].mxu1 }
 0x962   : > { %v1368_v34 = vpack.c.bf16 %v1362_v33, %v1362_v33  ;;  %v1716_v35 = vpop.f32.mrb[25].mxu1 }
 0x963   : > { %v1365_v36 = vpop.f32.mrb[26].mxu1 }
 0x964   : > { %v1717_v37 = vpop.f32.mrb[27].mxu1  ;;  %1721 = vmatmul.mubr.msk.bf16.vlgmr.msra.gmra.mrb[28].mxu0 %vm766_vm2, %v1368_v34 }
 0xa37   : > { %v1410_v38 = vpop.f32.mrb[28].mxu0 }
 0xa38   : > { %v1416_v40 = vadd.f32 %v1410_v38, %v1254_v23  ;;  %v1722_v41 = vpop.f32.mrb[29].mxu0 }
 0xa39   : > { %v1413_v42 = vpop.f32.mrb[30].mxu0 }
 0xa3a   : > { %v1424_v44 = vadd.f32 %v1590_v39, %v1416_v40  ;;  %v1723_v45 = vpop.f32.mrb[31].mxu0 }
 0xa3c   : > { %v1425_v46 = vadd.f32 %v1424_v44, %v559_v43 }
 0xa3e   : > { %v1426_v47 = vsel %vm585_vm1, %v1425_v46, 0.0 }
 0xa3f   : > { %1427 = vadd.xlane.f32.xlu1 %v1426_v47 }
 0xacc   : > { %v1428_v48 = vpop.xlane.xlu1 %1427 }
 0xacd   : > { %v1430_v49 = vmul.f32 0.03125, %v1428_v48 }
 0xacf   : > { %v1431_v50 = vsub.f32 %v1425_v46, %v1430_v49 }
 0xad1   : > { %v1432_v51 = vmul.f32 %v1431_v50, %v1431_v50 }
 0xad3   : > { %v1433_v52 = vsel %vm585_vm1, %v1432_v51, 0.0 }
 0xad4   : > { %1434 = vadd.xlane.f32.xlu0 %v1433_v52 }
 0xb61   : > { %v1435_v53 = vpop.xlane.xlu0 %1434 }
 0xb62   : > { %v1436_v54 = vmul.f32 0.03125, %v1435_v53 }
 0xb64   : > { %v1437_v55 = vadd.f32 1e-05, %v1436_v54 }
 0xb66   : > { %1759 = vrsqrt.f32 %v1437_v55 }
 0xb70   : > { %v1760_v56 = vpop.eup %1759 }
 0xb71   : > { %v1439_v58 = vmul.f32 %v1760_v56, %v1431_v50 }
 0xb73   : > { %v1447_v61 = vmul.f32 %v1591_v57, %v1439_v58 }
 0xb75   : > { %v1455_v62 = vadd.f32 %v1592_v60, %v1447_v61 }
 0xb77   : > { %1456 = vst.msk [vmem:[%s554_s22] sm:$0xff] %vm585_vm1, %v1455_v62 }
 0xb78 PF: > { %s25_s18 = sadd.s32 1, %s1767_s18  }
 0xb79   : > { %p22_p4 = scmp.ge.s32.totalorder %s25_s18, 4  }
 0xb7b   :  { %24 = sbr.rel (!%p22_p4) target bundleno = 1 (0x1), region = 122 }

// kernel: transformer_forward.15
= control target key start
LH: loop header
LB: loop body
LE: loop exit
PB: predicated region body
PF: predicated region fallthrough
CT: control target
= control target key end

     0   :  { %s1854_s18 = smov 0   ;;  %s2058_s0 = inlined_call_operand.vmem [shape: f32[2,8,32], index: 0, kind: input, shape index: {}, may-alias: {0,1}]   ;;  %s2059_s1 = inlined_call_operand.vmem [shape: f32[2,8,32], index: 1, kind: input, shape index: {}, may-alias: {0,1}]   ;;  %s2060_s2 = inlined_call_operand.vmem [shape: f32[2,8,32], index: 2, kind: input, shape index: {}, may-alias: {2,3}]   ;;  %s2061_s3 = inlined_call_operand.vmem [shape: f32[2,8,32], index: 3, kind: input, shape index: {}, may-alias: {2,3}]   ;;  %s2062_s4 = inlined_call_operand.vmem [shape: f32[2,1,8,8], index: 4, kind: input, shape index: {}]   ;;  %s2063_s5 = inlined_call_operand.vmem [shape: bf16[32,32], index: 5, kind: input, shape index: {}]   ;;  %s2064_s6 = inlined_call_operand.vmem [shape: f32[1,32], index: 6, kind: input, shape index: {}]   ;;  %s2065_s7 = inlined_call_operand.vmem [shape: bf16[32,32], index: 7, kind: input, shape index: {}]   ;;  %s2066_s8 = inlined_call_operand.vmem [shape: f32[1,32], index: 8, kind: input, shape index: {}]   ;;  %s2067_s9 = inlined_call_operand.vmem [shape: bf16[32,32], index: 9, kind: input, shape index: {}]   ;;  %s2068_s10 = inlined_call_operand.vmem [shape: f32[1,32], index: 10, kind: input, shape index: {}]   ;;  %s2069_s11 = inlined_call_operand.vmem [shape: bf16[32,32], index: 11, kind: input, shape index: {}]   ;;  %s2070_s12 = inlined_call_operand.vmem [shape: f32[1,32], index: 12, kind: input, shape index: {}]   ;;  %s2071_s13 = inlined_call_operand.vmem [shape: f32[1,32], index: 13, kind: input, shape index: {}]   ;;  %s2072_s14 = inlined_call_operand.vmem [shape: f32[1,32], index: 14, kind: input, shape index: {}]   ;;  %s2073_s15 = inlined_call_operand.vmem [shape: f32[2,8,32], index: 15, kind: output, shape index: {}]  }
   0x1 LB: > { %s1555_s19 = sadd.s32 4294967295, %s1767_s18   ;;  %p1559_p0 = scmp.ge.s32.totalorder %s1767_s18, 1  ;;  %s1767_s18 = sphi %s1854_s18, %s25_s18  }
   0x2   : > { %p472_p1 = scmp.lt.s32.totalorder %s1767_s18, 3 }
   0x4   : > { %p473_p2 = pnand %p1559_p0, %p472_p1 }
   0x5   : > { %v1737_v0 = vld [vmem:[%s2065_s7] sm:$0xff] (!%p473_p2)   ;;  %v1769_v1 = vmov (!%p473_p2), 0.0   ;;  %v1738_v2 = vld [vmem:[%s2065_s7 + $0x8] sm:$0xff] (!%p473_p2)   ;;  %vm1770_vm0 = vmmov (!%p473_p2), 0   ;;  %p534_p3 = scmp.lt.s32.totalorder (!%p473_p2), %s1555_s19, 1  ;;  %vm588_vm1 = vcmask (!%p473_p2), 261120  }
   0x6   : > { %476 = sbr.rel (%p473_p2) target bundleno = 2936 (0xb78), region = 80  ;;  %1636 = vmatprep.subr.bf16.mxu1 (!%p473_p2), %v1769_v1  ;;  %1628 = vmatprep.subr.bf16.mxu0 (!%p473_p2), %v1769_v1  ;;  %v1739_v3 = vld [vmem:[%s2063_s5] sm:$0xff] (!%p473_p2)   ;;  %v1740_v4 = vld [vmem:[%s2063_s5 + $0x8] sm:$0xff] (!%p473_p2)   ;;  %vm769_vm2 = vcmask (!%p473_p2), 64512   ;;  %s1771_s25 = smov (!%p473_p2), 120   ;;  %vm834_vm3 = vcmask (!%p473_p2), 1043456  }
   0x7   : > { %1637 = vmatpush3.bf16.msra.mxu1 (!%p473_p2), %v1737_v0  ;;  %1640 = vmatprep.mubr.msk.bf16.mxu1 (!%p473_p2), %vm1770_vm0, %v1769_v1  ;;  %v1570_v9 = vld [vmem:[%s2066_s8] ss:$0 sm:$0xff] (!%p473_p2)  ;;  %v1742_v25 = vld [vmem:[%s2067_s9 + $0x8] sm:$0xff] (!%p473_p2)   ;;  %s1772_s26 = smov (!%p473_p2), 112  }
   0x8   : > { %1638 = vmatprep.subr.bf16.mxu1 (!%p473_p2), %v1769_v1  ;;  %1632 = vmatprep.mubr.msk.bf16.mxu0 (!%p473_p2), %vm1770_vm0, %v1769_v1  ;;  %v1566_v10 = vld [vmem:[%s2064_s6] ss:$0 sm:$0xff] (!%p473_p2) }
   0x9   : > { %1629 = vmatpush3.bf16.msra.mxu0 (!%p473_p2), %v1739_v3  ;;  %v1741_v24 = vld [vmem:[%s2067_s9] sm:$0xff] (!%p473_p2)  }
   0xa   : > { %1630 = vmatprep.subr.bf16.mxu0 (!%p473_p2), %v1769_v1  ;;  %v1574_v57 = vld [vmem:[%s2068_s10] ss:$0 sm:$0xff] (!%p473_p2) }
   0xb   : > { %1639 = vmatpush3.bf16.msra.mxu1 (!%p473_p2), %v1738_v2 }
   0xc   : > { %1652 = vmatprep.subr.bf16.mxu1 (!%p473_p2), %v1769_v1 }
   0xd   : > { %s2075_s19 = smov (!%p534_p3, %s1555_s19), 1  ;;  %1631 = vmatpush3.bf16.msra.mxu0 %v1740_v4 }
   0xe   : > { %s1882_s28 = sshll.u32 %s2075_s19, 3  ;;  %1644 = vmatprep.subr.bf16.mxu0 %v1769_v1 }
   0xf   : > { %s541_s16 = scalar_lea.vmem %s2059_s1, %s1882_s28  ;;  %s537_s21 = scalar_lea.vmem %s2058_s0, %s1882_s28 }
  0x10   : > { %v560_v5 = vld [vmem:[%s541_s16] sm:$0xff]  ;;  %s545_s16 = scalar_lea.vmem %s2060_s2, %s1882_s28  ;;  %s553_s22 = scalar_lea.vmem %s2062_s4, %s1882_s28 }
  0x11   : > { %v559_v6 = vld [vmem:[%s537_s21] sm:$0xff]  ;;  %v632_v7 = vpack.c.bf16 %v560_v5, %v560_v5  ;;  %s549_s24 = scalar_lea.vmem %s2061_s3, %s1882_s28  ;;  %s557_s21 = scalar_lea.vmem %s2073_s15, %s1882_s28 }
  0x12   : > { %v564_v8 = vpack.c.bf16 %v559_v6, %v559_v6  ;;  %v561_v26 = vld [vmem:[%s545_s16] sm:$0xff]  ;;  %s1773_s16 = smov 104  }
  0x13   : > { %1641 = vmatmul.mubr.msk.bf16.vlgmr.msra.gmra.mrb[0].mxu1 %vm588_vm1, %v632_v7  ;;  %v699_v27 = vpack.c.bf16 %v561_v26, %v561_v26  ;;  %v1945_v32 = vld [vmem:[%s553_s22] sm:$0xff] }
  0x14   : > { %1633 = vmatmul.mubr.msk.bf16.vlgmr.msra.gmra.mrb[0].mxu0 %vm588_vm1, %v564_v8  ;;  %1654 = vmatprep.mubr.msk.bf16.mxu1 %vm1770_vm0, %v1769_v1  ;;  %v997_v7 = vld [vmem:[%s2069_s11 + $0x4] sm:$0xf] }
  0x15   : > { %1648 = vmatprep.mubr.msk.bf16.mxu0 %vm1770_vm0, %v1769_v1  ;;  %1645 = vmatpush3.bf16.msra.mxu0 %v1741_v24  ;;  %v1002_v8 = vsel %vm834_vm3, %v997_v7, 0 }
  0x16   : > { %1646 = vmatprep.subr.bf16.mxu0 %v1769_v1 }
  0x19   : > { %1647 = vmatpush3.bf16.msra.mxu0 %v1742_v25 }
  0x1a   : > { %1658 = vmatprep.subr.bf16.mxu0 %v1769_v1 }
  0x1c   : > { %1649 = vmatmul.mubr.msk.bf16.vlgmr.msra.gmra.mrb[4].mxu0 %vm588_vm1, %v699_v27 }
  0x1d   : > { %1660 = vmatprep.mubr.msk.bf16.mxu0 %vm1770_vm0, %v1769_v1 }
  0xe6   : > { %v693_v11 = vpop.f32.mrb[0].mxu1 }
  0xe7   : > { %v626_v12 = vpop.f32.mrb[0].mxu0  ;;  %v694_v13 = vadd.f32 %v1570_v9, %v693_v11  ;;  %v1642_v14 = vpop.f32.mrb[1].mxu1 }
  0xe8   : > { %v627_v15 = vadd.f32 %v1566_v10, %v626_v12  ;;  %v1634_v16 = vpop.f32.mrb[1].mxu0  ;;  %v696_v17 = vpop.f32.mrb[2].mxu1 }
  0xe9   : > { %v629_v18 = vpop.f32.mrb[2].mxu0  ;;  %v1906_v19 = vpack.c.bf16 %v694_v13, %v694_v13  ;;  %v1643_v20 = vpop.f32.mrb[3].mxu1  ;;  %v879_v13 = vld [vmem:[%s2069_s11] sm:$0xf] }
  0xea   : > { %v1635_v21 = vpop.f32.mrb[3].mxu0  ;;  %v1910_v22 = vpack.c.bf16 %v627_v15, %v627_v15  ;;  %v1048_v16 = vsel %vm834_vm3, %v879_v13, 0 }
  0xeb   : > { %884 = vrot.lane.b32.xlu0 %v1906_v19, %s1771_s25  ;;  %v774_v23 = vsel %vm769_vm2, %v1906_v19, 0 }
  0xec   : > { %1653 = vmatpush3.bf16.xpose.msra.mxu1 %v774_v23 }
  0xed   : > { %1664 = vmatprep.subr.bf16.mxu1 %v1769_v1 }
  0xef   : > { %881 = vrot.lane.b32.xlu0 %v1910_v22, %s1771_s25  ;;  %v760_v51 = vpop.f32.mrb[4].mxu0 }
  0xf0   : > { %v1650_v52 = vpop.f32.mrb[5].mxu0  ;;  %v761_v58 = vadd.f32 %v1574_v57, %v760_v51 }
  0xf1   : > { %v763_v53 = vpop.f32.mrb[6].mxu0 }
  0xf2   : > { %v1651_v54 = vpop.f32.mrb[7].mxu0  ;;  %v1955_v59 = vpack.c.bf16 %v761_v58, %v761_v58 }
  0xf3   : > { %1655 = vmatmul.mubr.msk.bf16.vlgmr.msra.gmra.mrb[4].mxu1 %vm769_vm2, %v1910_v22 }
  0xf4   : > { %1666 = vmatprep.mubr.msk.bf16.mxu1 %vm1770_vm0, %v1769_v1  ;;  %v836_v60 = vsel %vm834_vm3, %v1955_v59, 0 }
  0xf5   : > { %1659 = vmatpush3.bf16.msra.mxu0 %v836_v60 }
  0xf6   : > { %1670 = vmatprep.subr.bf16.mxu0 %v1769_v1 }
 0x15d   : > { %v885_v28 = vpop.permute.xlu0 %884 }
 0x15e   : > { %v890_v29 = vsel %vm769_vm2, %v885_v28, 0 }
 0x15f   : > { %1665 = vmatpush3.bf16.xpose.msra.mxu1 %v890_v29 }
 0x160   : > { %1676 = vmatprep.subr.bf16.mxu1 %v1769_v1 }
 0x161   : > { %v882_v30 = vpop.permute.xlu0 %881 }
 0x166   : > { %1667 = vmatmul.mubr.msk.bf16.vlgmr.msra.gmra.mrb[8].mxu1 %vm769_vm2, %v882_v30 }
 0x167   : > { %1678 = vmatprep.mubr.msk.bf16.mxu1 %vm1770_vm0, %v1769_v1  ;;  %1677 = vmatpush3.bf16.msra.mxu1 %v1002_v8 }
 0x168   : > { %1688 = vmatprep.subr.bf16.mxu1 %v1769_v1 }
 0x1c6   : > { %v810_v31 = vpop.f32.mrb[4].mxu1 }
 0x1c7   : > { %v816_v33 = vmul.f32 0.35355338, %v810_v31  ;;  %v1656_v34 = vpop.f32.mrb[5].mxu1 }
 0x1c8   : > { %v813_v35 = vpop.f32.mrb[6].mxu1 }
 0x1c9   : > { %v1657_v36 = vpop.f32.mrb[7].mxu1  ;;  %v817_v37 = vadd.f32 %v816_v33, %v1945_v32 }
 0x1cb   : > { %v818_v38 = vmax.f32 %v817_v37, -1e+30 }
 0x1cd   : > { %v819_v39 = vsel %vm769_vm2, %v818_v38, -inf }
 0x1ce   : > { %820 = vmax.xlane.f32.xlu1 %v819_v39 }
 0x239   : > { %v926_v40 = vpop.f32.mrb[8].mxu1 }
 0x23a   : > { %v932_v41 = vmul.f32 0.35355338, %v926_v40  ;;  %v1668_v42 = vpop.f32.mrb[9].mxu1 }
 0x23b   : > { %v929_v43 = vpop.f32.mrb[10].mxu1 }
 0x23c   : > { %v933_v44 = vadd.f32 %v932_v41, %v1945_v32  ;;  %v1669_v45 = vpop.f32.mrb[11].mxu1 }
 0x23e   : > { %v934_v46 = vmax.f32 %v933_v44, -1e+30 }
 0x240   : > { %v935_v47 = vsel %vm769_vm2, %v934_v46, -inf }
 0x241   : > { %936 = vmax.xlane.f32.xlu1 %v935_v47 }
 0x25b   : > { %v821_v48 = vpop.xlane.xlu1 %820 }
 0x25c   : > { %v822_v49 = vsub.f32 %v818_v38, %v821_v48 }
 0x25e   : > { %v823_v50 = vmul.f32 1.442695, %v822_v49 }
 0x260   : > { %1743 = vpow2.f32 %v823_v50 }
 0x26a   : > { %v1744_v55 = vpop.eup %1743 }
 0x26b   : > { %v825_v56 = vsel %vm769_vm2, %v1744_v55, 0.0 }
 0x26c   : > { %826 = vadd.xlane.f32.xlu0 %v825_v56 }
 0x282   : > { %1155 = vrot.lane.b32.xlu0 %v1955_v59, %s1772_s26 }
 0x2ce   : > { %v937_v61 = vpop.xlane.xlu1 %936 }
 0x2cf   : > { %v938_v62 = vsub.f32 %v934_v46, %v937_v61 }
 0x2d1   : > { %v939_v63 = vmul.f32 1.442695, %v938_v62 }
 0x2d3   : > { %1745 = vpow2.f32 %v939_v63 }
 0x2dd   : > { %v1746_v0 = vpop.eup %1745 }
 0x2de   : > { %v941_v2 = vsel %vm769_vm2, %v1746_v0, 0.0 }
 0x2df   : > { %942 = vadd.xlane.f32.xlu1 %v941_v2 }
 0x2f0   : > { %948 = vrot.lane.b32.xlu1 %v1955_v59, %s1771_s25 }
 0x2f4   : > { %1092 = vrot.lane.b32.xlu1 %v1906_v19, %s1772_s26 }
 0x2f8   : > { %1090 = vrot.lane.b32.xlu1 %v1910_v22, %s1772_s26 }
 0x2f9   : > { %v827_v3 = vpop.xlane.xlu0 %826 }
 0x2fa   : > { %1747 = vrcp.f32 %v827_v3 }
 0x2fd   : > { %v1156_v17 = vpop.permute.xlu0 %1155 }
 0x2fe   : > { %v1161_v24 = vsel %vm834_vm3, %v1156_v17, 0 }
 0x304   : > { %v1748_v4 = vpop.eup %1747 }
 0x305   : > { %v829_v5 = vmul.f32 %v1748_v4, %v1744_v55 }
 0x307   : > { %v830_v6 = vpack.c.bf16 %v829_v5, %v829_v5 }
 0x309   : > { %1661 = vmatmul.mubr.msk.bf16.vlgmr.msra.gmra.mrb[8].mxu0 %vm769_vm2, %v830_v6 }
 0x30a   : > { %1672 = vmatprep.mubr.msk.bf16.mxu0 %vm1770_vm0, %v1769_v1 }
 0x36c   : > { %v943_v9 = vpop.xlane.xlu1 %942 }
 0x36d   : > { %1749 = vrcp.f32 %v943_v9 }
 0x370   : > { %v949_v10 = vpop.permute.xlu1 %948 }
 0x371   : > { %v954_v11 = vsel %vm834_vm3, %v949_v10, 0 }
 0x372   : > { %1671 = vmatpush3.bf16.msra.mxu0 %v954_v11 }
 0x373   : > { %1682 = vmatprep.subr.bf16.mxu0 %v1769_v1 }
 0x374   : > { %v1093_v26 = vpop.permute.xlu1 %1092 }
 0x375   : > { %v1098_v31 = vsel %vm769_vm2, %v1093_v26, 0 }
 0x377   : > { %v1750_v12 = vpop.eup %1749 }
 0x378   : > { %v945_v14 = vmul.f32 %v1750_v12, %v1746_v0  ;;  %v1091_v34 = vpop.permute.xlu1 %1090 }
 0x37a   : > { %v946_v15 = vpack.c.bf16 %v945_v14, %v945_v14 }
 0x37c   : > { %1673 = vmatmul.mubr.msk.bf16.vlgmr.msra.gmra.mrb[12].mxu0 %vm769_vm2, %v946_v15 }
 0x37d   : > { %1683 = vmatpush3.bf16.msra.mxu0 %v1048_v16  ;;  %1684 = vmatprep.mubr.msk.bf16.mxu0 %vm1770_vm0, %v1769_v1 }
 0x37e   : > { %1694 = vmatprep.subr.bf16.mxu0 %v1769_v1 }
 0x3dc   : > { %v872_v18 = vpop.f32.mrb[8].mxu0 }
 0x3dd   : > { %v878_v20 = vpack.c.bf16 %v872_v18, %v872_v18  ;;  %v1662_v21 = vpop.f32.mrb[9].mxu0 }
 0x3de   : > { %v875_v23 = vpop.f32.mrb[10].mxu0 }
 0x3df   : > { %v1663_v25 = vpop.f32.mrb[11].mxu0  ;;  %1685 = vmatmul.mubr.msk.bf16.vlgmr.msra.gmra.mrb[16].mxu0 %vm769_vm2, %v878_v20 }
 0x3e0   : > { %1695 = vmatpush3.bf16.msra.mxu0 %v1161_v24  ;;  %1696 = vmatprep.mubr.msk.bf16.mxu0 %vm1770_vm0, %v1769_v1 }
 0x3e1   : > { %1706 = vmatprep.subr.bf16.mxu0 %v1769_v1 }
 0x44f   : > { %v990_v27 = vpop.f32.mrb[12].mxu0 }
 0x450   : > { %v996_v28 = vpack.c.bf16 %v990_v27, %v990_v27  ;;  %v1674_v29 = vpop.f32.mrb[13].mxu0 }
 0x451   : > { %v993_v30 = vpop.f32.mrb[14].mxu0 }
 0x452   : > { %v1675_v33 = vpop.f32.mrb[15].mxu0  ;;  %1679 = vmatmul.mubr.msk.bf16.vlgmr.msra.gmra.mrb[12].mxu1 %vm769_vm2, %v996_v28 }
 0x453   : > { %1689 = vmatpush3.bf16.xpose.msra.mxu1 %v1098_v31  ;;  %1690 = vmatprep.mubr.msk.bf16.mxu1 %vm1770_vm0, %v1769_v1 }
 0x454   : > { %1700 = vmatprep.subr.bf16.mxu1 %v1769_v1 }
 0x45a   : > { %1691 = vmatmul.mubr.msk.bf16.vlgmr.msra.gmra.mrb[16].mxu1 %vm769_vm2, %v1091_v34 }
 0x45b   : > { %1702 = vmatprep.mubr.msk.bf16.mxu1 %vm1770_vm0, %v1769_v1 }
 0x4b2   : > { %v1084_v35 = vpop.f32.mrb[16].mxu0 }
 0x4b3   : > { %v1686_v36 = vpop.f32.mrb[17].mxu0 }
 0x4b4   : > { %v1087_v37 = vpop.f32.mrb[18].mxu0 }
 0x4b5   : > { %v1687_v38 = vpop.f32.mrb[19].mxu0 }
 0x525   : > { %v1038_v39 = vpop.f32.mrb[12].mxu1 }
 0x526   : > { %v1997_v40 = vadd.f32 %v1084_v35, %v1038_v39  ;;  %v1680_v41 = vpop.f32.mrb[13].mxu1  ;;  %v1590_v39 = vld [vmem:[%s2070_s12] ss:$0 sm:$0xff] }
 0x527   : > { %v1041_v42 = vpop.f32.mrb[14].mxu1 }
 0x528   : > { %v1681_v43 = vpop.f32.mrb[15].mxu1 }
 0x529   : > { %v562_v43 = vld [vmem:[%s549_s24] sm:$0xff] }
 0x52d   : > { %v1134_v44 = vpop.f32.mrb[16].mxu1 }
 0x52e   : > { %v1140_v45 = vmul.f32 0.35355338, %v1134_v44  ;;  %v1692_v46 = vpop.f32.mrb[17].mxu1 }
 0x52f   : > { %v1137_v47 = vpop.f32.mrb[18].mxu1 }
 0x530   : > { %v1141_v48 = vadd.f32 %v1140_v45, %v1945_v32  ;;  %v1693_v49 = vpop.f32.mrb[19].mxu1 }
 0x532   : > { %v1142_v50 = vmax.f32 %v1141_v48, -1e+30 }
 0x534   : > { %v1143_v51 = vsel %vm769_vm2, %v1142_v50, -inf }
 0x535   : > { %1144 = vmax.xlane.f32.xlu1 %v1143_v51 }
 0x5c2   : > { %v1145_v52 = vpop.xlane.xlu1 %1144 }
 0x5c3   : > { %v1146_v53 = vsub.f32 %v1142_v50, %v1145_v52 }
 0x5c5   : > { %v1147_v54 = vmul.f32 1.442695, %v1146_v53 }
 0x5c7   : > { %1751 = vpow2.f32 %v1147_v54 }
 0x5d1   : > { %v1752_v55 = vpop.eup %1751 }
 0x5d2   : > { %v1149_v56 = vsel %vm769_vm2, %v1752_v55, 0.0 }
 0x5d3   : > { %1150 = vadd.xlane.f32.xlu0 %v1149_v56 }
 0x5e9   : > { %1254 = vrot.lane.b32.xlu0 %v1906_v19, %s1773_s16 }
 0x5ed   : > { %1252 = vrot.lane.b32.xlu0 %v1910_v22, %s1773_s16  ;;  %v1204_v22 = vld [vmem:[%s2069_s11 + $0x8] sm:$0xf] }
 0x5ee   : > { %v1209_v0 = vsel %vm834_vm3, %v1204_v22, 0 }
 0x5ef   : > { %1701 = vmatpush3.bf16.msra.mxu1 %v1209_v0 }
 0x5f0   : > { %1712 = vmatprep.subr.bf16.mxu1 %v1769_v1 }
 0x660   : > { %v1151_v57 = vpop.xlane.xlu0 %1150 }
 0x661   : > { %1753 = vrcp.f32 %v1151_v57  ;;  %v1591_v57 = vld [vmem:[%s2071_s13] ss:$0 sm:$0xff] }
 0x664   : > { %v1255_v61 = vpop.permute.xlu0 %1254 }
 0x665   : > { %v1260_v63 = vsel %vm769_vm2, %v1255_v61, 0 }
 0x668   : > { %v1253_v19 = vpop.permute.xlu0 %1252 }
 0x66b   : > { %v1754_v58 = vpop.eup %1753 }
 0x66c   : > { %v1153_v60 = vmul.f32 %v1754_v58, %v1752_v55 }
 0x66e   : > { %v1154_v62 = vpack.c.bf16 %v1153_v60, %v1153_v60  ;;  %v1592_v60 = vld [vmem:[%s2072_s14] ss:$0 sm:$0xff] }
 0x670   : > { %1697 = vmatmul.mubr.msk.bf16.vlgmr.msra.gmra.mrb[20].mxu0 %vm769_vm2, %v1154_v62 }
 0x671   : > { %1707 = vmatpush3.bf16.xpose.msra.mxu0 %v1260_v63  ;;  %1708 = vmatprep.mubr.msk.bf16.mxu0 %vm1770_vm0, %v1769_v1 }
 0x672   : > { %1718 = vmatprep.subr.bf16.mxu0 %v1769_v1 }
 0x678   : > { %1709 = vmatmul.mubr.msk.bf16.vlgmr.msra.gmra.mrb[24].mxu0 %vm769_vm2, %v1253_v19 }
 0x679   : > { %1720 = vmatprep.mubr.msk.bf16.mxu0 %vm1770_vm0, %v1769_v1 }
 0x743   : > { %v1197_v2 = vpop.f32.mrb[20].mxu0 }
 0x744   : > { %v1203_v3 = vpack.c.bf16 %v1197_v2, %v1197_v2  ;;  %v1698_v4 = vpop.f32.mrb[21].mxu0 }
 0x745   : > { %v1200_v5 = vpop.f32.mrb[22].mxu0 }
 0x746   : > { %v1699_v6 = vpop.f32.mrb[23].mxu0  ;;  %1703 = vmatmul.mubr.msk.bf16.vlgmr.msra.gmra.mrb[20].mxu1 %vm769_vm2, %v1203_v3 }
 0x747   : > { %1714 = vmatprep.mubr.msk.bf16.mxu1 %vm1770_vm0, %v1769_v1  ;;  %v1366_v1 = vld [vmem:[%s2069_s11 + $0xc] sm:$0xf] }
 0x74b   : > { %v1296_v7 = vpop.f32.mrb[24].mxu0 }
 0x74c   : > { %v1302_v8 = vmul.f32 0.35355338, %v1296_v7  ;;  %v1710_v9 = vpop.f32.mrb[25].mxu0 }
 0x74d   : > { %v1299_v10 = vpop.f32.mrb[26].mxu0 }
 0x74e   : > { %v1303_v11 = vadd.f32 %v1302_v8, %v1945_v32  ;;  %v1711_v12 = vpop.f32.mrb[27].mxu0  ;;  %v1371_v32 = vsel %vm834_vm3, %v1366_v1, 0 }
 0x74f   : > { %1719 = vmatpush3.bf16.msra.mxu0 %v1371_v32 }
 0x750   : > { %v1304_v13 = vmax.f32 %v1303_v11, -1e+30 }
 0x752   : > { %v1305_v14 = vsel %vm769_vm2, %v1304_v13, -inf }
 0x753   : > { %1306 = vmax.xlane.f32.xlu0 %v1305_v14 }
 0x7e0   : > { %v1307_v15 = vpop.xlane.xlu0 %1306 }
 0x7e1   : > { %v1308_v16 = vsub.f32 %v1304_v13, %v1307_v15 }
 0x7e3   : > { %v1309_v17 = vmul.f32 1.442695, %v1308_v16 }
 0x7e5   : > { %1755 = vpow2.f32 %v1309_v17 }
 0x7ef   : > { %v1756_v18 = vpop.eup %1755 }
 0x7f0   : > { %v1311_v20 = vsel %vm769_vm2, %v1756_v18, 0.0 }
 0x7f1   : > { %1312 = vadd.xlane.f32.xlu1 %v1311_v20 }
 0x802   : > { %1317 = vrot.lane.b32.xlu1 %v1955_v59, %s1773_s16 }
 0x819   : > { %v1245_v21 = vpop.f32.mrb[20].mxu1 }
 0x81a   : > { %v1251_v23 = vadd.f32 %v1245_v21, %v1997_v40  ;;  %v1704_v24 = vpop.f32.mrb[21].mxu1 }
 0x81b   : > { %v1248_v25 = vpop.f32.mrb[22].mxu1 }
 0x81c   : > { %v1705_v26 = vpop.f32.mrb[23].mxu1 }
 0x87e   : > { %v1313_v27 = vpop.xlane.xlu1 %1312 }
 0x87f   : > { %1757 = vrcp.f32 %v1313_v27 }
 0x882   : > { %v1318_v28 = vpop.permute.xlu1 %1317 }
 0x883   : > { %v1323_v29 = vsel %vm834_vm3, %v1318_v28, 0 }
 0x884   : > { %1713 = vmatpush3.bf16.msra.mxu1 %v1323_v29 }
 0x889   : > { %v1758_v59 = vpop.eup %1757 }
 0x88a   : > { %v1315_v30 = vmul.f32 %v1758_v59, %v1756_v18 }
 0x88c   : > { %v1316_v31 = vpack.c.bf16 %v1315_v30, %v1315_v30 }
 0x88e   : > { %1715 = vmatmul.mubr.msk.bf16.vlgmr.msra.gmra.mrb[24].mxu1 %vm769_vm2, %v1316_v31 }
 0x961   : > { %v1359_v33 = vpop.f32.mrb[24].mxu1 }
 0x962   : > { %v1365_v34 = vpack.c.bf16 %v1359_v33, %v1359_v33  ;;  %v1716_v35 = vpop.f32.mrb[25].mxu1 }
 0x963   : > { %v1362_v36 = vpop.f32.mrb[26].mxu1 }
 0x964   : > { %v1717_v37 = vpop.f32.mrb[27].mxu1  ;;  %1721 = vmatmul.mubr.msk.bf16.vlgmr.msra.gmra.mrb[28].mxu0 %vm769_vm2, %v1365_v34 }
 0xa37   : > { %v1407_v38 = vpop.f32.mrb[28].mxu0 }
 0xa38   : > { %v1413_v40 = vadd.f32 %v1407_v38, %v1251_v23  ;;  %v1722_v41 = vpop.f32.mrb[29].mxu0 }
 0xa39   : > { %v1410_v42 = vpop.f32.mrb[30].mxu0 }
 0xa3a   : > { %v1421_v44 = vadd.f32 %v1590_v39, %v1413_v40  ;;  %v1723_v45 = vpop.f32.mrb[31].mxu0 }
 0xa3c   : > { %v1422_v46 = vadd.f32 %v1421_v44, %v562_v43 }
 0xa3e   : > { %v1423_v47 = vsel %vm588_vm1, %v1422_v46, 0.0 }
 0xa3f   : > { %1424 = vadd.xlane.f32.xlu1 %v1423_v47 }
 0xacc   : > { %v1425_v48 = vpop.xlane.xlu1 %1424 }
 0xacd   : > { %v1427_v49 = vmul.f32 0.03125, %v1425_v48 }
 0xacf   : > { %v1428_v50 = vsub.f32 %v1422_v46, %v1427_v49 }
 0xad1   : > { %v1429_v51 = vmul.f32 %v1428_v50, %v1428_v50 }
 0xad3   : > { %v1430_v52 = vsel %vm588_vm1, %v1429_v51, 0.0 }
 0xad4   : > { %1431 = vadd.xlane.f32.xlu0 %v1430_v52 }
 0xb61   : > { %v1432_v53 = vpop.xlane.xlu0 %1431 }
 0xb62   : > { %v1433_v54 = vmul.f32 0.03125, %v1432_v53 }
 0xb64   : > { %v1434_v55 = vadd.f32 1e-05, %v1433_v54 }
 0xb66   : > { %1759 = vrsqrt.f32 %v1434_v55 }
 0xb70   : > { %v1760_v56 = vpop.eup %1759 }
 0xb71   : > { %v1436_v58 = vmul.f32 %v1760_v56, %v1428_v50 }
 0xb73   : > { %v1444_v61 = vmul.f32 %v1591_v57, %v1436_v58 }
 0xb75   : > { %v1452_v62 = vadd.f32 %v1592_v60, %v1444_v61 }
 0xb77   : > { %1453 = vst.msk [vmem:[%s557_s21] sm:$0xff] %vm588_vm1, %v1452_v62 }
 0xb78 PF: > { %s25_s18 = sadd.s32 1, %s1767_s18  }
 0xb79   : > { %p22_p4 = scmp.ge.s32.totalorder %s25_s18, 4  }
 0xb7b   :  { %24 = sbr.rel (!%p22_p4) target bundleno = 1 (0x1), region = 122 }

// kernel: transformer_forward.13
= control target key start
LH: loop header
LB: loop body
LE: loop exit
PB: predicated region body
PF: predicated region fallthrough
CT: control target
= control target key end

     0   :  { %s2368_s0 = inlined_call_operand.vmem [shape: f32[2,8,32], index: 0, kind: input, shape index: {}, may-alias: {0,1}]   ;;  %s2369_s1 = inlined_call_operand.vmem [shape: f32[2,8,32], index: 1, kind: input, shape index: {}, may-alias: {0,1}]   ;;  %s2370_s2 = inlined_call_operand.vmem [shape: f32[2,8,32], index: 2, kind: input, shape index: {}, may-alias: {2,3}]   ;;  %s2371_s3 = inlined_call_operand.vmem [shape: f32[2,8,32], index: 3, kind: input, shape index: {}, may-alias: {2,3}]   ;;  %s2372_s4 = inlined_call_operand.vmem [shape: f32[2,1,1,8], index: 4, kind: input, shape index: {}]   ;;  %s2373_s5 = inlined_call_operand.vmem [shape: bf16[32,32], index: 5, kind: input, shape index: {}]   ;;  %s2374_s6 = inlined_call_operand.vmem [shape: f32[1,32], index: 6, kind: input, shape index: {}]   ;;  %s2375_s7 = inlined_call_operand.vmem [shape: bf16[32,32], index: 7, kind: input, shape index: {}]   ;;  %s2376_s8 = inlined_call_operand.vmem [shape: f32[1,32], index: 8, kind: input, shape index: {}]   ;;  %s2377_s9 = inlined_call_operand.vmem [shape: bf16[32,32], index: 9, kind: input, shape index: {}]   ;;  %s2378_s10 = inlined_call_operand.vmem [shape: f32[1,32], index: 10, kind: input, shape index: {}]   ;;  %s2379_s11 = inlined_call_operand.vmem [shape: bf16[32,32], index: 11, kind: input, shape index: {}]   ;;  %s2380_s12 = inlined_call_operand.vmem [shape: f32[1,32], index: 12, kind: input, shape index: {}]   ;;  %s2381_s13 = inlined_call_operand.vmem [shape: f32[1,32], index: 13, kind: input, shape index: {}]   ;;  %s2382_s14 = inlined_call_operand.vmem [shape: f32[1,32], index: 14, kind: input, shape index: {}]   ;;  %s2383_s15 = inlined_call_operand.vmem [shape: f32[2,8,32], index: 15, kind: output, shape index: {0}]   ;;  %s2384_s16 = inlined_call_operand.hbm [shape: f32[2,4,8,8], index: 16, kind: output, shape index: {1}]  }
   0x1   :  { %2385 = sst [smem:[#allocation6_spill]] %s2368_s0 }
   0x2   :  { %2386 = sst [smem:[#allocation7_spill]] %s2369_s1 }
   0x3   :  { %2387 = sst [smem:[#allocation8_spill]] %s2370_s2 }
   0x4   :  { %2388 = sst [smem:[#allocation9_spill]] %s2373_s5 }
   0x5   :  { %2389 = sst [smem:[#allocation10_spill]] %s2375_s7 }
   0x6   :  { %22 = vsyncpa [#allocation3], 0 }
   0x7   :  { %24 = vsyncpa [#allocation3 + $0x1], 0  ;;  %s2057_s21 = smov 0   ;;  %s2059_s22 = smov 0  }
   0x8   :  { %s2061_s23 = smov 0   ;;  %s2063_s24 = smov 0  }
   0x9 LB: > { %s2078_s25 = sadd.s32 4294967295, %s1962_s24   ;;  %s1654_s26 = sadd.s32 4294967294, %s1962_s24   ;;  %s1962_s24 = sphi %s2063_s24, %s2402_s24   ;;  %s1958_s23 = sphi %s2061_s23, %s2401_s23   ;;  %s1954_s22 = sphi %s2059_s22, %s2400_s22   ;;  %s1950_s21 = sphi %s2057_s21, %s2399_s21  }
   0xa   : > { %s2082_s27 = sadd.s32 1, %s1962_s24   ;;  %s403_s28 = sadd.s32 1, %s1958_s23 }
   0xb   : > { %s400_s29 = ssub.s32 %s1962_s24, %s2082_s27  ;;  %p413_p0 = scmp.ne.s32.totalorder %s1958_s23, %s1954_s22 }
   0xc   : > { %p401_p1 = scmp.eq.s32.totalorder %s400_s29, 0  ;;  %p414_p2 = scmp.eq.s32.totalorder %s2078_s25, 1 }
   0xd   : > { %p419_p3 = scmp.ne.s32.totalorder %s1954_s22, %s1950_s21  ;;  %p420_p4 = scmp.eq.s32.totalorder %s1654_s26, 1 }
   0xe   : > { %s2093_s30 = scalar_select %p401_p1, %s1958_s23, %s403_s28  }
   0xf   : > { %p2095_p5 = por %p414_p2, %p413_p0  ;;  %p2099_p6 = por %p420_p4, %p419_p3 }
  0x10   : > { %2390 = sst [smem:[#allocation5_spill]] %s2093_s30  ;;  %p1657_p7 = scmp.ge.s32.totalorder %s1962_s24, 1 }
  0x11   : > { %p502_p8 = scmp.lt.s32.totalorder %s1962_s24, 3 }
  0x13   : > { %p503_p9 = pnand %p1657_p7, %p502_p8 }
  0x14   : > { %s2393_s7 = sld [smem:[#allocation10_spill]] (!%p503_p9)  ;;  %v1964_v1 = vmov (!%p503_p9), 0.0   ;;  %s2394_s5 = sld [smem:[#allocation9_spill]] (!%p503_p9)  ;;  %vm1965_vm0 = vmmov (!%p503_p9), 0   ;;  %vm623_vm1 = vcmask (!%p503_p9), 261120   ;;  %vm804_vm2 = vcmask (!%p503_p9), 64512  }
  0x15   : > { %506 = sbr.rel (%p503_p9) target bundleno = 2952 (0xb88), region = 80  ;;  %1742 = vmatprep.subr.bf16.mxu1 (!%p503_p9), %v1964_v1  ;;  %1734 = vmatprep.subr.bf16.mxu0 (!%p503_p9), %v1964_v1  ;;  %p570_p10 = scmp.lt.s32.totalorder (!%p503_p9), %s2078_s25, 1  ;;  %v1668_v9 = vld [vmem:[%s2376_s8] ss:$0 sm:$0xff] (!%p503_p9)  ;;  %v1881_v25 = vld [vmem:[%s2377_s9 + $0x8] sm:$0xff] (!%p503_p9)   ;;  %vm876_vm3 = vcmask (!%p503_p9), 1043456  }
  0x16   : > { %1746 = vmatprep.mubr.msk.bf16.mxu1 (!%p503_p9), %vm1965_vm0, %v1964_v1  ;;  %1738 = vmatprep.mubr.msk.bf16.mxu0 (!%p503_p9), %vm1965_vm0, %v1964_v1  ;;  %s2395_s1 = sld [smem:[#allocation7_spill]] (!%p503_p9)  ;;  %s2396_s20 = sld [smem:[#allocation6_spill]] (!%p503_p9)  ;;  %v1664_v10 = vld [vmem:[%s2374_s6] ss:$0 sm:$0xff] (!%p503_p9) }
  0x17   : > { %v1880_v24 = vld [vmem:[%s2377_s9] sm:$0xff] (!%p503_p9)   ;;  %s2397_s2 = sld [smem:[#allocation8_spill]] (!%p503_p9)  ;;  %s1967_s28 = smov (!%p503_p9), 112  }
  0x18   : > { %v1672_v57 = vld [vmem:[%s2378_s10] ss:$0 sm:$0xff] (!%p503_p9) }
  0x1a   : > { %v1876_v0 = vld [vmem:[%s2393_s7] sm:$0xff] (!%p503_p9)   ;;  %v1877_v2 = vld [vmem:[%s2393_s7 + $0x8] sm:$0xff] (!%p503_p9)  }
  0x1b   : > { %1743 = vmatpush3.bf16.msra.mxu1 (!%p503_p9), %v1876_v0  ;;  %v1878_v3 = vld [vmem:[%s2394_s5] sm:$0xff] (!%p503_p9)   ;;  %v1879_v4 = vld [vmem:[%s2394_s5 + $0x8] sm:$0xff] (!%p503_p9)  }
  0x1c   : > { %1744 = vmatprep.subr.bf16.mxu1 %v1964_v1  ;;  %1735 = vmatpush3.bf16.msra.mxu0 %v1878_v3  ;;  %s2123_s18 = scalar_select %p570_p10, %s2078_s25, 1 }
  0x1d   : > { %1736 = vmatprep.subr.bf16.mxu0 %v1964_v1 }
  0x1e   : > { %s2130_s26 = sshll.u32 %s2123_s18, 3 }
  0x1f   : > { %1745 = vmatpush3.bf16.msra.mxu1 %v1877_v2  ;;  %s577_s7 = scalar_lea.vmem %s2395_s1, %s2130_s26  ;;  %s573_s5 = scalar_lea.vmem %s2396_s20, %s2130_s26 }
  0x20   : > { %1758 = vmatprep.subr.bf16.mxu1 %v1964_v1  ;;  %v595_v5 = vld [vmem:[%s577_s7] sm:$0xff]  ;;  %1737 = vmatpush3.bf16.msra.mxu0 %v1879_v4  ;;  %s581_s30 = scalar_lea.vmem %s2397_s2, %s2130_s26  ;;  %s588_s20 = scalar_lea.vmem %s2372_s4, %s2123_s18 }
  0x21   : > { %v667_v6 = vpack.c.bf16 %v595_v5, %v595_v5  ;;  %v594_v7 = vld [vmem:[%s573_s5] sm:$0xff]  ;;  %1750 = vmatprep.subr.bf16.mxu0 %v1964_v1  ;;  %s1966_s5 = smov 120   ;;  %s1968_s7 = smov 104  }
  0x22   : > { %v599_v8 = vpack.c.bf16 %v594_v7, %v594_v7  ;;  %v596_v26 = vld [vmem:[%s581_s30] sm:$0xff]  ;;  %s567_s30 = sand.u32 1, %s1954_s22  }
  0x23   : > { %1747 = vmatmul.mubr.msk.bf16.vlgmr.msra.gmra.mrb[0].mxu1 %vm623_vm1, %v667_v6  ;;  %v734_v27 = vpack.c.bf16 %v596_v26, %v596_v26  ;;  %v2193_v32 = vld [vmem:[%s588_s20] ss:$0 sm:$0xff]  ;;  %s1658_s29 = sshll.u32 %s567_s30, 5  ;;  %v1041_v7 = vld [vmem:[%s2379_s11 + $0x4] sm:$0xf] }
  0x24   : > { %1739 = vmatmul.mubr.msk.bf16.vlgmr.msra.gmra.mrb[0].mxu0 %vm623_vm1, %v599_v8  ;;  %1760 = vmatprep.mubr.msk.bf16.mxu1 %vm1965_vm0, %v1964_v1  ;;  %s2217_s1 = scalar_lea.vmem [#allocation2], %s1658_s29  ;;  %v1046_v8 = vsel %vm876_vm3, %v1041_v7, 0 }
  0x25   : > { %1754 = vmatprep.mubr.msk.bf16.mxu0 %vm1965_vm0, %v1964_v1  ;;  %1751 = vmatpush3.bf16.msra.mxu0 %v1880_v24  ;;  %s1523_s19 = sshll.u32 %s2217_s1, 4  ;;  %s2312_s19 = int_to_ptr.vmem [resolvable:$true] %s1523_s19 }
  0x26   : > { %1752 = vmatprep.subr.bf16.mxu0 %v1964_v1  ;;  %s1900_s29 = scalar_lea.vmem %s2312_s19, 512 }
  0x27   : > { %p1901_p11 = scmp.ne.s32.totalorder %s2312_s19, %s1900_s29 }
  0x29   : > { %1753 = vmatpush3.bf16.msra.mxu0 %v1881_v25  ;;  %p1902_p12 = pnand %p1901_p11, %p2095_p5 }
  0x2a   : > { %1764 = vmatprep.subr.bf16.mxu0 %v1964_v1 }
  0x2b   : > { %p1903_p13 = pneg %p1902_p12 }
  0x2c   : > { %1755 = vmatmul.mubr.msk.bf16.vlgmr.msra.gmra.mrb[4].mxu0 %vm623_vm1, %v734_v27 }
  0x2d   : > { %1766 = vmatprep.mubr.msk.bf16.mxu0 %vm1965_vm0, %v1964_v1 }
  0xf6   : > { %v728_v11 = vpop.f32.mrb[0].mxu1 }
  0xf7   : > { %v729_v12 = vadd.f32 %v1668_v9, %v728_v11  ;;  %v1748_v13 = vpop.f32.mrb[1].mxu1  ;;  %v661_v14 = vpop.f32.mrb[0].mxu0 }
  0xf8   : > { %v731_v15 = vpop.f32.mrb[2].mxu1  ;;  %v662_v16 = vadd.f32 %v1664_v10, %v661_v14  ;;  %v1740_v17 = vpop.f32.mrb[1].mxu0  ;;  %v921_v13 = vld [vmem:[%s2379_s11] sm:$0xf] }
  0xf9   : > { %v2154_v18 = vpack.c.bf16 %v729_v12, %v729_v12  ;;  %v1749_v19 = vpop.f32.mrb[3].mxu1  ;;  %v664_v20 = vpop.f32.mrb[2].mxu0 }
  0xfa   : > { %v1741_v21 = vpop.f32.mrb[3].mxu0  ;;  %v2158_v22 = vpack.c.bf16 %v662_v16, %v662_v16  ;;  %v1092_v16 = vsel %vm876_vm3, %v921_v13, 0 }
  0xfb   : > { %926 = vrot.lane.b32.xlu0 %v2154_v18, %s1966_s5  ;;  %v809_v23 = vsel %vm804_vm2, %v2154_v18, 0 }
  0xfc   : > { %1759 = vmatpush3.bf16.xpose.msra.mxu1 %v809_v23 }
  0xfd   : > { %1770 = vmatprep.subr.bf16.mxu1 %v1964_v1 }
  0xff   : > { %923 = vrot.lane.b32.xlu0 %v2158_v22, %s1966_s5  ;;  %v795_v51 = vpop.f32.mrb[4].mxu0 }
 0x100   : > { %v1756_v52 = vpop.f32.mrb[5].mxu0  ;;  %v796_v58 = vadd.f32 %v1672_v57, %v795_v51 }
 0x101   : > { %v798_v53 = vpop.f32.mrb[6].mxu0 }
 0x102   : > { %v1757_v54 = vpop.f32.mrb[7].mxu0  ;;  %v2203_v59 = vpack.c.bf16 %v796_v58, %v796_v58 }
 0x103   : > { %1761 = vmatmul.mubr.msk.bf16.vlgmr.msra.gmra.mrb[4].mxu1 %vm804_vm2, %v2158_v22 }
 0x104   : > { %1772 = vmatprep.mubr.msk.bf16.mxu1 %vm1965_vm0, %v1964_v1  ;;  %v878_v60 = vsel %vm876_vm3, %v2203_v59, 0 }
 0x105   : > { %1765 = vmatpush3.bf16.msra.mxu0 %v878_v60 }
 0x106   : > { %1776 = vmatprep.subr.bf16.mxu0 %v1964_v1 }
 0x16d   : > { %v927_v28 = vpop.permute.xlu0 %926 }
 0x16e   : > { %v932_v29 = vsel %vm804_vm2, %v927_v28, 0 }
 0x16f   : > { %1771 = vmatpush3.bf16.xpose.msra.mxu1 %v932_v29 }
 0x170   : > { %1782 = vmatprep.subr.bf16.mxu1 %v1964_v1 }
 0x171   : > { %v924_v30 = vpop.permute.xlu0 %923 }
 0x176   : > { %1773 = vmatmul.mubr.msk.bf16.vlgmr.msra.gmra.mrb[8].mxu1 %vm804_vm2, %v924_v30 }
 0x177   : > { %1784 = vmatprep.mubr.msk.bf16.mxu1 %vm1965_vm0, %v1964_v1  ;;  %1783 = vmatpush3.bf16.msra.mxu1 %v1046_v8 }
 0x178   : > { %1794 = vmatprep.subr.bf16.mxu1 %v1964_v1 }
 0x1d6   : > { %v845_v31 = vpop.f32.mrb[4].mxu1 }
 0x1d7   : > { %v851_v33 = vmul.f32 0.35355338, %v845_v31  ;;  %v1762_v34 = vpop.f32.mrb[5].mxu1 }
 0x1d8   : > { %v848_v35 = vpop.f32.mrb[6].mxu1 }
 0x1d9   : > { %v1763_v36 = vpop.f32.mrb[7].mxu1  ;;  %v858_v37 = vadd.f32 %v2193_v32, %v851_v33 }
 0x1db   : > { %v859_v38 = vmax.f32 %v858_v37, -1e+30 }
 0x1dd   : > { %v860_v39 = vsel %vm804_vm2, %v859_v38, -inf }
 0x1de   : > { %861 = vmax.xlane.f32.xlu1 %v860_v39 }
 0x249   : > { %v968_v40 = vpop.f32.mrb[8].mxu1 }
 0x24a   : > { %v974_v41 = vmul.f32 0.35355338, %v968_v40  ;;  %v1774_v42 = vpop.f32.mrb[9].mxu1 }
 0x24b   : > { %v971_v43 = vpop.f32.mrb[10].mxu1 }
 0x24c   : > { %v975_v44 = vadd.f32 %v2193_v32, %v974_v41  ;;  %v1775_v45 = vpop.f32.mrb[11].mxu1 }
 0x24e   : > { %v976_v46 = vmax.f32 %v975_v44, -1e+30 }
 0x250   : > { %v977_v47 = vsel %vm804_vm2, %v976_v46, -inf }
 0x251   : > { %978 = vmax.xlane.f32.xlu1 %v977_v47 }
 0x26b   : > { %v862_v48 = vpop.xlane.xlu1 %861 }
 0x26c   : > { %v863_v49 = vsub.f32 %v859_v38, %v862_v48 }
 0x26e   : > { %v864_v50 = vmul.f32 1.442695, %v863_v49 }
 0x270   : > { %1882 = vpow2.f32 %v864_v50 }
 0x27a   : > { %v1883_v55 = vpop.eup %1882 }
 0x27b   : > { %v866_v56 = vsel %vm804_vm2, %v1883_v55, 0.0 }
 0x27c   : > { %867 = vadd.xlane.f32.xlu0 %v866_v56 }
 0x292   : > { %1201 = vrot.lane.b32.xlu0 %v2203_v59, %s1967_s28 }
 0x2de   : > { %v979_v61 = vpop.xlane.xlu1 %978 }
 0x2df   : > { %v980_v62 = vsub.f32 %v976_v46, %v979_v61 }
 0x2e1   : > { %v981_v63 = vmul.f32 1.442695, %v980_v62 }
 0x2e3   : > { %1884 = vpow2.f32 %v981_v63 }
 0x2ed   : > { %v1885_v0 = vpop.eup %1884 }
 0x2ee   : > { %v983_v2 = vsel %vm804_vm2, %v1885_v0, 0.0 }
 0x2ef   : > { %984 = vadd.xlane.f32.xlu1 %v983_v2 }
 0x300   : > { %992 = vrot.lane.b32.xlu1 %v2203_v59, %s1966_s5  ;;  %s1700_s5 = sshll.u32 %s2078_s25, 9  ;;  %s1969_s25 = smov [#allocation2]  }
 0x304   : > { %1136 = vrot.lane.b32.xlu1 %v2154_v18, %s1967_s28 }
 0x308   : > { %1134 = vrot.lane.b32.xlu1 %v2158_v22, %s1967_s28  ;;  %s2316_s28 = scalar_lea.sflag [#allocation3], %s567_s30 }
 0x309   : > { %v868_v3 = vpop.xlane.xlu0 %867 }
 0x30a   : > { %1886 = vrcp.f32 %v868_v3 }
 0x30d   : > { %v1202_v17 = vpop.permute.xlu0 %1201 }
 0x30e   : > { %v1207_v24 = vsel %vm876_vm3, %v1202_v17, 0 }
 0x314   : > { %v1887_v4 = vpop.eup %1886 }
 0x315   : > { %v870_v5 = vmul.f32 %v1887_v4, %v1883_v55 }
 0x317   : > { %871 = vst.msk [vmem:[%s2217_s1] sm:$0xff] %vm804_vm2, %v870_v5  ;;  %v872_v6 = vpack.c.bf16 %v870_v5, %v870_v5 }
 0x319   : > { %1767 = vmatmul.mubr.msk.bf16.vlgmr.msra.gmra.mrb[8].mxu0 %vm804_vm2, %v872_v6 }
 0x31a   : > { %1778 = vmatprep.mubr.msk.bf16.mxu0 %vm1965_vm0, %v1964_v1 }
 0x37c   : > { %v985_v9 = vpop.xlane.xlu1 %984 }
 0x37d   : > { %1888 = vrcp.f32 %v985_v9 }
 0x380   : > { %v993_v10 = vpop.permute.xlu1 %992 }
 0x381   : > { %v998_v11 = vsel %vm876_vm3, %v993_v10, 0 }
 0x382   : > { %1777 = vmatpush3.bf16.msra.mxu0 %v998_v11 }
 0x383   : > { %1788 = vmatprep.subr.bf16.mxu0 %v1964_v1 }
 0x384   : > { %v1137_v26 = vpop.permute.xlu1 %1136 }
 0x385   : > { %v1142_v31 = vsel %vm804_vm2, %v1137_v26, 0 }
 0x387   : > { %v1889_v12 = vpop.eup %1888 }
 0x388   : > { %v987_v14 = vmul.f32 %v1889_v12, %v1885_v0  ;;  %v1135_v34 = vpop.permute.xlu1 %1134 }
 0x38a   : > { %1680 = vst.msk [vmem:[%s2217_s1 + $0x8] sm:$0xff] %vm804_vm2, %v987_v14  ;;  %v990_v15 = vpack.c.bf16 %v987_v14, %v987_v14 }
 0x38c   : > { %1779 = vmatmul.mubr.msk.bf16.vlgmr.msra.gmra.mrb[12].mxu0 %vm804_vm2, %v990_v15 }
 0x38d   : > { %1789 = vmatpush3.bf16.msra.mxu0 %v1092_v16  ;;  %1790 = vmatprep.mubr.msk.bf16.mxu0 %vm1965_vm0, %v1964_v1 }
 0x38e   : > { %1800 = vmatprep.subr.bf16.mxu0 %v1964_v1 }
 0x3ec   : > { %v914_v19 = vpop.f32.mrb[8].mxu0 }
 0x3ed   : > { %v920_v20 = vpack.c.bf16 %v914_v19, %v914_v19  ;;  %v1768_v21 = vpop.f32.mrb[9].mxu0 }
 0x3ee   : > { %v917_v23 = vpop.f32.mrb[10].mxu0 }
 0x3ef   : > { %v1769_v25 = vpop.f32.mrb[11].mxu0  ;;  %1791 = vmatmul.mubr.msk.bf16.vlgmr.msra.gmra.mrb[16].mxu0 %vm804_vm2, %v920_v20 }
 0x3f0   : > { %1801 = vmatpush3.bf16.msra.mxu0 %v1207_v24  ;;  %1802 = vmatprep.mubr.msk.bf16.mxu0 %vm1965_vm0, %v1964_v1 }
 0x3f1   : > { %1812 = vmatprep.subr.bf16.mxu0 %v1964_v1 }
 0x45f   : > { %v1034_v27 = vpop.f32.mrb[12].mxu0 }
 0x460   : > { %v1040_v28 = vpack.c.bf16 %v1034_v27, %v1034_v27  ;;  %v1780_v29 = vpop.f32.mrb[13].mxu0 }
 0x461   : > { %v1037_v30 = vpop.f32.mrb[14].mxu0 }
 0x462   : > { %v1781_v33 = vpop.f32.mrb[15].mxu0  ;;  %1785 = vmatmul.mubr.msk.bf16.vlgmr.msra.gmra.mrb[12].mxu1 %vm804_vm2, %v1040_v28 }
 0x463   : > { %1795 = vmatpush3.bf16.xpose.msra.mxu1 %v1142_v31  ;;  %1796 = vmatprep.mubr.msk.bf16.mxu1 %vm1965_vm0, %v1964_v1 }
 0x464   : > { %1806 = vmatprep.subr.bf16.mxu1 %v1964_v1 }
 0x46a   : > { %1797 = vmatmul.mubr.msk.bf16.vlgmr.msra.gmra.mrb[16].mxu1 %vm804_vm2, %v1135_v34 }
 0x46b   : > { %1808 = vmatprep.mubr.msk.bf16.mxu1 %vm1965_vm0, %v1964_v1 }
 0x4c2   : > { %v1128_v35 = vpop.f32.mrb[16].mxu0 }
 0x4c3   : > { %v1792_v36 = vpop.f32.mrb[17].mxu0 }
 0x4c4   : > { %v1131_v37 = vpop.f32.mrb[18].mxu0 }
 0x4c5   : > { %v1793_v38 = vpop.f32.mrb[19].mxu0 }
 0x535   : > { %v1082_v39 = vpop.f32.mrb[12].mxu1 }
 0x536   : > { %v2254_v40 = vadd.f32 %v1128_v35, %v1082_v39  ;;  %v1786_v41 = vpop.f32.mrb[13].mxu1  ;;  %v1692_v39 = vld [vmem:[%s2380_s12] ss:$0 sm:$0xff] }
 0x537   : > { %v1085_v42 = vpop.f32.mrb[14].mxu1 }
 0x538   : > { %v1787_v43 = vpop.f32.mrb[15].mxu1 }
 0x53d   : > { %v1178_v44 = vpop.f32.mrb[16].mxu1 }
 0x53e   : > { %v1184_v45 = vmul.f32 0.35355338, %v1178_v44  ;;  %v1798_v46 = vpop.f32.mrb[17].mxu1 }
 0x53f   : > { %v1181_v47 = vpop.f32.mrb[18].mxu1 }
 0x540   : > { %v1185_v48 = vadd.f32 %v2193_v32, %v1184_v45  ;;  %v1799_v49 = vpop.f32.mrb[19].mxu1 }
 0x542   : > { %v1186_v50 = vmax.f32 %v1185_v48, -1e+30 }
 0x544   : > { %v1187_v51 = vsel %vm804_vm2, %v1186_v50, -inf }
 0x545   : > { %1188 = vmax.xlane.f32.xlu1 %v1187_v51 }
 0x5d2   : > { %v1189_v52 = vpop.xlane.xlu1 %1188 }
 0x5d3   : > { %v1190_v53 = vsub.f32 %v1186_v50, %v1189_v52 }
 0x5d5   : > { %v1191_v54 = vmul.f32 1.442695, %v1190_v53 }
 0x5d7   : > { %1890 = vpow2.f32 %v1191_v54 }
 0x5e1   : > { %v1891_v55 = vpop.eup %1890 }
 0x5e2   : > { %v1193_v56 = vsel %vm804_vm2, %v1891_v55, 0.0 }
 0x5e3   : > { %1194 = vadd.xlane.f32.xlu0 %v1193_v56 }
 0x5f9   : > { %1300 = vrot.lane.b32.xlu0 %v2154_v18, %s1968_s7 }
 0x5fd   : > { %1298 = vrot.lane.b32.xlu0 %v2158_v22, %s1968_s7  ;;  %v1250_v22 = vld [vmem:[%s2379_s11 + $0x8] sm:$0xf] }
 0x5fe   : > { %v1255_v0 = vsel %vm876_vm3, %v1250_v22, 0 }
 0x5ff   : > { %1807 = vmatpush3.bf16.msra.mxu1 %v1255_v0 }
 0x600   : > { %1818 = vmatprep.subr.bf16.mxu1 %v1964_v1 }
 0x670   : > { %v1195_v57 = vpop.xlane.xlu0 %1194 }
 0x671   : > { %1892 = vrcp.f32 %v1195_v57 }
 0x674   : > { %v1301_v61 = vpop.permute.xlu0 %1300 }
 0x675   : > { %v1306_v63 = vsel %vm804_vm2, %v1301_v61, 0 }
 0x678   : > { %v1299_v18 = vpop.permute.xlu0 %1298 }
 0x67b   : > { %v1893_v58 = vpop.eup %1892 }
 0x67c   : > { %v1197_v60 = vmul.f32 %v1893_v58, %v1891_v55 }
 0x67e   : > { %1685 = vst.msk [vmem:[%s2217_s1 + $0x10] sm:$0xff] %vm804_vm2, %v1197_v60  ;;  %v1200_v62 = vpack.c.bf16 %v1197_v60, %v1197_v60 }
 0x680   : > { %1803 = vmatmul.mubr.msk.bf16.vlgmr.msra.gmra.mrb[20].mxu0 %vm804_vm2, %v1200_v62 }
 0x681   : > { %1813 = vmatpush3.bf16.xpose.msra.mxu0 %v1306_v63  ;;  %1814 = vmatprep.mubr.msk.bf16.mxu0 %vm1965_vm0, %v1964_v1 }
 0x682   : > { %1824 = vmatprep.subr.bf16.mxu0 %v1964_v1 }
 0x688   : > { %1815 = vmatmul.mubr.msk.bf16.vlgmr.msra.gmra.mrb[24].mxu0 %vm804_vm2, %v1299_v18 }
 0x689   : > { %1826 = vmatprep.mubr.msk.bf16.mxu0 %vm1965_vm0, %v1964_v1 }
 0x753   : > { %v1243_v2 = vpop.f32.mrb[20].mxu0 }
 0x754   : > { %v1249_v3 = vpack.c.bf16 %v1243_v2, %v1243_v2  ;;  %v1804_v4 = vpop.f32.mrb[21].mxu0 }
 0x755   : > { %v1246_v5 = vpop.f32.mrb[22].mxu0 }
 0x756   : > { %v1805_v6 = vpop.f32.mrb[23].mxu0  ;;  %1809 = vmatmul.mubr.msk.bf16.vlgmr.msra.gmra.mrb[20].mxu1 %vm804_vm2, %v1249_v3 }
 0x757   : > { %1820 = vmatprep.mubr.msk.bf16.mxu1 %vm1965_vm0, %v1964_v1  ;;  %v1414_v1 = vld [vmem:[%s2379_s11 + $0xc] sm:$0xf] }
 0x75b   : > { %v1342_v7 = vpop.f32.mrb[24].mxu0 }
 0x75c   : > { %v1348_v8 = vmul.f32 0.35355338, %v1342_v7  ;;  %v1816_v9 = vpop.f32.mrb[25].mxu0 }
 0x75d   : > { %v1345_v10 = vpop.f32.mrb[26].mxu0 }
 0x75e   : > { %v1349_v11 = vadd.f32 %v2193_v32, %v1348_v8  ;;  %v1817_v12 = vpop.f32.mrb[27].mxu0  ;;  %v1419_v32 = vsel %vm876_vm3, %v1414_v1, 0 }
 0x75f   : > { %1825 = vmatpush3.bf16.msra.mxu0 %v1419_v32 }
 0x760   : > { %v1350_v13 = vmax.f32 %v1349_v11, -1e+30 }
 0x762   : > { %v1351_v14 = vsel %vm804_vm2, %v1350_v13, -inf }
 0x763   : > { %1352 = vmax.xlane.f32.xlu0 %v1351_v14 }
 0x7f0   : > { %v1353_v15 = vpop.xlane.xlu0 %1352 }
 0x7f1   : > { %v1354_v16 = vsub.f32 %v1350_v13, %v1353_v15 }
 0x7f3   : > { %v1355_v17 = vmul.f32 1.442695, %v1354_v16 }
 0x7f5   : > { %1894 = vpow2.f32 %v1355_v17 }
 0x7ff   : > { %v1895_v19 = vpop.eup %1894 }
 0x800   : > { %v1357_v20 = vsel %vm804_vm2, %v1895_v19, 0.0 }
 0x801   : > { %1358 = vadd.xlane.f32.xlu1 %v1357_v20 }
 0x812   : > { %1365 = vrot.lane.b32.xlu1 %v2203_v59, %s1968_s7  ;;  %s585_s7 = scalar_lea.vmem %s2371_s3, %s2130_s26 }
 0x813   : > { %v597_v43 = vld [vmem:[%s585_s7] sm:$0xff]  ;;  %s2310_s7 = scalar_lea.hbm %s2384_s16, %s1700_s5 }
 0x829   : > { %v1291_v21 = vpop.f32.mrb[20].mxu1 }
 0x82a   : > { %v1297_v23 = vadd.f32 %v1291_v21, %v2254_v40  ;;  %v1810_v24 = vpop.f32.mrb[21].mxu1 }
 0x82b   : > { %v1294_v25 = vpop.f32.mrb[22].mxu1 }
 0x82c   : > { %v1811_v26 = vpop.f32.mrb[23].mxu1 }
 0x88e   : > { %v1359_v27 = vpop.xlane.xlu1 %1358 }
 0x88f   : > { %1896 = vrcp.f32 %v1359_v27 }
 0x892   : > { %v1366_v28 = vpop.permute.xlu1 %1365 }
 0x893   : > { %v1371_v59 = vsel %vm876_vm3, %v1366_v28, 0 }
 0x894   : > { %1819 = vmatpush3.bf16.msra.mxu1 %v1371_v59 }
 0x899   : > { %v1897_v29 = vpop.eup %1896 }
 0x89a   : > { %v1361_v30 = vmul.f32 %v1897_v29, %v1895_v19 }
 0x89c   : > { %1689 = vst.msk [vmem:[%s2217_s1 + $0x18] sm:$0xff] %vm804_vm2, %v1361_v30  ;;  %v1364_v31 = vpack.c.bf16 %v1361_v30, %v1361_v30  ;;  %s1904_s1 = sshll.u32 %s1969_s25, 4  ;;  %s1905_s1 = int_to_ptr.vmem [resolvable:$false] %s1904_s1 }
 0x89d   : > { %s1906_s2 = scalar_lea.vmem %s1905_s1, 1024  ;;  %p1907_p0 = scmp.lt.s32.totalorder %s2312_s19, %s1905_s1 }
 0x89e   : > { %1821 = vmatmul.mubr.msk.bf16.vlgmr.msra.gmra.mrb[24].mxu1 %vm804_vm2, %v1364_v31  ;;  %p1908_p1 = scmp.lt.s32.totalorder %s1906_s2, %s1900_s29 }
 0x8a0   : > { %p1909_p2 = por %p1908_p1, %p1907_p0 }
 0x8a2   : > { %p1910_p3 = pnand %p1909_p2, %p1903_p13 }
 0x971   : > { %v1407_v33 = vpop.f32.mrb[24].mxu1 }
 0x972   : > { %v1413_v34 = vpack.c.bf16 %v1407_v33, %v1407_v33  ;;  %v1822_v35 = vpop.f32.mrb[25].mxu1 }
 0x973   : > { %v1410_v36 = vpop.f32.mrb[26].mxu1 }
 0x974   : > { %v1823_v37 = vpop.f32.mrb[27].mxu1  ;;  %1827 = vmatmul.mubr.msk.bf16.vlgmr.msra.gmra.mrb[28].mxu0 %vm804_vm2, %v1413_v34 }
 0xa47   : > { %v1455_v38 = vpop.f32.mrb[28].mxu0 }
 0xa48   : > { %v1461_v40 = vadd.f32 %v1455_v38, %v1297_v23  ;;  %v1828_v41 = vpop.f32.mrb[29].mxu0 }
 0xa49   : > { %v1458_v42 = vpop.f32.mrb[30].mxu0 }
 0xa4a   : > { %v1469_v44 = vadd.f32 %v1692_v39, %v1461_v40  ;;  %v1829_v45 = vpop.f32.mrb[31].mxu0 }
 0xa4c   : > { %v1470_v46 = vadd.f32 %v1469_v44, %v597_v43 }
 0xa4e   : > { %v1471_v47 = vsel %vm623_vm1, %v1470_v46, 0.0 }
 0xa4f   : > { %1472 = vadd.xlane.f32.xlu1 %v1471_v47 }
 0xadc   : > { %v1473_v48 = vpop.xlane.xlu1 %1472 }
 0xadd   : > { %v1475_v49 = vmul.f32 0.03125, %v1473_v48 }
 0xadf   : > { %v1476_v50 = vsub.f32 %v1470_v46, %v1475_v49 }
 0xae1   : > { %v1477_v51 = vmul.f32 %v1476_v50, %v1476_v50 }
 0xae3   : > { %v1478_v52 = vsel %vm623_vm1, %v1477_v51, 0.0 }
 0xae4   : > { %1479 = vadd.xlane.f32.xlu0 %v1478_v52 }
 0xae5   : > { %1913 = shalt.err (!%p1910_p3)
}
 0xae6   : > { %s1914_s30 = scalar_lea.hbm %s2310_s7, 512  ;;  %s1918_s18 = scalar_lea.hbm %s2384_s16, 1024 }
 0xae7   : > { %p1915_p4 = scmp.ne.s32.totalorder %s2310_s7, %s1914_s30  ;;  %p1919_p9 = scmp.lt.u32.totalorder %s2310_s7, %s2384_s16 }
 0xae8   : > { %p1920_p10 = scmp.lt.u32.totalorder %s1918_s18, %s1914_s30  ;;  %p1922_p12 = scmp.lt.u32.totalorder %s1914_s30, %s2310_s7 }
 0xae9   : > { %p1916_p7 = pnand %p1915_p4, %p2095_p5 }
 0xaea   : > { %p1921_p11 = por %p1920_p10, %p1919_p9 }
 0xaeb   : > { %p1917_p8 = pneg %p1916_p7 }
 0xaec   : > { %p1923_p13 = por %p1922_p12, %p1921_p11 }
 0xaee   : > { %p1924_p0 = pnand %p1923_p13, %p1917_p8 }
 0xaf0   : > { %1927 = shalt.err (!%p1924_p0)
}
 0xaf1   : > { %s1970_s2 = smov 128   ;;  %s1971_s29 = smov 8   ;;  %v1693_v57 = vld [vmem:[%s2381_s13] ss:$0 sm:$0xff] }
 0xaf2   : > { %1830 = dma.vmem_to_hbm [thread:$0]  (%p2095_p5), %s2312_s19, 512, %s2310_s7, %s2316_s28, %s1970_s2, %s1970_s2, %s1971_s29  }
 0xaf3   : > { %v1694_v60 = vld [vmem:[%s2382_s14] ss:$0 sm:$0xff]  ;;  %s592_s0 = scalar_lea.vmem %s2383_s15, %s2130_s26 }
 0xb71   : > { %v1480_v53 = vpop.xlane.xlu0 %1479 }
 0xb72   : > { %v1481_v54 = vmul.f32 0.03125, %v1480_v53 }
 0xb74   : > { %v1482_v55 = vadd.f32 1e-05, %v1481_v54 }
 0xb76   : > { %1898 = vrsqrt.f32 %v1482_v55 }
 0xb80   : > { %v1899_v56 = vpop.eup %1898 }
 0xb81   : > { %v1484_v58 = vmul.f32 %v1899_v56, %v1476_v50 }
 0xb83   : > { %v1492_v61 = vmul.f32 %v1693_v57, %v1484_v58 }
 0xb85   : > { %v1500_v62 = vadd.f32 %v1694_v60, %v1492_v61 }
 0xb87   : > { %1501 = vst.msk [vmem:[%s592_s0] sm:$0xff] %vm623_vm1, %v1500_v62 }
 0xb88 PF: > { %p1836_p5 = scmp.ge.s32.totalorder %s1962_s24, 2  ;;  %s1545_s19 = sand.u32 1, %s1950_s21  }
 0xb89   : > { %s1546_s7 = scalar_lea.sflag [#allocation3], %s1545_s19 }
 0xb8a   : > { %p1833_p1 = pnand %p1836_p5, %p2099_p6 }
 0xb8c   : > { %1945 = dma.done.wait (!%p1833_p1), %s1546_s7, 512  }
 0xb8d   : > { %1947 = vsyncadd (!%p1833_p1), %s1546_s7, 4294966784  ;;  %s2398_s28 = sld [smem:[#allocation5_spill]]  ;;  %p27_p2 = scmp.ge.s32.totalorder %s2082_s27, 4  }
 0xb8e   : > { %s2399_s21 = smov %s1954_s22  ;;  %s2400_s22 = smov %s1958_s23 }
 0xb8f   : > { %s2402_s24 = smov %s2082_s27  ;;  %29 = sbr.rel (!%p27_p2) target bundleno = 9 (0x9), region = 142 }
 0xb93   : > { %s2401_s23 = smov %s2398_s28 }
 0xb96   :  { %1551 = vsyncpa [#allocation3], 1 }
 0xb97   :  { %1553 = vsyncpa [#allocation3 + $0x1], 1 }

// kernel: transformer_forward.21
= control target key start
LH: loop header
LB: loop body
LE: loop exit
PB: predicated region body
PF: predicated region fallthrough
CT: control target
= control target key end

     0   :  { %v172_v1 = vmov 0.0   ;;  %vm173_vm0 = vmmov 0   ;;  %vm20_vm1 = vcmask 523264   ;;  %s230_s0 = inlined_call_operand.vmem [shape: f32[16,32], index: 0, kind: input, shape index: {}]   ;;  %s231_s1 = inlined_call_operand.vmem [shape: bf16[32,64], index: 1, kind: input, shape index: {}]   ;;  %s232_s2 = inlined_call_operand.vmem [shape: f32[1,64], index: 2, kind: input, shape index: {}]   ;;  %s233_s3 = inlined_call_operand.hbm [shape: f32[16,64], index: 3, kind: output, shape index: {}]  }
   0x1   :  { %v146_v0 = vld [vmem:[%s231_s1] sm:$0xff]   ;;  %133 = vmatprep.subr.bf16.mxu0 %v172_v1  ;;  %v147_v2 = vld [vmem:[%s231_s1 + $0x8] sm:$0xff]   ;;  %137 = vmatprep.mubr.msk.bf16.mxu0 %vm173_vm0, %v172_v1 }
   0x2   :  { %134 = vmatpush3.bf16.msra.mxu0 %v146_v0  ;;  %v25_v3 = vld [vmem:[%s230_s0] sm:$0xff]  ;;  %v26_v4 = vld [vmem:[%s230_s0 + $0x8] sm:$0xff] }
   0x3   :  { %8 = vsyncpa [#allocation4], 0  ;;  %135 = vmatprep.subr.bf16.mxu0 %v172_v1  ;;  %21 = vst.msk [vmem:[#allocation2] sm:$0xff] %vm20_vm1, %v172_v1  ;;  %v27_v5 = vpack.c.bf16 %v26_v4, %v25_v3  ;;  %vm44_vm2 = vcmask 261120   ;;  %v129_v14 = vld [vmem:[%s232_s2] ss:$0 sm:$0xff] }
   0x4   :  { %22 = vst.msk [vmem:[#allocation2 + $0x8] sm:$0xff] %vm20_vm1, %v172_v1  ;;  %s174_s20 = smov [#allocation3]  }
   0x5   :  { %s115_s21 = sshll.u32 %s174_s20, 4  ;;  %s116_s21 = int_to_ptr.vmem [resolvable:$true] %s115_s21 }
   0x6   :  { %136 = vmatpush3.bf16.msra.mxu0 %v147_v2  ;;  %s148_s22 = scalar_lea.vmem %s116_s21, 256  ;;  %p153_p1 = scmp.lt.s32.totalorder %s116_s21, %s116_s21 }
   0x7   :  { %p149_p0 = scmp.ne.s32.totalorder %s116_s21, %s148_s22  ;;  %p154_p2 = scmp.lt.s32.totalorder %s148_s22, %s148_s22 }
   0x9   :  { %138 = vmatmul.mubr.msk.bf16.vlgmr.msra.gmra.mrb[0].mxu0 %vm44_vm2, %v27_v5  ;;  %p155_p3 = por %p154_p2, %p153_p1 }
   0xa   :  { %v23_v6 = vld [vmem:[#allocation2] sm:$0xff] }
   0xb   :  { %v24_v8 = vld [vmem:[#allocation2 + $0x8] sm:$0xff]  ;;  %p156_p4 = pnand %p155_p3, %p149_p0 }
  0xdc   :  { %v82_v7 = vpop.f32.mrb[0].mxu0 }
  0xdd   :  { %v89_v9 = vadd.f32 %v82_v7, %v23_v6  ;;  %v139_v10 = vpop.f32.mrb[1].mxu0 }
  0xde   :  { %v85_v11 = vpop.f32.mrb[2].mxu0 }
  0xdf   :  { %92 = vst.msk [vmem:[#allocation2] sm:$0xff] %vm20_vm1, %v89_v9  ;;  %v90_v12 = vadd.f32 %v85_v11, %v24_v8  ;;  %v140_v13 = vpop.f32.mrb[3].mxu0 }
  0xe1   :  { %93 = vst.msk [vmem:[#allocation2 + $0x8] sm:$0xff] %vm20_vm1, %v90_v12 }
  0xe6   :  { %v97_v15 = vld [vmem:[#allocation2] sm:$0xff] }
  0xe7   :  { %v106_v16 = vadd.f32 %v129_v14, %v97_v15 }
  0xe8   :  { %v98_v17 = vld [vmem:[#allocation2 + $0x8] sm:$0xff] }
  0xe9   :  { %v107_v18 = vadd.f32 %v129_v14, %v98_v17  ;;  %108 = vst.msk [vmem:[#allocation3] sm:$0xff] %vm20_vm1, %v106_v16 }
  0xeb   :  { %109 = vst.msk [vmem:[#allocation3 + $0x8] sm:$0xff] %vm20_vm1, %v107_v18 }
  0xec   :  { %159 = shalt.err (!%p156_p4)
}
  0xed   :  { %s160_s24 = scalar_lea.hbm %s233_s3, 256 }
  0xee   :  { %p161_p5 = scmp.ne.s32.totalorder %s233_s3, %s160_s24  ;;  %p164_p6 = scmp.lt.u32.totalorder %s160_s24, %s233_s3 }
  0xf0   :  { %p166_p7 = pnand %p164_p6, %p161_p5 }
  0xf2   :  { %169 = shalt.err (!%p166_p7)
}
  0xf3   :  { %s175_s29 = smov 128   ;;  %s176_s30 = smov 8  }
  0xf4   :  { %121 = dma.vmem_to_hbm [thread:$0]  %s116_s21, 256, %s233_s3, [#allocation4], %s175_s29, %s175_s29, %s176_s30  }
  0xf5   :  { %170 = dma.done.wait [#allocation4], 256  }
  0xf6   :  { %171 = vsyncadd [#allocation4], 4294967040 }
  0xf7   :  { %125 = vsyncpa [#allocation4], 1 }

</bundles_post_ra>
